<compile_context>
chip_gen: v6e
topology: v6e:2x2x1
jax: 0.10.0
libtpu: 0.0.40
codegen_flags: <defaults>
</compile_context>

<pallas_src>
from functools import partial

import jax
import jax.numpy as jnp
from jax.experimental import pallas as pl
from jax.experimental.pallas import tpu as pltpu


_TAPS = tuple((dy, dx) for dy in (-1, 0, 1) for dx in (-1, 0, 1))


def _shift_minor(x, k, size):
    """out[..., p] = x[..., (p + k) % size]  (k is a static Python int)."""
    kk = k % size
    if kk == 0:
        return x
    if size % 128 == 0:
        # One XLU lane rotation (jnp.roll semantics: out[p] = x[(p - s) % size]).
        return pltpu.roll(x, (-k) % size, axis=x.ndim - 1)
    # Fallback for minor dims that are not a multiple of 128.
    return jnp.concatenate([x[..., kk:], x[..., :kk]], axis=-1)


def sphere_block_kernel(x_ref, m_ref, w1_ref, w2_ref, o_ref, *, Bt, C, W, HW):
    """One grid step: conv3x3+ReLU, conv3x3+ReLU, +residual on a (Bt*C, HW) slab.

    x_ref : (1, Bt*C, HW) input slab (rows = image-major: b*C + channel)
    m_ref : (9, HW) f32   per-tap validity masks (1 = neighbour in bounds)
    w*_ref: (C, 9*C+1)    weight tables; column t*C+ci = w[:, ci, ky, kx], last = bias
    o_ref : (1, Bt*C, HW) output slab
    """
    # Per-tap masks, loaded once and shared by both convs (center tap needs none).
    tap_masks = [None if (dy == 0 and dx == 0) else m_ref[t:t + 1, :]
                 for t, (dy, dx) in enumerate(_TAPS)]

    def conv3x3_relu(x, w_ref):
        wt = w_ref[...]                                        # (C, 9*C+1) in vregs
        bias_col = wt[:, 9 * C:9 * C + 1]                      # (C, 1)
        accs = [jnp.zeros((C, HW), jnp.float32) + bias_col for _ in range(Bt)]
        for t, (dy, dx) in enumerate(_TAPS):
            # Shift the whole slab so lane p holds input(y+dy, x+dx); zero the
            # out-of-bounds positions (this emulates the conv's zero padding).
            xt = _shift_minor(x, dy * W + dx, HW)
            if tap_masks[t] is not None:
                xt = xt * tap_masks[t]
            for ci in range(C):
                wcol = wt[:, t * C + ci:t * C + ci + 1]        # (C, 1)
                for b in range(Bt):
                    patch = xt[b * C + ci:b * C + ci + 1, :]   # (1, HW)
                    accs[b] = accs[b] + wcol * patch           # outer-product FMA
        out = accs[0] if Bt == 1 else jnp.concatenate(accs, axis=0)
        return jnp.maximum(out, 0.0)

    h = conv3x3_relu(x_ref[0].astype(jnp.float32), w1_ref)
    h = conv3x3_relu(h, w2_ref)
    # Residual: re-read the (still VMEM-resident) input block instead of keeping
    # the upcast copy live across both convs.
    o_ref[0] = (h + x_ref[0].astype(jnp.float32)).astype(o_ref.dtype)


def sphere_block(x_nchw, w1_oihw, b1, w2_oihw, b2):
    """x_nchw: (N, C, H, W); weights in PyTorch OIHW (C, C, 3, 3); biases (C,)."""
    N, C, H, W = x_nchw.shape
    HW = H * W
    itemsize = jnp.dtype(x_nchw.dtype).itemsize

    # ---- batch tile (Bt) and VMEM budget, derived from the device -------------
    try:
        vmem_cap = int(getattr(pltpu.get_tpu_info(), "vmem_capacity_bytes"))
    except Exception:
        vmem_cap = 64 * 1024 * 1024        # conservative default (v7x per-TC)
    per_image = C * HW * itemsize
    target_block = max(per_image, min(1 << 20, vmem_cap // 32))
    bt_cap = max(1, target_block // per_image)
    bt_cap = min(bt_cap, max(1, 64 // C))  # bound the fully-unrolled FMA count
    Bt = 1
    for d in range(1, N + 1):
        if N % d == 0 and d <= bt_cap:
            Bt = d
    G = N // Bt
    # v7x megacore: prefer >=2 (even) grid steps when it does not cost sublane fill.
    if G == 1 and N % 2 == 0 and (N // 2) * C >= 8:
        Bt, G = N // 2, 2
    R = Bt * C

    x3 = x_nchw.reshape(G, R, HW)          # contiguous view; no HBM transpose

    # ---- per-tap validity masks (9, HW): 1 where the tap's neighbour exists ----
    p = jnp.arange(HW, dtype=jnp.int32)
    xc = p % W
    ok = {(-1, 'y'): p >= W, (1, 'y'): p < HW - W,
          (-1, 'x'): xc > 0, (1, 'x'): xc < W - 1}
    rows = []
    for dy, dx in _TAPS:
        m = jnp.ones((HW,), jnp.bool_)
        if dy != 0:
            m = m & ok[(dy, 'y')]
        if dx != 0:
            m = m & ok[(dx, 'x')]
        rows.append(m)
    masks = jnp.stack(rows, axis=0).astype(jnp.float32)            # (9, HW)

    # ---- weight tables (C, 9*C+1): column t*C+ci = w[:, ci, ky, kx]; last = bias
    def wtab(w, b):
        t = jnp.transpose(w.astype(jnp.float32), (2, 3, 1, 0)).reshape(9 * C, C).T
        return jnp.concatenate([t, b.astype(jnp.float32)[:, None]], axis=1)

    w1t, w2t = wtab(w1_oihw, b1), wtab(w2_oihw, b2)

    flops = 2 * 2 * 9 * C * C * HW * N                             # two convs, mul+add
    bytes_accessed = int(2 * N * C * HW * itemsize
                         + (w1t.size + w2t.size + masks.size) * 4)
    slab_f32 = R * HW * 4
    vmem_limit = int(min(vmem_cap, max(4 << 20, 12 * slab_f32 + (2 << 20))))

    kernel = partial(sphere_block_kernel, Bt=Bt, C=C, W=W, HW=HW)

    out3 = pl.pallas_call(
        kernel,
        out_shape=jax.ShapeDtypeStruct((G, R, HW), x_nchw.dtype),
        grid=(G,),
        in_specs=[
            pl.BlockSpec((1, R, HW), lambda n: (n, 0, 0)),         # x slab (pipelined)
            pl.BlockSpec((9, HW), lambda n: (0, 0)),               # tap masks (invariant)
            pl.BlockSpec((C, 9 * C + 1), lambda n: (0, 0)),        # conv1 weights+bias
            pl.BlockSpec((C, 9 * C + 1), lambda n: (0, 0)),        # conv2 weights+bias
        ],
        out_specs=pl.BlockSpec((1, R, HW), lambda n: (n, 0, 0)),
        compiler_params=pltpu.CompilerParams(
            dimension_semantics=("parallel",),                     # megacore batch split
            vmem_limit_bytes=vmem_limit),
        cost_estimate=pl.CostEstimate(flops=flops, transcendentals=0,
                                      bytes_accessed=bytes_accessed),
    )(x3, masks, w1t, w2t)

    return out3.reshape(N, C, H, W)


def ref_sphere_block(x_nchw, w1_oihw, b1, w2_oihw, b2):
    """Pure-JAX reference matching PyTorch semantics (NCHW, OIHW)."""
    dn = ('NCHW', 'OIHW', 'NCHW')
    out = jax.lax.conv_general_dilated(x_nchw, w1_oihw, (1, 1), ((1, 1), (1, 1)),
                                       dimension_numbers=dn)
    out = jnp.maximum(out + b1[None, :, None, None], 0.0)
    out = jax.lax.conv_general_dilated(out, w2_oihw, (1, 1), ((1, 1), (1, 1)),
                                       dimension_numbers=dn)
    out = jnp.maximum(out + b2[None, :, None, None], 0.0)
    return out + x_nchw


if __name__ == "__main__":
    # Small deterministic setup: batch=2, planes=4, spatial=16x16.
    Nb, C, H, W = 2, 4, 16, 16
    key = jax.random.PRNGKey(0)
    kx, kw1, kw2 = jax.random.split(key, 3)

    x = jax.random.normal(kx, (Nb, C, H, W), dtype=jnp.float32)

    # SphereBlock._init_weight: normal(std=0.01) weights, zero biases (OIHW layout).
    w1 = 0.01 * jax.random.normal(kw1, (C, C, 3, 3), dtype=jnp.float32)
    b1 = jnp.zeros((C,), dtype=jnp.float32)
    w2 = 0.01 * jax.random.normal(kw2, (C, C, 3, 3), dtype=jnp.float32)
    b2 = jnp.zeros((C,), dtype=jnp.float32)

    out = jax.block_until_ready(sphere_block(x, w1, b1, w2, b2))

    ref = ref_sphere_block(x, w1, b1, w2, b2)
    assert out.shape == ref.shape and out.dtype == ref.dtype
    assert jnp.allclose(out, ref, atol=1e-5, rtol=1e-5), "mismatch vs reference"

    print("KERNEL_OK")
</pallas_src>

<mosaic_0001>
module attributes {stable_mosaic.version = 11 : i64} {
  func.func @sphere_block_kernel(%arg0: i32, %arg1: memref<1x8x256xf32, #tpu.memory_space<vmem>>, %arg2: memref<9x256xf32, #tpu.memory_space<vmem>>, %arg3: memref<4x37xf32, #tpu.memory_space<vmem>>, %arg4: memref<4x37xf32, #tpu.memory_space<vmem>>, %arg5: memref<1x8x256xf32, #tpu.memory_space<vmem>>) attributes {dimension_semantics = [#tpu.dimension_semantics<parallel>], iteration_bounds = array<i64: 1>, scalar_prefetch = 0 : i64, scratch_operands = 0 : i64, tpu.core_type = #tpu.core_type<tc>, window_params = [{transform_indices = @transform_0, window_bounds = array<i64: 1, 8, 256>}, {pipeline_mode = #tpu.pipeline_mode<synchronous>, transform_indices = @transform_1, window_bounds = array<i64: 9, 256>}, {pipeline_mode = #tpu.pipeline_mode<synchronous>, transform_indices = @transform_2, window_bounds = array<i64: 4, 37>}, {pipeline_mode = #tpu.pipeline_mode<synchronous>, transform_indices = @transform_3, window_bounds = array<i64: 4, 37>}, {transform_indices = @transform_4, window_bounds = array<i64: 1, 8, 256>}]} {
    %c0 = arith.constant 0 : index
    %c0_0 = arith.constant 0 : index
    %0 = vector.load %arg2[%c0, %c0_0] : memref<9x256xf32, #tpu.memory_space<vmem>>, vector<1x256xf32>
    %c1 = arith.constant 1 : index
    %c0_1 = arith.constant 0 : index
    %1 = vector.load %arg2[%c1, %c0_1] : memref<9x256xf32, #tpu.memory_space<vmem>>, vector<1x256xf32>
    %c2 = arith.constant 2 : index
    %c0_2 = arith.constant 0 : index
    %2 = vector.load %arg2[%c2, %c0_2] : memref<9x256xf32, #tpu.memory_space<vmem>>, vector<1x256xf32>
    %c3 = arith.constant 3 : index
    %c0_3 = arith.constant 0 : index
    %3 = vector.load %arg2[%c3, %c0_3] : memref<9x256xf32, #tpu.memory_space<vmem>>, vector<1x256xf32>
    %c5 = arith.constant 5 : index
    %c0_4 = arith.constant 0 : index
    %4 = vector.load %arg2[%c5, %c0_4] : memref<9x256xf32, #tpu.memory_space<vmem>>, vector<1x256xf32>
    %c6 = arith.constant 6 : index
    %c0_5 = arith.constant 0 : index
    %5 = vector.load %arg2[%c6, %c0_5] : memref<9x256xf32, #tpu.memory_space<vmem>>, vector<1x256xf32>
    %c7 = arith.constant 7 : index
    %c0_6 = arith.constant 0 : index
    %6 = vector.load %arg2[%c7, %c0_6] : memref<9x256xf32, #tpu.memory_space<vmem>>, vector<1x256xf32>
    %c8 = arith.constant 8 : index
    %c0_7 = arith.constant 0 : index
    %7 = vector.load %arg2[%c8, %c0_7] : memref<9x256xf32, #tpu.memory_space<vmem>>, vector<1x256xf32>
    %c0_8 = arith.constant 0 : index
    %c0_9 = arith.constant 0 : index
    %c0_10 = arith.constant 0 : index
    %8 = vector.load %arg1[%c0_8, %c0_9, %c0_10] : memref<1x8x256xf32, #tpu.memory_space<vmem>>, vector<1x8x256xf32>
    %9 = vector.shape_cast %8 : vector<1x8x256xf32> to vector<8x256xf32>
    %c0_11 = arith.constant 0 : index
    %c0_12 = arith.constant 0 : index
    %10 = vector.load %arg3[%c0_11, %c0_12] : memref<4x37xf32, #tpu.memory_space<vmem>>, vector<4x37xf32>
    %11 = vector.extract_strided_slice %10 {offsets = [0, 36], sizes = [4, 1], strides = [1, 1]} : vector<4x37xf32> to vector<4x1xf32>
    %cst = arith.constant 0.000000e+00 : f32
    %12 = vector.broadcast %cst : f32 to vector<4x256xf32>
    %13 = vector.broadcast %11 : vector<4x1xf32> to vector<4x256xf32>
    %14 = arith.addf %12, %13 : vector<4x256xf32>
    %cst_13 = arith.constant 0.000000e+00 : f32
    %15 = vector.broadcast %cst_13 : f32 to vector<4x256xf32>
    %16 = vector.broadcast %11 : vector<4x1xf32> to vector<4x256xf32>
    %17 = arith.addf %15, %16 : vector<4x256xf32>
    %c17_i32 = arith.constant 17 : i32
    %18 = tpu.dynamic_rotate %9 by %c17_i32 dim 1 : vector<8x256xf32>, i32 -> vector<8x256xf32>
    %19 = vector.broadcast %0 : vector<1x256xf32> to vector<8x256xf32>
    %20 = arith.mulf %18, %19 : vector<8x256xf32>
    %21 = vector.extract_strided_slice %10 {offsets = [0, 0], sizes = [4, 1], strides = [1, 1]} : vector<4x37xf32> to vector<4x1xf32>
    %22 = vector.extract_strided_slice %20 {offsets = [0, 0], sizes = [1, 256], strides = [1, 1]} : vector<8x256xf32> to vector<1x256xf32>
    %23 = vector.broadcast %21 : vector<4x1xf32> to vector<4x256xf32>
    %24 = vector.broadcast %22 : vector<1x256xf32> to vector<4x256xf32>
    %25 = arith.mulf %23, %24 : vector<4x256xf32>
    %26 = arith.addf %14, %25 : vector<4x256xf32>
    %27 = vector.extract_strided_slice %20 {offsets = [4, 0], sizes = [1, 256], strides = [1, 1]} : vector<8x256xf32> to vector<1x256xf32>
    %28 = vector.broadcast %21 : vector<4x1xf32> to vector<4x256xf32>
    %29 = vector.broadcast %27 : vector<1x256xf32> to vector<4x256xf32>
    %30 = arith.mulf %28, %29 : vector<4x256xf32>
    %31 = arith.addf %17, %30 : vector<4x256xf32>
    %32 = vector.extract_strided_slice %10 {offsets = [0, 1], sizes = [4, 1], strides = [1, 1]} : vector<4x37xf32> to vector<4x1xf32>
    %33 = vector.extract_strided_slice %20 {offsets = [1, 0], sizes = [1, 256], strides = [1, 1]} : vector<8x256xf32> to vector<1x256xf32>
    %34 = vector.broadcast %32 : vector<4x1xf32> to vector<4x256xf32>
    %35 = vector.broadcast %33 : vector<1x256xf32> to vector<4x256xf32>
    %36 = arith.mulf %34, %35 : vector<4x256xf32>
    %37 = arith.addf %26, %36 : vector<4x256xf32>
    %38 = vector.extract_strided_slice %20 {offsets = [5, 0], sizes = [1, 256], strides = [1, 1]} : vector<8x256xf32> to vector<1x256xf32>
    %39 = vector.broadcast %32 : vector<4x1xf32> to vector<4x256xf32>
    %40 = vector.broadcast %38 : vector<1x256xf32> to vector<4x256xf32>
    %41 = arith.mulf %39, %40 : vector<4x256xf32>
    %42 = arith.addf %31, %41 : vector<4x256xf32>
    %43 = vector.extract_strided_slice %10 {offsets = [0, 2], sizes = [4, 1], strides = [1, 1]} : vector<4x37xf32> to vector<4x1xf32>
    %44 = vector.extract_strided_slice %20 {offsets = [2, 0], sizes = [1, 256], strides = [1, 1]} : vector<8x256xf32> to vector<1x256xf32>
    %45 = vector.broadcast %43 : vector<4x1xf32> to vector<4x256xf32>
    %46 = vector.broadcast %44 : vector<1x256xf32> to vector<4x256xf32>
    %47 = arith.mulf %45, %46 : vector<4x256xf32>
    %48 = arith.addf %37, %47 : vector<4x256xf32>
    %49 = vector.extract_strided_slice %20 {offsets = [6, 0], sizes = [1, 256], strides = [1, 1]} : vector<8x256xf32> to vector<1x256xf32>
    %50 = vector.broadcast %43 : vector<4x1xf32> to vector<4x256xf32>
    %51 = vector.broadcast %49 : vector<1x256xf32> to vector<4x256xf32>
    %52 = arith.mulf %50, %51 : vector<4x256xf32>
    %53 = arith.addf %42, %52 : vector<4x256xf32>
    %54 = vector.extract_strided_slice %10 {offsets = [0, 3], sizes = [4, 1], strides = [1, 1]} : vector<4x37xf32> to vector<4x1xf32>
    %55 = vector.extract_strided_slice %20 {offsets = [3, 0], sizes = [1, 256], strides = [1, 1]} : vector<8x256xf32> to vector<1x256xf32>
    %56 = vector.broadcast %54 : vector<4x1xf32> to vector<4x256xf32>
    %57 = vector.broadcast %55 : vector<1x256xf32> to vector<4x256xf32>
    %58 = arith.mulf %56, %57 : vector<4x256xf32>
    %59 = arith.addf %48, %58 : vector<4x256xf32>
    %60 = vector.extract_strided_slice %20 {offsets = [7, 0], sizes = [1, 256], strides = [1, 1]} : vector<8x256xf32> to vector<1x256xf32>
    %61 = vector.broadcast %54 : vector<4x1xf32> to vector<4x256xf32>
    %62 = vector.broadcast %60 : vector<1x256xf32> to vector<4x256xf32>
    %63 = arith.mulf %61, %62 : vector<4x256xf32>
    %64 = arith.addf %53, %63 : vector<4x256xf32>
    %c16_i32 = arith.constant 16 : i32
    %65 = tpu.dynamic_rotate %9 by %c16_i32 dim 1 : vector<8x256xf32>, i32 -> vector<8x256xf32>
    %66 = vector.broadcast %1 : vector<1x256xf32> to vector<8x256xf32>
    %67 = arith.mulf %65, %66 : vector<8x256xf32>
    %68 = vector.extract_strided_slice %10 {offsets = [0, 4], sizes = [4, 1], strides = [1, 1]} : vector<4x37xf32> to vector<4x1xf32>
    %69 = vector.extract_strided_slice %67 {offsets = [0, 0], sizes = [1, 256], strides = [1, 1]} : vector<8x256xf32> to vector<1x256xf32>
    %70 = vector.broadcast %68 : vector<4x1xf32> to vector<4x256xf32>
    %71 = vector.broadcast %69 : vector<1x256xf32> to vector<4x256xf32>
    %72 = arith.mulf %70, %71 : vector<4x256xf32>
    %73 = arith.addf %59, %72 : vector<4x256xf32>
    %74 = vector.extract_strided_slice %67 {offsets = [4, 0], sizes = [1, 256], strides = [1, 1]} : vector<8x256xf32> to vector<1x256xf32>
    %75 = vector.broadcast %68 : vector<4x1xf32> to vector<4x256xf32>
    %76 = vector.broadcast %74 : vector<1x256xf32> to vector<4x256xf32>
    %77 = arith.mulf %75, %76 : vector<4x256xf32>
    %78 = arith.addf %64, %77 : vector<4x256xf32>
    %79 = vector.extract_strided_slice %10 {offsets = [0, 5], sizes = [4, 1], strides = [1, 1]} : vector<4x37xf32> to vector<4x1xf32>
    %80 = vector.extract_strided_slice %67 {offsets = [1, 0], sizes = [1, 256], strides = [1, 1]} : vector<8x256xf32> to vector<1x256xf32>
    %81 = vector.broadcast %79 : vector<4x1xf32> to vector<4x256xf32>
    %82 = vector.broadcast %80 : vector<1x256xf32> to vector<4x256xf32>
    %83 = arith.mulf %81, %82 : vector<4x256xf32>
    %84 = arith.addf %73, %83 : vector<4x256xf32>
    %85 = vector.extract_strided_slice %67 {offsets = [5, 0], sizes = [1, 256], strides = [1, 1]} : vector<8x256xf32> to vector<1x256xf32>
    %86 = vector.broadcast %79 : vector<4x1xf32> to vector<4x256xf32>
    %87 = vector.broadcast %85 : vector<1x256xf32> to vector<4x256xf32>
    %88 = arith.mulf %86, %87 : vector<4x256xf32>
    %89 = arith.addf %78, %88 : vector<4x256xf32>
    %90 = vector.extract_strided_slice %10 {offsets = [0, 6], sizes = [4, 1], strides = [1, 1]} : vector<4x37xf32> to vector<4x1xf32>
    %91 = vector.extract_strided_slice %67 {offsets = [2, 0], sizes = [1, 256], strides = [1, 1]} : vector<8x256xf32> to vector<1x256xf32>
    %92 = vector.broadcast %90 : vector<4x1xf32> to vector<4x256xf32>
    %93 = vector.broadcast %91 : vector<1x256xf32> to vector<4x256xf32>
    %94 = arith.mulf %92, %93 : vector<4x256xf32>
    %95 = arith.addf %84, %94 : vector<4x256xf32>
    %96 = vector.extract_strided_slice %67 {offsets = [6, 0], sizes = [1, 256], strides = [1, 1]} : vector<8x256xf32> to vector<1x256xf32>
    %97 = vector.broadcast %90 : vector<4x1xf32> to vector<4x256xf32>
    %98 = vector.broadcast %96 : vector<1x256xf32> to vector<4x256xf32>
    %99 = arith.mulf %97, %98 : vector<4x256xf32>
    %100 = arith.addf %89, %99 : vector<4x256xf32>
    %101 = vector.extract_strided_slice %10 {offsets = [0, 7], sizes = [4, 1], strides = [1, 1]} : vector<4x37xf32> to vector<4x1xf32>
    %102 = vector.extract_strided_slice %67 {offsets = [3, 0], sizes = [1, 256], strides = [1, 1]} : vector<8x256xf32> to vector<1x256xf32>
    %103 = vector.broadcast %101 : vector<4x1xf32> to vector<4x256xf32>
    %104 = vector.broadcast %102 : vector<1x256xf32> to vector<4x256xf32>
    %105 = arith.mulf %103, %104 : vector<4x256xf32>
    %106 = arith.addf %95, %105 : vector<4x256xf32>
    %107 = vector.extract_strided_slice %67 {offsets = [7, 0], sizes = [1, 256], strides = [1, 1]} : vector<8x256xf32> to vector<1x256xf32>
    %108 = vector.broadcast %101 : vector<4x1xf32> to vector<4x256xf32>
    %109 = vector.broadcast %107 : vector<1x256xf32> to vector<4x256xf32>
    %110 = arith.mulf %108, %109 : vector<4x256xf32>
    %111 = arith.addf %100, %110 : vector<4x256xf32>
    %c15_i32 = arith.constant 15 : i32
    %112 = tpu.dynamic_rotate %9 by %c15_i32 dim 1 : vector<8x256xf32>, i32 -> vector<8x256xf32>
    %113 = vector.broadcast %2 : vector<1x256xf32> to vector<8x256xf32>
    %114 = arith.mulf %112, %113 : vector<8x256xf32>
    %115 = vector.extract_strided_slice %10 {offsets = [0, 8], sizes = [4, 1], strides = [1, 1]} : vector<4x37xf32> to vector<4x1xf32>
    %116 = vector.extract_strided_slice %114 {offsets = [0, 0], sizes = [1, 256], strides = [1, 1]} : vector<8x256xf32> to vector<1x256xf32>
    %117 = vector.broadcast %115 : vector<4x1xf32> to vector<4x256xf32>
    %118 = vector.broadcast %116 : vector<1x256xf32> to vector<4x256xf32>
    %119 = arith.mulf %117, %118 : vector<4x256xf32>
    %120 = arith.addf %106, %119 : vector<4x256xf32>
    %121 = vector.extract_strided_slice %114 {offsets = [4, 0], sizes = [1, 256], strides = [1, 1]} : vector<8x256xf32> to vector<1x256xf32>
    %122 = vector.broadcast %115 : vector<4x1xf32> to vector<4x256xf32>
    %123 = vector.broadcast %121 : vector<1x256xf32> to vector<4x256xf32>
    %124 = arith.mulf %122, %123 : vector<4x256xf32>
    %125 = arith.addf %111, %124 : vector<4x256xf32>
    %126 = vector.extract_strided_slice %10 {offsets = [0, 9], sizes = [4, 1], strides = [1, 1]} : vector<4x37xf32> to vector<4x1xf32>
    %127 = vector.extract_strided_slice %114 {offsets = [1, 0], sizes = [1, 256], strides = [1, 1]} : vector<8x256xf32> to vector<1x256xf32>
    %128 = vector.broadcast %126 : vector<4x1xf32> to vector<4x256xf32>
    %129 = vector.broadcast %127 : vector<1x256xf32> to vector<4x256xf32>
    %130 = arith.mulf %128, %129 : vector<4x256xf32>
    %131 = arith.addf %120, %130 : vector<4x256xf32>
    %132 = vector.extract_strided_slice %114 {offsets = [5, 0], sizes = [1, 256], strides = [1, 1]} : vector<8x256xf32> to vector<1x256xf32>
    %133 = vector.broadcast %126 : vector<4x1xf32> to vector<4x256xf32>
    %134 = vector.broadcast %132 : vector<1x256xf32> to vector<4x256xf32>
    %135 = arith.mulf %133, %134 : vector<4x256xf32>
    %136 = arith.addf %125, %135 : vector<4x256xf32>
    %137 = vector.extract_strided_slice %10 {offsets = [0, 10], sizes = [4, 1], strides = [1, 1]} : vector<4x37xf32> to vector<4x1xf32>
    %138 = vector.extract_strided_slice %114 {offsets = [2, 0], sizes = [1, 256], strides = [1, 1]} : vector<8x256xf32> to vector<1x256xf32>
    %139 = vector.broadcast %137 : vector<4x1xf32> to vector<4x256xf32>
    %140 = vector.broadcast %138 : vector<1x256xf32> to vector<4x256xf32>
    %141 = arith.mulf %139, %140 : vector<4x256xf32>
    %142 = arith.addf %131, %141 : vector<4x256xf32>
    %143 = vector.extract_strided_slice %114 {offsets = [6, 0], sizes = [1, 256], strides = [1, 1]} : vector<8x256xf32> to vector<1x256xf32>
    %144 = vector.broadcast %137 : vector<4x1xf32> to vector<4x256xf32>
    %145 = vector.broadcast %143 : vector<1x256xf32> to vector<4x256xf32>
    %146 = arith.mulf %144, %145 : vector<4x256xf32>
    %147 = arith.addf %136, %146 : vector<4x256xf32>
    %148 = vector.extract_strided_slice %10 {offsets = [0, 11], sizes = [4, 1], strides = [1, 1]} : vector<4x37xf32> to vector<4x1xf32>
    %149 = vector.extract_strided_slice %114 {offsets = [3, 0], sizes = [1, 256], strides = [1, 1]} : vector<8x256xf32> to vector<1x256xf32>
    %150 = vector.broadcast %148 : vector<4x1xf32> to vector<4x256xf32>
    %151 = vector.broadcast %149 : vector<1x256xf32> to vector<4x256xf32>
    %152 = arith.mulf %150, %151 : vector<4x256xf32>
    %153 = arith.addf %142, %152 : vector<4x256xf32>
    %154 = vector.extract_strided_slice %114 {offsets = [7, 0], sizes = [1, 256], strides = [1, 1]} : vector<8x256xf32> to vector<1x256xf32>
    %155 = vector.broadcast %148 : vector<4x1xf32> to vector<4x256xf32>
    %156 = vector.broadcast %154 : vector<1x256xf32> to vector<4x256xf32>
    %157 = arith.mulf %155, %156 : vector<4x256xf32>
    %158 = arith.addf %147, %157 : vector<4x256xf32>
    %c1_i32 = arith.constant 1 : i32
    %159 = tpu.dynamic_rotate %9 by %c1_i32 dim 1 : vector<8x256xf32>, i32 -> vector<8x256xf32>
    %160 = vector.broadcast %3 : vector<1x256xf32> to vector<8x256xf32>
    %161 = arith.mulf %159, %160 : vector<8x256xf32>
    %162 = vector.extract_strided_slice %10 {offsets = [0, 12], sizes = [4, 1], strides = [1, 1]} : vector<4x37xf32> to vector<4x1xf32>
    %163 = vector.extract_strided_slice %161 {offsets = [0, 0], sizes = [1, 256], strides = [1, 1]} : vector<8x256xf32> to vector<1x256xf32>
    %164 = vector.broadcast %162 : vector<4x1xf32> to vector<4x256xf32>
    %165 = vector.broadcast %163 : vector<1x256xf32> to vector<4x256xf32>
    %166 = arith.mulf %164, %165 : vector<4x256xf32>
    %167 = arith.addf %153, %166 : vector<4x256xf32>
    %168 = vector.extract_strided_slice %161 {offsets = [4, 0], sizes = [1, 256], strides = [1, 1]} : vector<8x256xf32> to vector<1x256xf32>
    %169 = vector.broadcast %162 : vector<4x1xf32> to vector<4x256xf32>
    %170 = vector.broadcast %168 : vector<1x256xf32> to vector<4x256xf32>
    %171 = arith.mulf %169, %170 : vector<4x256xf32>
    %172 = arith.addf %158, %171 : vector<4x256xf32>
    %173 = vector.extract_strided_slice %10 {offsets = [0, 13], sizes = [4, 1], strides = [1, 1]} : vector<4x37xf32> to vector<4x1xf32>
    %174 = vector.extract_strided_slice %161 {offsets = [1, 0], sizes = [1, 256], strides = [1, 1]} : vector<8x256xf32> to vector<1x256xf32>
    %175 = vector.broadcast %173 : vector<4x1xf32> to vector<4x256xf32>
    %176 = vector.broadcast %174 : vector<1x256xf32> to vector<4x256xf32>
    %177 = arith.mulf %175, %176 : vector<4x256xf32>
    %178 = arith.addf %167, %177 : vector<4x256xf32>
    %179 = vector.extract_strided_slice %161 {offsets = [5, 0], sizes = [1, 256], strides = [1, 1]} : vector<8x256xf32> to vector<1x256xf32>
    %180 = vector.broadcast %173 : vector<4x1xf32> to vector<4x256xf32>
    %181 = vector.broadcast %179 : vector<1x256xf32> to vector<4x256xf32>
    %182 = arith.mulf %180, %181 : vector<4x256xf32>
    %183 = arith.addf %172, %182 : vector<4x256xf32>
    %184 = vector.extract_strided_slice %10 {offsets = [0, 14], sizes = [4, 1], strides = [1, 1]} : vector<4x37xf32> to vector<4x1xf32>
    %185 = vector.extract_strided_slice %161 {offsets = [2, 0], sizes = [1, 256], strides = [1, 1]} : vector<8x256xf32> to vector<1x256xf32>
    %186 = vector.broadcast %184 : vector<4x1xf32> to vector<4x256xf32>
    %187 = vector.broadcast %185 : vector<1x256xf32> to vector<4x256xf32>
    %188 = arith.mulf %186, %187 : vector<4x256xf32>
    %189 = arith.addf %178, %188 : vector<4x256xf32>
    %190 = vector.extract_strided_slice %161 {offsets = [6, 0], sizes = [1, 256], strides = [1, 1]} : vector<8x256xf32> to vector<1x256xf32>
    %191 = vector.broadcast %184 : vector<4x1xf32> to vector<4x256xf32>
    %192 = vector.broadcast %190 : vector<1x256xf32> to vector<4x256xf32>
    %193 = arith.mulf %191, %192 : vector<4x256xf32>
    %194 = arith.addf %183, %193 : vector<4x256xf32>
    %195 = vector.extract_strided_slice %10 {offsets = [0, 15], sizes = [4, 1], strides = [1, 1]} : vector<4x37xf32> to vector<4x1xf32>
    %196 = vector.extract_strided_slice %161 {offsets = [3, 0], sizes = [1, 256], strides = [1, 1]} : vector<8x256xf32> to vector<1x256xf32>
    %197 = vector.broadcast %195 : vector<4x1xf32> to vector<4x256xf32>
    %198 = vector.broadcast %196 : vector<1x256xf32> to vector<4x256xf32>
    %199 = arith.mulf %197, %198 : vector<4x256xf32>
    %200 = arith.addf %189, %199 : vector<4x256xf32>
    %201 = vector.extract_strided_slice %161 {offsets = [7, 0], sizes = [1, 256], strides = [1, 1]} : vector<8x256xf32> to vector<1x256xf32>
    %202 = vector.broadcast %195 : vector<4x1xf32> to vector<4x256xf32>
    %203 = vector.broadcast %201 : vector<1x256xf32> to vector<4x256xf32>
    %204 = arith.mulf %202, %203 : vector<4x256xf32>
    %205 = arith.addf %194, %204 : vector<4x256xf32>
    %206 = vector.extract_strided_slice %10 {offsets = [0, 16], sizes = [4, 1], strides = [1, 1]} : vector<4x37xf32> to vector<4x1xf32>
    %207 = vector.extract_strided_slice %9 {offsets = [0, 0], sizes = [1, 256], strides = [1, 1]} : vector<8x256xf32> to vector<1x256xf32>
    %208 = vector.broadcast %206 : vector<4x1xf32> to vector<4x256xf32>
    %209 = vector.broadcast %207 : vector<1x256xf32> to vector<4x256xf32>
    %210 = arith.mulf %208, %209 : vector<4x256xf32>
    %211 = arith.addf %200, %210 : vector<4x256xf32>
    %212 = vector.extract_strided_slice %9 {offsets = [4, 0], sizes = [1, 256], strides = [1, 1]} : vector<8x256xf32> to vector<1x256xf32>
    %213 = vector.broadcast %206 : vector<4x1xf32> to vector<4x256xf32>
    %214 = vector.broadcast %212 : vector<1x256xf32> to vector<4x256xf32>
    %215 = arith.mulf %213, %214 : vector<4x256xf32>
    %216 = arith.addf %205, %215 : vector<4x256xf32>
    %217 = vector.extract_strided_slice %10 {offsets = [0, 17], sizes = [4, 1], strides = [1, 1]} : vector<4x37xf32> to vector<4x1xf32>
    %218 = vector.extract_strided_slice %9 {offsets = [1, 0], sizes = [1, 256], strides = [1, 1]} : vector<8x256xf32> to vector<1x256xf32>
    %219 = vector.broadcast %217 : vector<4x1xf32> to vector<4x256xf32>
    %220 = vector.broadcast %218 : vector<1x256xf32> to vector<4x256xf32>
    %221 = arith.mulf %219, %220 : vector<4x256xf32>
    %222 = arith.addf %211, %221 : vector<4x256xf32>
    %223 = vector.extract_strided_slice %9 {offsets = [5, 0], sizes = [1, 256], strides = [1, 1]} : vector<8x256xf32> to vector<1x256xf32>
    %224 = vector.broadcast %217 : vector<4x1xf32> to vector<4x256xf32>
    %225 = vector.broadcast %223 : vector<1x256xf32> to vector<4x256xf32>
    %226 = arith.mulf %224, %225 : vector<4x256xf32>
    %227 = arith.addf %216, %226 : vector<4x256xf32>
    %228 = vector.extract_strided_slice %10 {offsets = [0, 18], sizes = [4, 1], strides = [1, 1]} : vector<4x37xf32> to vector<4x1xf32>
    %229 = vector.extract_strided_slice %9 {offsets = [2, 0], sizes = [1, 256], strides = [1, 1]} : vector<8x256xf32> to vector<1x256xf32>
    %230 = vector.broadcast %228 : vector<4x1xf32> to vector<4x256xf32>
    %231 = vector.broadcast %229 : vector<1x256xf32> to vector<4x256xf32>
    %232 = arith.mulf %230, %231 : vector<4x256xf32>
    %233 = arith.addf %222, %232 : vector<4x256xf32>
    %234 = vector.extract_strided_slice %9 {offsets = [6, 0], sizes = [1, 256], strides = [1, 1]} : vector<8x256xf32> to vector<1x256xf32>
    %235 = vector.broadcast %228 : vector<4x1xf32> to vector<4x256xf32>
    %236 = vector.broadcast %234 : vector<1x256xf32> to vector<4x256xf32>
    %237 = arith.mulf %235, %236 : vector<4x256xf32>
    %238 = arith.addf %227, %237 : vector<4x256xf32>
    %239 = vector.extract_strided_slice %10 {offsets = [0, 19], sizes = [4, 1], strides = [1, 1]} : vector<4x37xf32> to vector<4x1xf32>
    %240 = vector.extract_strided_slice %9 {offsets = [3, 0], sizes = [1, 256], strides = [1, 1]} : vector<8x256xf32> to vector<1x256xf32>
    %241 = vector.broadcast %239 : vector<4x1xf32> to vector<4x256xf32>
    %242 = vector.broadcast %240 : vector<1x256xf32> to vector<4x256xf32>
    %243 = arith.mulf %241, %242 : vector<4x256xf32>
    %244 = arith.addf %233, %243 : vector<4x256xf32>
    %245 = vector.extract_strided_slice %9 {offsets = [7, 0], sizes = [1, 256], strides = [1, 1]} : vector<8x256xf32> to vector<1x256xf32>
    %246 = vector.broadcast %239 : vector<4x1xf32> to vector<4x256xf32>
    %247 = vector.broadcast %245 : vector<1x256xf32> to vector<4x256xf32>
    %248 = arith.mulf %246, %247 : vector<4x256xf32>
    %249 = arith.addf %238, %248 : vector<4x256xf32>
    %c255_i32 = arith.constant 255 : i32
    %250 = tpu.dynamic_rotate %9 by %c255_i32 dim 1 : vector<8x256xf32>, i32 -> vector<8x256xf32>
    %251 = vector.broadcast %4 : vector<1x256xf32> to vector<8x256xf32>
    %252 = arith.mulf %250, %251 : vector<8x256xf32>
    %253 = vector.extract_strided_slice %10 {offsets = [0, 20], sizes = [4, 1], strides = [1, 1]} : vector<4x37xf32> to vector<4x1xf32>
    %254 = vector.extract_strided_slice %252 {offsets = [0, 0], sizes = [1, 256], strides = [1, 1]} : vector<8x256xf32> to vector<1x256xf32>
    %255 = vector.broadcast %253 : vector<4x1xf32> to vector<4x256xf32>
    %256 = vector.broadcast %254 : vector<1x256xf32> to vector<4x256xf32>
    %257 = arith.mulf %255, %256 : vector<4x256xf32>
    %258 = arith.addf %244, %257 : vector<4x256xf32>
    %259 = vector.extract_strided_slice %252 {offsets = [4, 0], sizes = [1, 256], strides = [1, 1]} : vector<8x256xf32> to vector<1x256xf32>
    %260 = vector.broadcast %253 : vector<4x1xf32> to vector<4x256xf32>
    %261 = vector.broadcast %259 : vector<1x256xf32> to vector<4x256xf32>
    %262 = arith.mulf %260, %261 : vector<4x256xf32>
    %263 = arith.addf %249, %262 : vector<4x256xf32>
    %264 = vector.extract_strided_slice %10 {offsets = [0, 21], sizes = [4, 1], strides = [1, 1]} : vector<4x37xf32> to vector<4x1xf32>
    %265 = vector.extract_strided_slice %252 {offsets = [1, 0], sizes = [1, 256], strides = [1, 1]} : vector<8x256xf32> to vector<1x256xf32>
    %266 = vector.broadcast %264 : vector<4x1xf32> to vector<4x256xf32>
    %267 = vector.broadcast %265 : vector<1x256xf32> to vector<4x256xf32>
    %268 = arith.mulf %266, %267 : vector<4x256xf32>
    %269 = arith.addf %258, %268 : vector<4x256xf32>
    %270 = vector.extract_strided_slice %252 {offsets = [5, 0], sizes = [1, 256], strides = [1, 1]} : vector<8x256xf32> to vector<1x256xf32>
    %271 = vector.broadcast %264 : vector<4x1xf32> to vector<4x256xf32>
    %272 = vector.broadcast %270 : vector<1x256xf32> to vector<4x256xf32>
    %273 = arith.mulf %271, %272 : vector<4x256xf32>
    %274 = arith.addf %263, %273 : vector<4x256xf32>
    %275 = vector.extract_strided_slice %10 {offsets = [0, 22], sizes = [4, 1], strides = [1, 1]} : vector<4x37xf32> to vector<4x1xf32>
    %276 = vector.extract_strided_slice %252 {offsets = [2, 0], sizes = [1, 256], strides = [1, 1]} : vector<8x256xf32> to vector<1x256xf32>
    %277 = vector.broadcast %275 : vector<4x1xf32> to vector<4x256xf32>
    %278 = vector.broadcast %276 : vector<1x256xf32> to vector<4x256xf32>
    %279 = arith.mulf %277, %278 : vector<4x256xf32>
    %280 = arith.addf %269, %279 : vector<4x256xf32>
    %281 = vector.extract_strided_slice %252 {offsets = [6, 0], sizes = [1, 256], strides = [1, 1]} : vector<8x256xf32> to vector<1x256xf32>
    %282 = vector.broadcast %275 : vector<4x1xf32> to vector<4x256xf32>
    %283 = vector.broadcast %281 : vector<1x256xf32> to vector<4x256xf32>
    %284 = arith.mulf %282, %283 : vector<4x256xf32>
    %285 = arith.addf %274, %284 : vector<4x256xf32>
    %286 = vector.extract_strided_slice %10 {offsets = [0, 23], sizes = [4, 1], strides = [1, 1]} : vector<4x37xf32> to vector<4x1xf32>
    %287 = vector.extract_strided_slice %252 {offsets = [3, 0], sizes = [1, 256], strides = [1, 1]} : vector<8x256xf32> to vector<1x256xf32>
    %288 = vector.broadcast %286 : vector<4x1xf32> to vector<4x256xf32>
    %289 = vector.broadcast %287 : vector<1x256xf32> to vector<4x256xf32>
    %290 = arith.mulf %288, %289 : vector<4x256xf32>
    %291 = arith.addf %280, %290 : vector<4x256xf32>
    %292 = vector.extract_strided_slice %252 {offsets = [7, 0], sizes = [1, 256], strides = [1, 1]} : vector<8x256xf32> to vector<1x256xf32>
    %293 = vector.broadcast %286 : vector<4x1xf32> to vector<4x256xf32>
    %294 = vector.broadcast %292 : vector<1x256xf32> to vector<4x256xf32>
    %295 = arith.mulf %293, %294 : vector<4x256xf32>
    %296 = arith.addf %285, %295 : vector<4x256xf32>
    %c241_i32 = arith.constant 241 : i32
    %297 = tpu.dynamic_rotate %9 by %c241_i32 dim 1 : vector<8x256xf32>, i32 -> vector<8x256xf32>
    %298 = vector.broadcast %5 : vector<1x256xf32> to vector<8x256xf32>
    %299 = arith.mulf %297, %298 : vector<8x256xf32>
    %300 = vector.extract_strided_slice %10 {offsets = [0, 24], sizes = [4, 1], strides = [1, 1]} : vector<4x37xf32> to vector<4x1xf32>
    %301 = vector.extract_strided_slice %299 {offsets = [0, 0], sizes = [1, 256], strides = [1, 1]} : vector<8x256xf32> to vector<1x256xf32>
    %302 = vector.broadcast %300 : vector<4x1xf32> to vector<4x256xf32>
    %303 = vector.broadcast %301 : vector<1x256xf32> to vector<4x256xf32>
    %304 = arith.mulf %302, %303 : vector<4x256xf32>
    %305 = arith.addf %291, %304 : vector<4x256xf32>
    %306 = vector.extract_strided_slice %299 {offsets = [4, 0], sizes = [1, 256], strides = [1, 1]} : vector<8x256xf32> to vector<1x256xf32>
    %307 = vector.broadcast %300 : vector<4x1xf32> to vector<4x256xf32>
    %308 = vector.broadcast %306 : vector<1x256xf32> to vector<4x256xf32>
    %309 = arith.mulf %307, %308 : vector<4x256xf32>
    %310 = arith.addf %296, %309 : vector<4x256xf32>
    %311 = vector.extract_strided_slice %10 {offsets = [0, 25], sizes = [4, 1], strides = [1, 1]} : vector<4x37xf32> to vector<4x1xf32>
    %312 = vector.extract_strided_slice %299 {offsets = [1, 0], sizes = [1, 256], strides = [1, 1]} : vector<8x256xf32> to vector<1x256xf32>
    %313 = vector.broadcast %311 : vector<4x1xf32> to vector<4x256xf32>
    %314 = vector.broadcast %312 : vector<1x256xf32> to vector<4x256xf32>
    %315 = arith.mulf %313, %314 : vector<4x256xf32>
    %316 = arith.addf %305, %315 : vector<4x256xf32>
    %317 = vector.extract_strided_slice %299 {offsets = [5, 0], sizes = [1, 256], strides = [1, 1]} : vector<8x256xf32> to vector<1x256xf32>
    %318 = vector.broadcast %311 : vector<4x1xf32> to vector<4x256xf32>
    %319 = vector.broadcast %317 : vector<1x256xf32> to vector<4x256xf32>
    %320 = arith.mulf %318, %319 : vector<4x256xf32>
    %321 = arith.addf %310, %320 : vector<4x256xf32>
    %322 = vector.extract_strided_slice %10 {offsets = [0, 26], sizes = [4, 1], strides = [1, 1]} : vector<4x37xf32> to vector<4x1xf32>
    %323 = vector.extract_strided_slice %299 {offsets = [2, 0], sizes = [1, 256], strides = [1, 1]} : vector<8x256xf32> to vector<1x256xf32>
    %324 = vector.broadcast %322 : vector<4x1xf32> to vector<4x256xf32>
    %325 = vector.broadcast %323 : vector<1x256xf32> to vector<4x256xf32>
    %326 = arith.mulf %324, %325 : vector<4x256xf32>
    %327 = arith.addf %316, %326 : vector<4x256xf32>
    %328 = vector.extract_strided_slice %299 {offsets = [6, 0], sizes = [1, 256], strides = [1, 1]} : vector<8x256xf32> to vector<1x256xf32>
    %329 = vector.broadcast %322 : vector<4x1xf32> to vector<4x256xf32>
    %330 = vector.broadcast %328 : vector<1x256xf32> to vector<4x256xf32>
    %331 = arith.mulf %329, %330 : vector<4x256xf32>
    %332 = arith.addf %321, %331 : vector<4x256xf32>
    %333 = vector.extract_strided_slice %10 {offsets = [0, 27], sizes = [4, 1], strides = [1, 1]} : vector<4x37xf32> to vector<4x1xf32>
    %334 = vector.extract_strided_slice %299 {offsets = [3, 0], sizes = [1, 256], strides = [1, 1]} : vector<8x256xf32> to vector<1x256xf32>
    %335 = vector.broadcast %333 : vector<4x1xf32> to vector<4x256xf32>
    %336 = vector.broadcast %334 : vector<1x256xf32> to vector<4x256xf32>
    %337 = arith.mulf %335, %336 : vector<4x256xf32>
    %338 = arith.addf %327, %337 : vector<4x256xf32>
    %339 = vector.extract_strided_slice %299 {offsets = [7, 0], sizes = [1, 256], strides = [1, 1]} : vector<8x256xf32> to vector<1x256xf32>
    %340 = vector.broadcast %333 : vector<4x1xf32> to vector<4x256xf32>
    %341 = vector.broadcast %339 : vector<1x256xf32> to vector<4x256xf32>
    %342 = arith.mulf %340, %341 : vector<4x256xf32>
    %343 = arith.addf %332, %342 : vector<4x256xf32>
    %c240_i32 = arith.constant 240 : i32
    %344 = tpu.dynamic_rotate %9 by %c240_i32 dim 1 : vector<8x256xf32>, i32 -> vector<8x256xf32>
    %345 = vector.broadcast %6 : vector<1x256xf32> to vector<8x256xf32>
    %346 = arith.mulf %344, %345 : vector<8x256xf32>
    %347 = vector.extract_strided_slice %10 {offsets = [0, 28], sizes = [4, 1], strides = [1, 1]} : vector<4x37xf32> to vector<4x1xf32>
    %348 = vector.extract_strided_slice %346 {offsets = [0, 0], sizes = [1, 256], strides = [1, 1]} : vector<8x256xf32> to vector<1x256xf32>
    %349 = vector.broadcast %347 : vector<4x1xf32> to vector<4x256xf32>
    %350 = vector.broadcast %348 : vector<1x256xf32> to vector<4x256xf32>
    %351 = arith.mulf %349, %350 : vector<4x256xf32>
    %352 = arith.addf %338, %351 : vector<4x256xf32>
    %353 = vector.extract_strided_slice %346 {offsets = [4, 0], sizes = [1, 256], strides = [1, 1]} : vector<8x256xf32> to vector<1x256xf32>
    %354 = vector.broadcast %347 : vector<4x1xf32> to vector<4x256xf32>
    %355 = vector.broadcast %353 : vector<1x256xf32> to vector<4x256xf32>
    %356 = arith.mulf %354, %355 : vector<4x256xf32>
    %357 = arith.addf %343, %356 : vector<4x256xf32>
    %358 = vector.extract_strided_slice %10 {offsets = [0, 29], sizes = [4, 1], strides = [1, 1]} : vector<4x37xf32> to vector<4x1xf32>
    %359 = vector.extract_strided_slice %346 {offsets = [1, 0], sizes = [1, 256], strides = [1, 1]} : vector<8x256xf32> to vector<1x256xf32>
    %360 = vector.broadcast %358 : vector<4x1xf32> to vector<4x256xf32>
    %361 = vector.broadcast %359 : vector<1x256xf32> to vector<4x256xf32>
    %362 = arith.mulf %360, %361 : vector<4x256xf32>
    %363 = arith.addf %352, %362 : vector<4x256xf32>
    %364 = vector.extract_strided_slice %346 {offsets = [5, 0], sizes = [1, 256], strides = [1, 1]} : vector<8x256xf32> to vector<1x256xf32>
    %365 = vector.broadcast %358 : vector<4x1xf32> to vector<4x256xf32>
    %366 = vector.broadcast %364 : vector<1x256xf32> to vector<4x256xf32>
    %367 = arith.mulf %365, %366 : vector<4x256xf32>
    %368 = arith.addf %357, %367 : vector<4x256xf32>
    %369 = vector.extract_strided_slice %10 {offsets = [0, 30], sizes = [4, 1], strides = [1, 1]} : vector<4x37xf32> to vector<4x1xf32>
    %370 = vector.extract_strided_slice %346 {offsets = [2, 0], sizes = [1, 256], strides = [1, 1]} : vector<8x256xf32> to vector<1x256xf32>
    %371 = vector.broadcast %369 : vector<4x1xf32> to vector<4x256xf32>
    %372 = vector.broadcast %370 : vector<1x256xf32> to vector<4x256xf32>
    %373 = arith.mulf %371, %372 : vector<4x256xf32>
    %374 = arith.addf %363, %373 : vector<4x256xf32>
    %375 = vector.extract_strided_slice %346 {offsets = [6, 0], sizes = [1, 256], strides = [1, 1]} : vector<8x256xf32> to vector<1x256xf32>
    %376 = vector.broadcast %369 : vector<4x1xf32> to vector<4x256xf32>
    %377 = vector.broadcast %375 : vector<1x256xf32> to vector<4x256xf32>
    %378 = arith.mulf %376, %377 : vector<4x256xf32>
    %379 = arith.addf %368, %378 : vector<4x256xf32>
    %380 = vector.extract_strided_slice %10 {offsets = [0, 31], sizes = [4, 1], strides = [1, 1]} : vector<4x37xf32> to vector<4x1xf32>
    %381 = vector.extract_strided_slice %346 {offsets = [3, 0], sizes = [1, 256], strides = [1, 1]} : vector<8x256xf32> to vector<1x256xf32>
    %382 = vector.broadcast %380 : vector<4x1xf32> to vector<4x256xf32>
    %383 = vector.broadcast %381 : vector<1x256xf32> to vector<4x256xf32>
    %384 = arith.mulf %382, %383 : vector<4x256xf32>
    %385 = arith.addf %374, %384 : vector<4x256xf32>
    %386 = vector.extract_strided_slice %346 {offsets = [7, 0], sizes = [1, 256], strides = [1, 1]} : vector<8x256xf32> to vector<1x256xf32>
    %387 = vector.broadcast %380 : vector<4x1xf32> to vector<4x256xf32>
    %388 = vector.broadcast %386 : vector<1x256xf32> to vector<4x256xf32>
    %389 = arith.mulf %387, %388 : vector<4x256xf32>
    %390 = arith.addf %379, %389 : vector<4x256xf32>
    %c239_i32 = arith.constant 239 : i32
    %391 = tpu.dynamic_rotate %9 by %c239_i32 dim 1 : vector<8x256xf32>, i32 -> vector<8x256xf32>
    %392 = vector.broadcast %7 : vector<1x256xf32> to vector<8x256xf32>
    %393 = arith.mulf %391, %392 : vector<8x256xf32>
    %394 = vector.extract_strided_slice %10 {offsets = [0, 32], sizes = [4, 1], strides = [1, 1]} : vector<4x37xf32> to vector<4x1xf32>
    %395 = vector.extract_strided_slice %393 {offsets = [0, 0], sizes = [1, 256], strides = [1, 1]} : vector<8x256xf32> to vector<1x256xf32>
    %396 = vector.broadcast %394 : vector<4x1xf32> to vector<4x256xf32>
    %397 = vector.broadcast %395 : vector<1x256xf32> to vector<4x256xf32>
    %398 = arith.mulf %396, %397 : vector<4x256xf32>
    %399 = arith.addf %385, %398 : vector<4x256xf32>
    %400 = vector.extract_strided_slice %393 {offsets = [4, 0], sizes = [1, 256], strides = [1, 1]} : vector<8x256xf32> to vector<1x256xf32>
    %401 = vector.broadcast %394 : vector<4x1xf32> to vector<4x256xf32>
    %402 = vector.broadcast %400 : vector<1x256xf32> to vector<4x256xf32>
    %403 = arith.mulf %401, %402 : vector<4x256xf32>
    %404 = arith.addf %390, %403 : vector<4x256xf32>
    %405 = vector.extract_strided_slice %10 {offsets = [0, 33], sizes = [4, 1], strides = [1, 1]} : vector<4x37xf32> to vector<4x1xf32>
    %406 = vector.extract_strided_slice %393 {offsets = [1, 0], sizes = [1, 256], strides = [1, 1]} : vector<8x256xf32> to vector<1x256xf32>
    %407 = vector.broadcast %405 : vector<4x1xf32> to vector<4x256xf32>
    %408 = vector.broadcast %406 : vector<1x256xf32> to vector<4x256xf32>
    %409 = arith.mulf %407, %408 : vector<4x256xf32>
    %410 = arith.addf %399, %409 : vector<4x256xf32>
    %411 = vector.extract_strided_slice %393 {offsets = [5, 0], sizes = [1, 256], strides = [1, 1]} : vector<8x256xf32> to vector<1x256xf32>
    %412 = vector.broadcast %405 : vector<4x1xf32> to vector<4x256xf32>
    %413 = vector.broadcast %411 : vector<1x256xf32> to vector<4x256xf32>
    %414 = arith.mulf %412, %413 : vector<4x256xf32>
    %415 = arith.addf %404, %414 : vector<4x256xf32>
    %416 = vector.extract_strided_slice %10 {offsets = [0, 34], sizes = [4, 1], strides = [1, 1]} : vector<4x37xf32> to vector<4x1xf32>
    %417 = vector.extract_strided_slice %393 {offsets = [2, 0], sizes = [1, 256], strides = [1, 1]} : vector<8x256xf32> to vector<1x256xf32>
    %418 = vector.broadcast %416 : vector<4x1xf32> to vector<4x256xf32>
    %419 = vector.broadcast %417 : vector<1x256xf32> to vector<4x256xf32>
    %420 = arith.mulf %418, %419 : vector<4x256xf32>
    %421 = arith.addf %410, %420 : vector<4x256xf32>
    %422 = vector.extract_strided_slice %393 {offsets = [6, 0], sizes = [1, 256], strides = [1, 1]} : vector<8x256xf32> to vector<1x256xf32>
    %423 = vector.broadcast %416 : vector<4x1xf32> to vector<4x256xf32>
    %424 = vector.broadcast %422 : vector<1x256xf32> to vector<4x256xf32>
    %425 = arith.mulf %423, %424 : vector<4x256xf32>
    %426 = arith.addf %415, %425 : vector<4x256xf32>
    %427 = vector.extract_strided_slice %10 {offsets = [0, 35], sizes = [4, 1], strides = [1, 1]} : vector<4x37xf32> to vector<4x1xf32>
    %428 = vector.extract_strided_slice %393 {offsets = [3, 0], sizes = [1, 256], strides = [1, 1]} : vector<8x256xf32> to vector<1x256xf32>
    %429 = vector.broadcast %427 : vector<4x1xf32> to vector<4x256xf32>
    %430 = vector.broadcast %428 : vector<1x256xf32> to vector<4x256xf32>
    %431 = arith.mulf %429, %430 : vector<4x256xf32>
    %432 = arith.addf %421, %431 : vector<4x256xf32>
    %433 = vector.extract_strided_slice %393 {offsets = [7, 0], sizes = [1, 256], strides = [1, 1]} : vector<8x256xf32> to vector<1x256xf32>
    %434 = vector.broadcast %427 : vector<4x1xf32> to vector<4x256xf32>
    %435 = vector.broadcast %433 : vector<1x256xf32> to vector<4x256xf32>
    %436 = arith.mulf %434, %435 : vector<4x256xf32>
    %437 = arith.addf %426, %436 : vector<4x256xf32>
    %438 = tpu.concatenate %432, %437 in 0 : vector<4x256xf32>, vector<4x256xf32> -> vector<8x256xf32>
    %cst_14 = arith.constant 0.000000e+00 : f32
    %439 = vector.broadcast %cst_14 : f32 to vector<8x256xf32>
    %440 = arith.maximumf %438, %439 : vector<8x256xf32>
    %c0_15 = arith.constant 0 : index
    %c0_16 = arith.constant 0 : index
    %441 = vector.load %arg4[%c0_15, %c0_16] : memref<4x37xf32, #tpu.memory_space<vmem>>, vector<4x37xf32>
    %442 = vector.extract_strided_slice %441 {offsets = [0, 36], sizes = [4, 1], strides = [1, 1]} : vector<4x37xf32> to vector<4x1xf32>
    %cst_17 = arith.constant 0.000000e+00 : f32
    %443 = vector.broadcast %cst_17 : f32 to vector<4x256xf32>
    %444 = vector.broadcast %442 : vector<4x1xf32> to vector<4x256xf32>
    %445 = arith.addf %443, %444 : vector<4x256xf32>
    %cst_18 = arith.constant 0.000000e+00 : f32
    %446 = vector.broadcast %cst_18 : f32 to vector<4x256xf32>
    %447 = vector.broadcast %442 : vector<4x1xf32> to vector<4x256xf32>
    %448 = arith.addf %446, %447 : vector<4x256xf32>
    %c17_i32_19 = arith.constant 17 : i32
    %449 = tpu.dynamic_rotate %440 by %c17_i32_19 dim 1 : vector<8x256xf32>, i32 -> vector<8x256xf32>
    %450 = vector.broadcast %0 : vector<1x256xf32> to vector<8x256xf32>
    %451 = arith.mulf %449, %450 : vector<8x256xf32>
    %452 = vector.extract_strided_slice %441 {offsets = [0, 0], sizes = [4, 1], strides = [1, 1]} : vector<4x37xf32> to vector<4x1xf32>
    %453 = vector.extract_strided_slice %451 {offsets = [0, 0], sizes = [1, 256], strides = [1, 1]} : vector<8x256xf32> to vector<1x256xf32>
    %454 = vector.broadcast %452 : vector<4x1xf32> to vector<4x256xf32>
    %455 = vector.broadcast %453 : vector<1x256xf32> to vector<4x256xf32>
    %456 = arith.mulf %454, %455 : vector<4x256xf32>
    %457 = arith.addf %445, %456 : vector<4x256xf32>
    %458 = vector.extract_strided_slice %451 {offsets = [4, 0], sizes = [1, 256], strides = [1, 1]} : vector<8x256xf32> to vector<1x256xf32>
    %459 = vector.broadcast %452 : vector<4x1xf32> to vector<4x256xf32>
    %460 = vector.broadcast %458 : vector<1x256xf32> to vector<4x256xf32>
    %461 = arith.mulf %459, %460 : vector<4x256xf32>
    %462 = arith.addf %448, %461 : vector<4x256xf32>
    %463 = vector.extract_strided_slice %441 {offsets = [0, 1], sizes = [4, 1], strides = [1, 1]} : vector<4x37xf32> to vector<4x1xf32>
    %464 = vector.extract_strided_slice %451 {offsets = [1, 0], sizes = [1, 256], strides = [1, 1]} : vector<8x256xf32> to vector<1x256xf32>
    %465 = vector.broadcast %463 : vector<4x1xf32> to vector<4x256xf32>
    %466 = vector.broadcast %464 : vector<1x256xf32> to vector<4x256xf32>
    %467 = arith.mulf %465, %466 : vector<4x256xf32>
    %468 = arith.addf %457, %467 : vector<4x256xf32>
    %469 = vector.extract_strided_slice %451 {offsets = [5, 0], sizes = [1, 256], strides = [1, 1]} : vector<8x256xf32> to vector<1x256xf32>
    %470 = vector.broadcast %463 : vector<4x1xf32> to vector<4x256xf32>
    %471 = vector.broadcast %469 : vector<1x256xf32> to vector<4x256xf32>
    %472 = arith.mulf %470, %471 : vector<4x256xf32>
    %473 = arith.addf %462, %472 : vector<4x256xf32>
    %474 = vector.extract_strided_slice %441 {offsets = [0, 2], sizes = [4, 1], strides = [1, 1]} : vector<4x37xf32> to vector<4x1xf32>
    %475 = vector.extract_strided_slice %451 {offsets = [2, 0], sizes = [1, 256], strides = [1, 1]} : vector<8x256xf32> to vector<1x256xf32>
    %476 = vector.broadcast %474 : vector<4x1xf32> to vector<4x256xf32>
    %477 = vector.broadcast %475 : vector<1x256xf32> to vector<4x256xf32>
    %478 = arith.mulf %476, %477 : vector<4x256xf32>
    %479 = arith.addf %468, %478 : vector<4x256xf32>
    %480 = vector.extract_strided_slice %451 {offsets = [6, 0], sizes = [1, 256], strides = [1, 1]} : vector<8x256xf32> to vector<1x256xf32>
    %481 = vector.broadcast %474 : vector<4x1xf32> to vector<4x256xf32>
    %482 = vector.broadcast %480 : vector<1x256xf32> to vector<4x256xf32>
    %483 = arith.mulf %481, %482 : vector<4x256xf32>
    %484 = arith.addf %473, %483 : vector<4x256xf32>
    %485 = vector.extract_strided_slice %441 {offsets = [0, 3], sizes = [4, 1], strides = [1, 1]} : vector<4x37xf32> to vector<4x1xf32>
    %486 = vector.extract_strided_slice %451 {offsets = [3, 0], sizes = [1, 256], strides = [1, 1]} : vector<8x256xf32> to vector<1x256xf32>
    %487 = vector.broadcast %485 : vector<4x1xf32> to vector<4x256xf32>
    %488 = vector.broadcast %486 : vector<1x256xf32> to vector<4x256xf32>
    %489 = arith.mulf %487, %488 : vector<4x256xf32>
    %490 = arith.addf %479, %489 : vector<4x256xf32>
    %491 = vector.extract_strided_slice %451 {offsets = [7, 0], sizes = [1, 256], strides = [1, 1]} : vector<8x256xf32> to vector<1x256xf32>
    %492 = vector.broadcast %485 : vector<4x1xf32> to vector<4x256xf32>
    %493 = vector.broadcast %491 : vector<1x256xf32> to vector<4x256xf32>
    %494 = arith.mulf %492, %493 : vector<4x256xf32>
    %495 = arith.addf %484, %494 : vector<4x256xf32>
    %c16_i32_20 = arith.constant 16 : i32
    %496 = tpu.dynamic_rotate %440 by %c16_i32_20 dim 1 : vector<8x256xf32>, i32 -> vector<8x256xf32>
    %497 = vector.broadcast %1 : vector<1x256xf32> to vector<8x256xf32>
    %498 = arith.mulf %496, %497 : vector<8x256xf32>
    %499 = vector.extract_strided_slice %441 {offsets = [0, 4], sizes = [4, 1], strides = [1, 1]} : vector<4x37xf32> to vector<4x1xf32>
    %500 = vector.extract_strided_slice %498 {offsets = [0, 0], sizes = [1, 256], strides = [1, 1]} : vector<8x256xf32> to vector<1x256xf32>
    %501 = vector.broadcast %499 : vector<4x1xf32> to vector<4x256xf32>
    %502 = vector.broadcast %500 : vector<1x256xf32> to vector<4x256xf32>
    %503 = arith.mulf %501, %502 : vector<4x256xf32>
    %504 = arith.addf %490, %503 : vector<4x256xf32>
    %505 = vector.extract_strided_slice %498 {offsets = [4, 0], sizes = [1, 256], strides = [1, 1]} : vector<8x256xf32> to vector<1x256xf32>
    %506 = vector.broadcast %499 : vector<4x1xf32> to vector<4x256xf32>
    %507 = vector.broadcast %505 : vector<1x256xf32> to vector<4x256xf32>
    %508 = arith.mulf %506, %507 : vector<4x256xf32>
    %509 = arith.addf %495, %508 : vector<4x256xf32>
    %510 = vector.extract_strided_slice %441 {offsets = [0, 5], sizes = [4, 1], strides = [1, 1]} : vector<4x37xf32> to vector<4x1xf32>
    %511 = vector.extract_strided_slice %498 {offsets = [1, 0], sizes = [1, 256], strides = [1, 1]} : vector<8x256xf32> to vector<1x256xf32>
    %512 = vector.broadcast %510 : vector<4x1xf32> to vector<4x256xf32>
    %513 = vector.broadcast %511 : vector<1x256xf32> to vector<4x256xf32>
    %514 = arith.mulf %512, %513 : vector<4x256xf32>
    %515 = arith.addf %504, %514 : vector<4x256xf32>
    %516 = vector.extract_strided_slice %498 {offsets = [5, 0], sizes = [1, 256], strides = [1, 1]} : vector<8x256xf32> to vector<1x256xf32>
    %517 = vector.broadcast %510 : vector<4x1xf32> to vector<4x256xf32>
    %518 = vector.broadcast %516 : vector<1x256xf32> to vector<4x256xf32>
    %519 = arith.mulf %517, %518 : vector<4x256xf32>
    %520 = arith.addf %509, %519 : vector<4x256xf32>
    %521 = vector.extract_strided_slice %441 {offsets = [0, 6], sizes = [4, 1], strides = [1, 1]} : vector<4x37xf32> to vector<4x1xf32>
    %522 = vector.extract_strided_slice %498 {offsets = [2, 0], sizes = [1, 256], strides = [1, 1]} : vector<8x256xf32> to vector<1x256xf32>
    %523 = vector.broadcast %521 : vector<4x1xf32> to vector<4x256xf32>
    %524 = vector.broadcast %522 : vector<1x256xf32> to vector<4x256xf32>
    %525 = arith.mulf %523, %524 : vector<4x256xf32>
    %526 = arith.addf %515, %525 : vector<4x256xf32>
    %527 = vector.extract_strided_slice %498 {offsets = [6, 0], sizes = [1, 256], strides = [1, 1]} : vector<8x256xf32> to vector<1x256xf32>
    %528 = vector.broadcast %521 : vector<4x1xf32> to vector<4x256xf32>
    %529 = vector.broadcast %527 : vector<1x256xf32> to vector<4x256xf32>
    %530 = arith.mulf %528, %529 : vector<4x256xf32>
    %531 = arith.addf %520, %530 : vector<4x256xf32>
    %532 = vector.extract_strided_slice %441 {offsets = [0, 7], sizes = [4, 1], strides = [1, 1]} : vector<4x37xf32> to vector<4x1xf32>
    %533 = vector.extract_strided_slice %498 {offsets = [3, 0], sizes = [1, 256], strides = [1, 1]} : vector<8x256xf32> to vector<1x256xf32>
    %534 = vector.broadcast %532 : vector<4x1xf32> to vector<4x256xf32>
    %535 = vector.broadcast %533 : vector<1x256xf32> to vector<4x256xf32>
    %536 = arith.mulf %534, %535 : vector<4x256xf32>
    %537 = arith.addf %526, %536 : vector<4x256xf32>
    %538 = vector.extract_strided_slice %498 {offsets = [7, 0], sizes = [1, 256], strides = [1, 1]} : vector<8x256xf32> to vector<1x256xf32>
    %539 = vector.broadcast %532 : vector<4x1xf32> to vector<4x256xf32>
    %540 = vector.broadcast %538 : vector<1x256xf32> to vector<4x256xf32>
    %541 = arith.mulf %539, %540 : vector<4x256xf32>
    %542 = arith.addf %531, %541 : vector<4x256xf32>
    %c15_i32_21 = arith.constant 15 : i32
    %543 = tpu.dynamic_rotate %440 by %c15_i32_21 dim 1 : vector<8x256xf32>, i32 -> vector<8x256xf32>
    %544 = vector.broadcast %2 : vector<1x256xf32> to vector<8x256xf32>
    %545 = arith.mulf %543, %544 : vector<8x256xf32>
    %546 = vector.extract_strided_slice %441 {offsets = [0, 8], sizes = [4, 1], strides = [1, 1]} : vector<4x37xf32> to vector<4x1xf32>
    %547 = vector.extract_strided_slice %545 {offsets = [0, 0], sizes = [1, 256], strides = [1, 1]} : vector<8x256xf32> to vector<1x256xf32>
    %548 = vector.broadcast %546 : vector<4x1xf32> to vector<4x256xf32>
    %549 = vector.broadcast %547 : vector<1x256xf32> to vector<4x256xf32>
    %550 = arith.mulf %548, %549 : vector<4x256xf32>
    %551 = arith.addf %537, %550 : vector<4x256xf32>
    %552 = vector.extract_strided_slice %545 {offsets = [4, 0], sizes = [1, 256], strides = [1, 1]} : vector<8x256xf32> to vector<1x256xf32>
    %553 = vector.broadcast %546 : vector<4x1xf32> to vector<4x256xf32>
    %554 = vector.broadcast %552 : vector<1x256xf32> to vector<4x256xf32>
    %555 = arith.mulf %553, %554 : vector<4x256xf32>
    %556 = arith.addf %542, %555 : vector<4x256xf32>
    %557 = vector.extract_strided_slice %441 {offsets = [0, 9], sizes = [4, 1], strides = [1, 1]} : vector<4x37xf32> to vector<4x1xf32>
    %558 = vector.extract_strided_slice %545 {offsets = [1, 0], sizes = [1, 256], strides = [1, 1]} : vector<8x256xf32> to vector<1x256xf32>
    %559 = vector.broadcast %557 : vector<4x1xf32> to vector<4x256xf32>
    %560 = vector.broadcast %558 : vector<1x256xf32> to vector<4x256xf32>
    %561 = arith.mulf %559, %560 : vector<4x256xf32>
    %562 = arith.addf %551, %561 : vector<4x256xf32>
    %563 = vector.extract_strided_slice %545 {offsets = [5, 0], sizes = [1, 256], strides = [1, 1]} : vector<8x256xf32> to vector<1x256xf32>
    %564 = vector.broadcast %557 : vector<4x1xf32> to vector<4x256xf32>
    %565 = vector.broadcast %563 : vector<1x256xf32> to vector<4x256xf32>
    %566 = arith.mulf %564, %565 : vector<4x256xf32>
    %567 = arith.addf %556, %566 : vector<4x256xf32>
    %568 = vector.extract_strided_slice %441 {offsets = [0, 10], sizes = [4, 1], strides = [1, 1]} : vector<4x37xf32> to vector<4x1xf32>
    %569 = vector.extract_strided_slice %545 {offsets = [2, 0], sizes = [1, 256], strides = [1, 1]} : vector<8x256xf32> to vector<1x256xf32>
    %570 = vector.broadcast %568 : vector<4x1xf32> to vector<4x256xf32>
    %571 = vector.broadcast %569 : vector<1x256xf32> to vector<4x256xf32>
    %572 = arith.mulf %570, %571 : vector<4x256xf32>
    %573 = arith.addf %562, %572 : vector<4x256xf32>
    %574 = vector.extract_strided_slice %545 {offsets = [6, 0], sizes = [1, 256], strides = [1, 1]} : vector<8x256xf32> to vector<1x256xf32>
    %575 = vector.broadcast %568 : vector<4x1xf32> to vector<4x256xf32>
    %576 = vector.broadcast %574 : vector<1x256xf32> to vector<4x256xf32>
    %577 = arith.mulf %575, %576 : vector<4x256xf32>
    %578 = arith.addf %567, %577 : vector<4x256xf32>
    %579 = vector.extract_strided_slice %441 {offsets = [0, 11], sizes = [4, 1], strides = [1, 1]} : vector<4x37xf32> to vector<4x1xf32>
    %580 = vector.extract_strided_slice %545 {offsets = [3, 0], sizes = [1, 256], strides = [1, 1]} : vector<8x256xf32> to vector<1x256xf32>
    %581 = vector.broadcast %579 : vector<4x1xf32> to vector<4x256xf32>
    %582 = vector.broadcast %580 : vector<1x256xf32> to vector<4x256xf32>
    %583 = arith.mulf %581, %582 : vector<4x256xf32>
    %584 = arith.addf %573, %583 : vector<4x256xf32>
    %585 = vector.extract_strided_slice %545 {offsets = [7, 0], sizes = [1, 256], strides = [1, 1]} : vector<8x256xf32> to vector<1x256xf32>
    %586 = vector.broadcast %579 : vector<4x1xf32> to vector<4x256xf32>
    %587 = vector.broadcast %585 : vector<1x256xf32> to vector<4x256xf32>
    %588 = arith.mulf %586, %587 : vector<4x256xf32>
    %589 = arith.addf %578, %588 : vector<4x256xf32>
    %c1_i32_22 = arith.constant 1 : i32
    %590 = tpu.dynamic_rotate %440 by %c1_i32_22 dim 1 : vector<8x256xf32>, i32 -> vector<8x256xf32>
    %591 = vector.broadcast %3 : vector<1x256xf32> to vector<8x256xf32>
    %592 = arith.mulf %590, %591 : vector<8x256xf32>
    %593 = vector.extract_strided_slice %441 {offsets = [0, 12], sizes = [4, 1], strides = [1, 1]} : vector<4x37xf32> to vector<4x1xf32>
    %594 = vector.extract_strided_slice %592 {offsets = [0, 0], sizes = [1, 256], strides = [1, 1]} : vector<8x256xf32> to vector<1x256xf32>
    %595 = vector.broadcast %593 : vector<4x1xf32> to vector<4x256xf32>
    %596 = vector.broadcast %594 : vector<1x256xf32> to vector<4x256xf32>
    %597 = arith.mulf %595, %596 : vector<4x256xf32>
    %598 = arith.addf %584, %597 : vector<4x256xf32>
    %599 = vector.extract_strided_slice %592 {offsets = [4, 0], sizes = [1, 256], strides = [1, 1]} : vector<8x256xf32> to vector<1x256xf32>
    %600 = vector.broadcast %593 : vector<4x1xf32> to vector<4x256xf32>
    %601 = vector.broadcast %599 : vector<1x256xf32> to vector<4x256xf32>
    %602 = arith.mulf %600, %601 : vector<4x256xf32>
    %603 = arith.addf %589, %602 : vector<4x256xf32>
    %604 = vector.extract_strided_slice %441 {offsets = [0, 13], sizes = [4, 1], strides = [1, 1]} : vector<4x37xf32> to vector<4x1xf32>
    %605 = vector.extract_strided_slice %592 {offsets = [1, 0], sizes = [1, 256], strides = [1, 1]} : vector<8x256xf32> to vector<1x256xf32>
    %606 = vector.broadcast %604 : vector<4x1xf32> to vector<4x256xf32>
    %607 = vector.broadcast %605 : vector<1x256xf32> to vector<4x256xf32>
    %608 = arith.mulf %606, %607 : vector<4x256xf32>
    %609 = arith.addf %598, %608 : vector<4x256xf32>
    %610 = vector.extract_strided_slice %592 {offsets = [5, 0], sizes = [1, 256], strides = [1, 1]} : vector<8x256xf32> to vector<1x256xf32>
    %611 = vector.broadcast %604 : vector<4x1xf32> to vector<4x256xf32>
    %612 = vector.broadcast %610 : vector<1x256xf32> to vector<4x256xf32>
    %613 = arith.mulf %611, %612 : vector<4x256xf32>
    %614 = arith.addf %603, %613 : vector<4x256xf32>
    %615 = vector.extract_strided_slice %441 {offsets = [0, 14], sizes = [4, 1], strides = [1, 1]} : vector<4x37xf32> to vector<4x1xf32>
    %616 = vector.extract_strided_slice %592 {offsets = [2, 0], sizes = [1, 256], strides = [1, 1]} : vector<8x256xf32> to vector<1x256xf32>
    %617 = vector.broadcast %615 : vector<4x1xf32> to vector<4x256xf32>
    %618 = vector.broadcast %616 : vector<1x256xf32> to vector<4x256xf32>
    %619 = arith.mulf %617, %618 : vector<4x256xf32>
    %620 = arith.addf %609, %619 : vector<4x256xf32>
    %621 = vector.extract_strided_slice %592 {offsets = [6, 0], sizes = [1, 256], strides = [1, 1]} : vector<8x256xf32> to vector<1x256xf32>
    %622 = vector.broadcast %615 : vector<4x1xf32> to vector<4x256xf32>
    %623 = vector.broadcast %621 : vector<1x256xf32> to vector<4x256xf32>
    %624 = arith.mulf %622, %623 : vector<4x256xf32>
    %625 = arith.addf %614, %624 : vector<4x256xf32>
    %626 = vector.extract_strided_slice %441 {offsets = [0, 15], sizes = [4, 1], strides = [1, 1]} : vector<4x37xf32> to vector<4x1xf32>
    %627 = vector.extract_strided_slice %592 {offsets = [3, 0], sizes = [1, 256], strides = [1, 1]} : vector<8x256xf32> to vector<1x256xf32>
    %628 = vector.broadcast %626 : vector<4x1xf32> to vector<4x256xf32>
    %629 = vector.broadcast %627 : vector<1x256xf32> to vector<4x256xf32>
    %630 = arith.mulf %628, %629 : vector<4x256xf32>
    %631 = arith.addf %620, %630 : vector<4x256xf32>
    %632 = vector.extract_strided_slice %592 {offsets = [7, 0], sizes = [1, 256], strides = [1, 1]} : vector<8x256xf32> to vector<1x256xf32>
    %633 = vector.broadcast %626 : vector<4x1xf32> to vector<4x256xf32>
    %634 = vector.broadcast %632 : vector<1x256xf32> to vector<4x256xf32>
    %635 = arith.mulf %633, %634 : vector<4x256xf32>
    %636 = arith.addf %625, %635 : vector<4x256xf32>
    %637 = vector.extract_strided_slice %441 {offsets = [0, 16], sizes = [4, 1], strides = [1, 1]} : vector<4x37xf32> to vector<4x1xf32>
    %638 = vector.extract_strided_slice %440 {offsets = [0, 0], sizes = [1, 256], strides = [1, 1]} : vector<8x256xf32> to vector<1x256xf32>
    %639 = vector.broadcast %637 : vector<4x1xf32> to vector<4x256xf32>
    %640 = vector.broadcast %638 : vector<1x256xf32> to vector<4x256xf32>
    %641 = arith.mulf %639, %640 : vector<4x256xf32>
    %642 = arith.addf %631, %641 : vector<4x256xf32>
    %643 = vector.extract_strided_slice %440 {offsets = [4, 0], sizes = [1, 256], strides = [1, 1]} : vector<8x256xf32> to vector<1x256xf32>
    %644 = vector.broadcast %637 : vector<4x1xf32> to vector<4x256xf32>
    %645 = vector.broadcast %643 : vector<1x256xf32> to vector<4x256xf32>
    %646 = arith.mulf %644, %645 : vector<4x256xf32>
    %647 = arith.addf %636, %646 : vector<4x256xf32>
    %648 = vector.extract_strided_slice %441 {offsets = [0, 17], sizes = [4, 1], strides = [1, 1]} : vector<4x37xf32> to vector<4x1xf32>
    %649 = vector.extract_strided_slice %440 {offsets = [1, 0], sizes = [1, 256], strides = [1, 1]} : vector<8x256xf32> to vector<1x256xf32>
    %650 = vector.broadcast %648 : vector<4x1xf32> to vector<4x256xf32>
    %651 = vector.broadcast %649 : vector<1x256xf32> to vector<4x256xf32>
    %652 = arith.mulf %650, %651 : vector<4x256xf32>
    %653 = arith.addf %642, %652 : vector<4x256xf32>
    %654 = vector.extract_strided_slice %440 {offsets = [5, 0], sizes = [1, 256], strides = [1, 1]} : vector<8x256xf32> to vector<1x256xf32>
    %655 = vector.broadcast %648 : vector<4x1xf32> to vector<4x256xf32>
    %656 = vector.broadcast %654 : vector<1x256xf32> to vector<4x256xf32>
    %657 = arith.mulf %655, %656 : vector<4x256xf32>
    %658 = arith.addf %647, %657 : vector<4x256xf32>
    %659 = vector.extract_strided_slice %441 {offsets = [0, 18], sizes = [4, 1], strides = [1, 1]} : vector<4x37xf32> to vector<4x1xf32>
    %660 = vector.extract_strided_slice %440 {offsets = [2, 0], sizes = [1, 256], strides = [1, 1]} : vector<8x256xf32> to vector<1x256xf32>
    %661 = vector.broadcast %659 : vector<4x1xf32> to vector<4x256xf32>
    %662 = vector.broadcast %660 : vector<1x256xf32> to vector<4x256xf32>
    %663 = arith.mulf %661, %662 : vector<4x256xf32>
    %664 = arith.addf %653, %663 : vector<4x256xf32>
    %665 = vector.extract_strided_slice %440 {offsets = [6, 0], sizes = [1, 256], strides = [1, 1]} : vector<8x256xf32> to vector<1x256xf32>
    %666 = vector.broadcast %659 : vector<4x1xf32> to vector<4x256xf32>
    %667 = vector.broadcast %665 : vector<1x256xf32> to vector<4x256xf32>
    %668 = arith.mulf %666, %667 : vector<4x256xf32>
    %669 = arith.addf %658, %668 : vector<4x256xf32>
    %670 = vector.extract_strided_slice %441 {offsets = [0, 19], sizes = [4, 1], strides = [1, 1]} : vector<4x37xf32> to vector<4x1xf32>
    %671 = vector.extract_strided_slice %440 {offsets = [3, 0], sizes = [1, 256], strides = [1, 1]} : vector<8x256xf32> to vector<1x256xf32>
    %672 = vector.broadcast %670 : vector<4x1xf32> to vector<4x256xf32>
    %673 = vector.broadcast %671 : vector<1x256xf32> to vector<4x256xf32>
    %674 = arith.mulf %672, %673 : vector<4x256xf32>
    %675 = arith.addf %664, %674 : vector<4x256xf32>
    %676 = vector.extract_strided_slice %440 {offsets = [7, 0], sizes = [1, 256], strides = [1, 1]} : vector<8x256xf32> to vector<1x256xf32>
    %677 = vector.broadcast %670 : vector<4x1xf32> to vector<4x256xf32>
    %678 = vector.broadcast %676 : vector<1x256xf32> to vector<4x256xf32>
    %679 = arith.mulf %677, %678 : vector<4x256xf32>
    %680 = arith.addf %669, %679 : vector<4x256xf32>
    %c255_i32_23 = arith.constant 255 : i32
    %681 = tpu.dynamic_rotate %440 by %c255_i32_23 dim 1 : vector<8x256xf32>, i32 -> vector<8x256xf32>
    %682 = vector.broadcast %4 : vector<1x256xf32> to vector<8x256xf32>
    %683 = arith.mulf %681, %682 : vector<8x256xf32>
    %684 = vector.extract_strided_slice %441 {offsets = [0, 20], sizes = [4, 1], strides = [1, 1]} : vector<4x37xf32> to vector<4x1xf32>
    %685 = vector.extract_strided_slice %683 {offsets = [0, 0], sizes = [1, 256], strides = [1, 1]} : vector<8x256xf32> to vector<1x256xf32>
    %686 = vector.broadcast %684 : vector<4x1xf32> to vector<4x256xf32>
    %687 = vector.broadcast %685 : vector<1x256xf32> to vector<4x256xf32>
    %688 = arith.mulf %686, %687 : vector<4x256xf32>
    %689 = arith.addf %675, %688 : vector<4x256xf32>
    %690 = vector.extract_strided_slice %683 {offsets = [4, 0], sizes = [1, 256], strides = [1, 1]} : vector<8x256xf32> to vector<1x256xf32>
    %691 = vector.broadcast %684 : vector<4x1xf32> to vector<4x256xf32>
    %692 = vector.broadcast %690 : vector<1x256xf32> to vector<4x256xf32>
    %693 = arith.mulf %691, %692 : vector<4x256xf32>
    %694 = arith.addf %680, %693 : vector<4x256xf32>
    %695 = vector.extract_strided_slice %441 {offsets = [0, 21], sizes = [4, 1], strides = [1, 1]} : vector<4x37xf32> to vector<4x1xf32>
    %696 = vector.extract_strided_slice %683 {offsets = [1, 0], sizes = [1, 256], strides = [1, 1]} : vector<8x256xf32> to vector<1x256xf32>
    %697 = vector.broadcast %695 : vector<4x1xf32> to vector<4x256xf32>
    %698 = vector.broadcast %696 : vector<1x256xf32> to vector<4x256xf32>
    %699 = arith.mulf %697, %698 : vector<4x256xf32>
    %700 = arith.addf %689, %699 : vector<4x256xf32>
    %701 = vector.extract_strided_slice %683 {offsets = [5, 0], sizes = [1, 256], strides = [1, 1]} : vector<8x256xf32> to vector<1x256xf32>
    %702 = vector.broadcast %695 : vector<4x1xf32> to vector<4x256xf32>
    %703 = vector.broadcast %701 : vector<1x256xf32> to vector<4x256xf32>
    %704 = arith.mulf %702, %703 : vector<4x256xf32>
    %705 = arith.addf %694, %704 : vector<4x256xf32>
    %706 = vector.extract_strided_slice %441 {offsets = [0, 22], sizes = [4, 1], strides = [1, 1]} : vector<4x37xf32> to vector<4x1xf32>
    %707 = vector.extract_strided_slice %683 {offsets = [2, 0], sizes = [1, 256], strides = [1, 1]} : vector<8x256xf32> to vector<1x256xf32>
    %708 = vector.broadcast %706 : vector<4x1xf32> to vector<4x256xf32>
    %709 = vector.broadcast %707 : vector<1x256xf32> to vector<4x256xf32>
    %710 = arith.mulf %708, %709 : vector<4x256xf32>
    %711 = arith.addf %700, %710 : vector<4x256xf32>
    %712 = vector.extract_strided_slice %683 {offsets = [6, 0], sizes = [1, 256], strides = [1, 1]} : vector<8x256xf32> to vector<1x256xf32>
    %713 = vector.broadcast %706 : vector<4x1xf32> to vector<4x256xf32>
    %714 = vector.broadcast %712 : vector<1x256xf32> to vector<4x256xf32>
    %715 = arith.mulf %713, %714 : vector<4x256xf32>
    %716 = arith.addf %705, %715 : vector<4x256xf32>
    %717 = vector.extract_strided_slice %441 {offsets = [0, 23], sizes = [4, 1], strides = [1, 1]} : vector<4x37xf32> to vector<4x1xf32>
    %718 = vector.extract_strided_slice %683 {offsets = [3, 0], sizes = [1, 256], strides = [1, 1]} : vector<8x256xf32> to vector<1x256xf32>
    %719 = vector.broadcast %717 : vector<4x1xf32> to vector<4x256xf32>
    %720 = vector.broadcast %718 : vector<1x256xf32> to vector<4x256xf32>
    %721 = arith.mulf %719, %720 : vector<4x256xf32>
    %722 = arith.addf %711, %721 : vector<4x256xf32>
    %723 = vector.extract_strided_slice %683 {offsets = [7, 0], sizes = [1, 256], strides = [1, 1]} : vector<8x256xf32> to vector<1x256xf32>
    %724 = vector.broadcast %717 : vector<4x1xf32> to vector<4x256xf32>
    %725 = vector.broadcast %723 : vector<1x256xf32> to vector<4x256xf32>
    %726 = arith.mulf %724, %725 : vector<4x256xf32>
    %727 = arith.addf %716, %726 : vector<4x256xf32>
    %c241_i32_24 = arith.constant 241 : i32
    %728 = tpu.dynamic_rotate %440 by %c241_i32_24 dim 1 : vector<8x256xf32>, i32 -> vector<8x256xf32>
    %729 = vector.broadcast %5 : vector<1x256xf32> to vector<8x256xf32>
    %730 = arith.mulf %728, %729 : vector<8x256xf32>
    %731 = vector.extract_strided_slice %441 {offsets = [0, 24], sizes = [4, 1], strides = [1, 1]} : vector<4x37xf32> to vector<4x1xf32>
    %732 = vector.extract_strided_slice %730 {offsets = [0, 0], sizes = [1, 256], strides = [1, 1]} : vector<8x256xf32> to vector<1x256xf32>
    %733 = vector.broadcast %731 : vector<4x1xf32> to vector<4x256xf32>
    %734 = vector.broadcast %732 : vector<1x256xf32> to vector<4x256xf32>
    %735 = arith.mulf %733, %734 : vector<4x256xf32>
    %736 = arith.addf %722, %735 : vector<4x256xf32>
    %737 = vector.extract_strided_slice %730 {offsets = [4, 0], sizes = [1, 256], strides = [1, 1]} : vector<8x256xf32> to vector<1x256xf32>
    %738 = vector.broadcast %731 : vector<4x1xf32> to vector<4x256xf32>
    %739 = vector.broadcast %737 : vector<1x256xf32> to vector<4x256xf32>
    %740 = arith.mulf %738, %739 : vector<4x256xf32>
    %741 = arith.addf %727, %740 : vector<4x256xf32>
    %742 = vector.extract_strided_slice %441 {offsets = [0, 25], sizes = [4, 1], strides = [1, 1]} : vector<4x37xf32> to vector<4x1xf32>
    %743 = vector.extract_strided_slice %730 {offsets = [1, 0], sizes = [1, 256], strides = [1, 1]} : vector<8x256xf32> to vector<1x256xf32>
    %744 = vector.broadcast %742 : vector<4x1xf32> to vector<4x256xf32>
    %745 = vector.broadcast %743 : vector<1x256xf32> to vector<4x256xf32>
    %746 = arith.mulf %744, %745 : vector<4x256xf32>
    %747 = arith.addf %736, %746 : vector<4x256xf32>
    %748 = vector.extract_strided_slice %730 {offsets = [5, 0], sizes = [1, 256], strides = [1, 1]} : vector<8x256xf32> to vector<1x256xf32>
    %749 = vector.broadcast %742 : vector<4x1xf32> to vector<4x256xf32>
    %750 = vector.broadcast %748 : vector<1x256xf32> to vector<4x256xf32>
    %751 = arith.mulf %749, %750 : vector<4x256xf32>
    %752 = arith.addf %741, %751 : vector<4x256xf32>
    %753 = vector.extract_strided_slice %441 {offsets = [0, 26], sizes = [4, 1], strides = [1, 1]} : vector<4x37xf32> to vector<4x1xf32>
    %754 = vector.extract_strided_slice %730 {offsets = [2, 0], sizes = [1, 256], strides = [1, 1]} : vector<8x256xf32> to vector<1x256xf32>
    %755 = vector.broadcast %753 : vector<4x1xf32> to vector<4x256xf32>
    %756 = vector.broadcast %754 : vector<1x256xf32> to vector<4x256xf32>
    %757 = arith.mulf %755, %756 : vector<4x256xf32>
    %758 = arith.addf %747, %757 : vector<4x256xf32>
    %759 = vector.extract_strided_slice %730 {offsets = [6, 0], sizes = [1, 256], strides = [1, 1]} : vector<8x256xf32> to vector<1x256xf32>
    %760 = vector.broadcast %753 : vector<4x1xf32> to vector<4x256xf32>
    %761 = vector.broadcast %759 : vector<1x256xf32> to vector<4x256xf32>
    %762 = arith.mulf %760, %761 : vector<4x256xf32>
    %763 = arith.addf %752, %762 : vector<4x256xf32>
    %764 = vector.extract_strided_slice %441 {offsets = [0, 27], sizes = [4, 1], strides = [1, 1]} : vector<4x37xf32> to vector<4x1xf32>
    %765 = vector.extract_strided_slice %730 {offsets = [3, 0], sizes = [1, 256], strides = [1, 1]} : vector<8x256xf32> to vector<1x256xf32>
    %766 = vector.broadcast %764 : vector<4x1xf32> to vector<4x256xf32>
    %767 = vector.broadcast %765 : vector<1x256xf32> to vector<4x256xf32>
    %768 = arith.mulf %766, %767 : vector<4x256xf32>
    %769 = arith.addf %758, %768 : vector<4x256xf32>
    %770 = vector.extract_strided_slice %730 {offsets = [7, 0], sizes = [1, 256], strides = [1, 1]} : vector<8x256xf32> to vector<1x256xf32>
    %771 = vector.broadcast %764 : vector<4x1xf32> to vector<4x256xf32>
    %772 = vector.broadcast %770 : vector<1x256xf32> to vector<4x256xf32>
    %773 = arith.mulf %771, %772 : vector<4x256xf32>
    %774 = arith.addf %763, %773 : vector<4x256xf32>
    %c240_i32_25 = arith.constant 240 : i32
    %775 = tpu.dynamic_rotate %440 by %c240_i32_25 dim 1 : vector<8x256xf32>, i32 -> vector<8x256xf32>
    %776 = vector.broadcast %6 : vector<1x256xf32> to vector<8x256xf32>
    %777 = arith.mulf %775, %776 : vector<8x256xf32>
    %778 = vector.extract_strided_slice %441 {offsets = [0, 28], sizes = [4, 1], strides = [1, 1]} : vector<4x37xf32> to vector<4x1xf32>
    %779 = vector.extract_strided_slice %777 {offsets = [0, 0], sizes = [1, 256], strides = [1, 1]} : vector<8x256xf32> to vector<1x256xf32>
    %780 = vector.broadcast %778 : vector<4x1xf32> to vector<4x256xf32>
    %781 = vector.broadcast %779 : vector<1x256xf32> to vector<4x256xf32>
    %782 = arith.mulf %780, %781 : vector<4x256xf32>
    %783 = arith.addf %769, %782 : vector<4x256xf32>
    %784 = vector.extract_strided_slice %777 {offsets = [4, 0], sizes = [1, 256], strides = [1, 1]} : vector<8x256xf32> to vector<1x256xf32>
    %785 = vector.broadcast %778 : vector<4x1xf32> to vector<4x256xf32>
    %786 = vector.broadcast %784 : vector<1x256xf32> to vector<4x256xf32>
    %787 = arith.mulf %785, %786 : vector<4x256xf32>
    %788 = arith.addf %774, %787 : vector<4x256xf32>
    %789 = vector.extract_strided_slice %441 {offsets = [0, 29], sizes = [4, 1], strides = [1, 1]} : vector<4x37xf32> to vector<4x1xf32>
    %790 = vector.extract_strided_slice %777 {offsets = [1, 0], sizes = [1, 256], strides = [1, 1]} : vector<8x256xf32> to vector<1x256xf32>
    %791 = vector.broadcast %789 : vector<4x1xf32> to vector<4x256xf32>
    %792 = vector.broadcast %790 : vector<1x256xf32> to vector<4x256xf32>
    %793 = arith.mulf %791, %792 : vector<4x256xf32>
    %794 = arith.addf %783, %793 : vector<4x256xf32>
    %795 = vector.extract_strided_slice %777 {offsets = [5, 0], sizes = [1, 256], strides = [1, 1]} : vector<8x256xf32> to vector<1x256xf32>
    %796 = vector.broadcast %789 : vector<4x1xf32> to vector<4x256xf32>
    %797 = vector.broadcast %795 : vector<1x256xf32> to vector<4x256xf32>
    %798 = arith.mulf %796, %797 : vector<4x256xf32>
    %799 = arith.addf %788, %798 : vector<4x256xf32>
    %800 = vector.extract_strided_slice %441 {offsets = [0, 30], sizes = [4, 1], strides = [1, 1]} : vector<4x37xf32> to vector<4x1xf32>
    %801 = vector.extract_strided_slice %777 {offsets = [2, 0], sizes = [1, 256], strides = [1, 1]} : vector<8x256xf32> to vector<1x256xf32>
    %802 = vector.broadcast %800 : vector<4x1xf32> to vector<4x256xf32>
    %803 = vector.broadcast %801 : vector<1x256xf32> to vector<4x256xf32>
    %804 = arith.mulf %802, %803 : vector<4x256xf32>
    %805 = arith.addf %794, %804 : vector<4x256xf32>
    %806 = vector.extract_strided_slice %777 {offsets = [6, 0], sizes = [1, 256], strides = [1, 1]} : vector<8x256xf32> to vector<1x256xf32>
    %807 = vector.broadcast %800 : vector<4x1xf32> to vector<4x256xf32>
    %808 = vector.broadcast %806 : vector<1x256xf32> to vector<4x256xf32>
    %809 = arith.mulf %807, %808 : vector<4x256xf32>
    %810 = arith.addf %799, %809 : vector<4x256xf32>
    %811 = vector.extract_strided_slice %441 {offsets = [0, 31], sizes = [4, 1], strides = [1, 1]} : vector<4x37xf32> to vector<4x1xf32>
    %812 = vector.extract_strided_slice %777 {offsets = [3, 0], sizes = [1, 256], strides = [1, 1]} : vector<8x256xf32> to vector<1x256xf32>
    %813 = vector.broadcast %811 : vector<4x1xf32> to vector<4x256xf32>
    %814 = vector.broadcast %812 : vector<1x256xf32> to vector<4x256xf32>
    %815 = arith.mulf %813, %814 : vector<4x256xf32>
    %816 = arith.addf %805, %815 : vector<4x256xf32>
    %817 = vector.extract_strided_slice %777 {offsets = [7, 0], sizes = [1, 256], strides = [1, 1]} : vector<8x256xf32> to vector<1x256xf32>
    %818 = vector.broadcast %811 : vector<4x1xf32> to vector<4x256xf32>
    %819 = vector.broadcast %817 : vector<1x256xf32> to vector<4x256xf32>
    %820 = arith.mulf %818, %819 : vector<4x256xf32>
    %821 = arith.addf %810, %820 : vector<4x256xf32>
    %c239_i32_26 = arith.constant 239 : i32
    %822 = tpu.dynamic_rotate %440 by %c239_i32_26 dim 1 : vector<8x256xf32>, i32 -> vector<8x256xf32>
    %823 = vector.broadcast %7 : vector<1x256xf32> to vector<8x256xf32>
    %824 = arith.mulf %822, %823 : vector<8x256xf32>
    %825 = vector.extract_strided_slice %441 {offsets = [0, 32], sizes = [4, 1], strides = [1, 1]} : vector<4x37xf32> to vector<4x1xf32>
    %826 = vector.extract_strided_slice %824 {offsets = [0, 0], sizes = [1, 256], strides = [1, 1]} : vector<8x256xf32> to vector<1x256xf32>
    %827 = vector.broadcast %825 : vector<4x1xf32> to vector<4x256xf32>
    %828 = vector.broadcast %826 : vector<1x256xf32> to vector<4x256xf32>
    %829 = arith.mulf %827, %828 : vector<4x256xf32>
    %830 = arith.addf %816, %829 : vector<4x256xf32>
    %831 = vector.extract_strided_slice %824 {offsets = [4, 0], sizes = [1, 256], strides = [1, 1]} : vector<8x256xf32> to vector<1x256xf32>
    %832 = vector.broadcast %825 : vector<4x1xf32> to vector<4x256xf32>
    %833 = vector.broadcast %831 : vector<1x256xf32> to vector<4x256xf32>
    %834 = arith.mulf %832, %833 : vector<4x256xf32>
    %835 = arith.addf %821, %834 : vector<4x256xf32>
    %836 = vector.extract_strided_slice %441 {offsets = [0, 33], sizes = [4, 1], strides = [1, 1]} : vector<4x37xf32> to vector<4x1xf32>
    %837 = vector.extract_strided_slice %824 {offsets = [1, 0], sizes = [1, 256], strides = [1, 1]} : vector<8x256xf32> to vector<1x256xf32>
    %838 = vector.broadcast %836 : vector<4x1xf32> to vector<4x256xf32>
    %839 = vector.broadcast %837 : vector<1x256xf32> to vector<4x256xf32>
    %840 = arith.mulf %838, %839 : vector<4x256xf32>
    %841 = arith.addf %830, %840 : vector<4x256xf32>
    %842 = vector.extract_strided_slice %824 {offsets = [5, 0], sizes = [1, 256], strides = [1, 1]} : vector<8x256xf32> to vector<1x256xf32>
    %843 = vector.broadcast %836 : vector<4x1xf32> to vector<4x256xf32>
    %844 = vector.broadcast %842 : vector<1x256xf32> to vector<4x256xf32>
    %845 = arith.mulf %843, %844 : vector<4x256xf32>
    %846 = arith.addf %835, %845 : vector<4x256xf32>
    %847 = vector.extract_strided_slice %441 {offsets = [0, 34], sizes = [4, 1], strides = [1, 1]} : vector<4x37xf32> to vector<4x1xf32>
    %848 = vector.extract_strided_slice %824 {offsets = [2, 0], sizes = [1, 256], strides = [1, 1]} : vector<8x256xf32> to vector<1x256xf32>
    %849 = vector.broadcast %847 : vector<4x1xf32> to vector<4x256xf32>
    %850 = vector.broadcast %848 : vector<1x256xf32> to vector<4x256xf32>
    %851 = arith.mulf %849, %850 : vector<4x256xf32>
    %852 = arith.addf %841, %851 : vector<4x256xf32>
    %853 = vector.extract_strided_slice %824 {offsets = [6, 0], sizes = [1, 256], strides = [1, 1]} : vector<8x256xf32> to vector<1x256xf32>
    %854 = vector.broadcast %847 : vector<4x1xf32> to vector<4x256xf32>
    %855 = vector.broadcast %853 : vector<1x256xf32> to vector<4x256xf32>
    %856 = arith.mulf %854, %855 : vector<4x256xf32>
    %857 = arith.addf %846, %856 : vector<4x256xf32>
    %858 = vector.extract_strided_slice %441 {offsets = [0, 35], sizes = [4, 1], strides = [1, 1]} : vector<4x37xf32> to vector<4x1xf32>
    %859 = vector.extract_strided_slice %824 {offsets = [3, 0], sizes = [1, 256], strides = [1, 1]} : vector<8x256xf32> to vector<1x256xf32>
    %860 = vector.broadcast %858 : vector<4x1xf32> to vector<4x256xf32>
    %861 = vector.broadcast %859 : vector<1x256xf32> to vector<4x256xf32>
    %862 = arith.mulf %860, %861 : vector<4x256xf32>
    %863 = arith.addf %852, %862 : vector<4x256xf32>
    %864 = vector.extract_strided_slice %824 {offsets = [7, 0], sizes = [1, 256], strides = [1, 1]} : vector<8x256xf32> to vector<1x256xf32>
    %865 = vector.broadcast %858 : vector<4x1xf32> to vector<4x256xf32>
    %866 = vector.broadcast %864 : vector<1x256xf32> to vector<4x256xf32>
    %867 = arith.mulf %865, %866 : vector<4x256xf32>
    %868 = arith.addf %857, %867 : vector<4x256xf32>
    %869 = tpu.concatenate %863, %868 in 0 : vector<4x256xf32>, vector<4x256xf32> -> vector<8x256xf32>
    %cst_27 = arith.constant 0.000000e+00 : f32
    %870 = vector.broadcast %cst_27 : f32 to vector<8x256xf32>
    %871 = arith.maximumf %869, %870 : vector<8x256xf32>
    %c0_28 = arith.constant 0 : index
    %c0_29 = arith.constant 0 : index
    %c0_30 = arith.constant 0 : index
    %872 = vector.load %arg1[%c0_28, %c0_29, %c0_30] : memref<1x8x256xf32, #tpu.memory_space<vmem>>, vector<1x8x256xf32>
    %873 = vector.shape_cast %872 : vector<1x8x256xf32> to vector<8x256xf32>
    %874 = arith.addf %871, %873 : vector<8x256xf32>
    %c0_31 = arith.constant 0 : index
    %c0_32 = arith.constant 0 : index
    %c0_33 = arith.constant 0 : index
    %875 = vector.load %arg5[%c0_31, %c0_32, %c0_33] : memref<1x8x256xf32, #tpu.memory_space<vmem>>, vector<1x8x256xf32>
    %876 = vector.shape_cast %875 : vector<1x8x256xf32> to vector<8x256xf32>
    %877 = vector.shape_cast %874 : vector<8x256xf32> to vector<1x8x256xf32>
    tpu.vector_store %arg5[%c0_31, %c0_32, %c0_33], %877 {strides = array<i32>} : memref<1x8x256xf32, #tpu.memory_space<vmem>>, vector<1x8x256xf32>,
    return
  }
  func.func @transform_0(%arg0: i32) -> (i32, i32, i32) {
    %c0_i32 = arith.constant 0 : i32
    %c0_i32_0 = arith.constant 0 : i32
    %c0_i32_1 = arith.constant 0 : i32
    return %arg0, %c0_i32, %c0_i32_0 : i32, i32, i32
  }
  func.func @transform_1(%arg0: i32) -> (i32, i32) {
    %c0_i32 = arith.constant 0 : i32
    %c0_i32_0 = arith.constant 0 : i32
    %c0_i32_1 = arith.constant 0 : i32
    return %c0_i32, %c0_i32_0 : i32, i32
  }
  func.func @transform_2(%arg0: i32) -> (i32, i32) {
    %c0_i32 = arith.constant 0 : i32
    %c0_i32_0 = arith.constant 0 : i32
    %c0_i32_1 = arith.constant 0 : i32
    return %c0_i32, %c0_i32_0 : i32, i32
  }
  func.func @transform_3(%arg0: i32) -> (i32, i32) {
    %c0_i32 = arith.constant 0 : i32
    %c0_i32_0 = arith.constant 0 : i32
    %c0_i32_1 = arith.constant 0 : i32
    return %c0_i32, %c0_i32_0 : i32, i32
  }
  func.func @transform_4(%arg0: i32) -> (i32, i32, i32) {
    %c0_i32 = arith.constant 0 : i32
    %c0_i32_0 = arith.constant 0 : i32
    %c0_i32_1 = arith.constant 0 : i32
    return %arg0, %c0_i32, %c0_i32_0 : i32, i32, i32
  }
}

</mosaic_0001>

<bundles_post_ra>
// kernel: tpu_custom_call.1
= control target key start
LH: loop header
LB: loop body
LE: loop exit
PB: predicated region body
PF: predicated region fallthrough
CT: control target
= control target key end

     0   :  { %9 = vsyncpa [#allocation3], 0  ;;  %s3744_s0 = inlined_call_operand.hbm [shape: f32[1,8,256], index: 0, kind: input, shape index: {}]   ;;  %s3745_s1 = inlined_call_operand.hbm [shape: f32[9,256], index: 1, kind: input, shape index: {}]   ;;  %s3746_s2 = inlined_call_operand.hbm [shape: f32[4,37], index: 2, kind: input, shape index: {}]   ;;  %s3747_s3 = inlined_call_operand.vmem [shape: f32[4,37], index: 3, kind: input, shape index: {}]   ;;  %s3748_s4 = inlined_call_operand.hbm [shape: f32[1,8,256], index: 4, kind: output, shape index: {}]  }
   0x1   :  { %10 = vsyncpa [#allocation6], 0 }
   0x2   :  { %11 = vsyncpa [#allocation4], 0  ;;  %s2582_s15 = smov [#allocation5]  }
   0x3   :  { %s27_s16 = sshll.u32 %s2582_s15, 4  ;;  %s28_s16 = int_to_ptr.vmem [resolvable:$true] %s27_s16 }
   0x4   :  { %s2504_s17 = scalar_lea.vmem %s28_s16, 512  ;;  %p2509_p1 = scmp.lt.s32.totalorder %s28_s16, %s28_s16 }
   0x5   :  { %p2505_p0 = scmp.ne.s32.totalorder %s28_s16, %s2504_s17  ;;  %p2510_p2 = scmp.lt.s32.totalorder %s2504_s17, %s2504_s17 }
   0x7   :  { %p2511_p3 = por %p2510_p2, %p2509_p1 }
   0x9   :  { %p2512_p4 = pnand %p2511_p3, %p2505_p0 }
   0xb   :  { %2515 = shalt.err (!%p2512_p4)
}
   0xc   :  { %s2583_s18 = smov 256   ;;  %s2584_s19 = smov 16  }
   0xd   :  { %33 = dma.hbm_to_vmem [thread:$0]  %s3745_s1, 512, %s28_s16, [#allocation6], %s2583_s18, %s2583_s18, %s2584_s19  }
   0xe   :  { %s2585_s22 = smov [#allocation2]   ;;  %s2586_s24 = smov [#allocation7]  }
   0xf   :  { %s18_s23 = sshll.u32 %s2585_s22, 4  ;;  %s40_s25 = sshll.u32 %s2586_s24, 4  ;;  %s19_s23 = int_to_ptr.vmem [resolvable:$true] %s18_s23  ;;  %s41_s25 = int_to_ptr.vmem [resolvable:$true] %s40_s25 }
  0x10   :  { %s2524_s26 = scalar_lea.vmem %s19_s23, 256  ;;  %p2529_p6 = scmp.lt.s32.totalorder %s19_s23, %s19_s23 }
  0x11   :  { %p2525_p5 = scmp.ne.s32.totalorder %s19_s23, %s2524_s26  ;;  %p2530_p7 = scmp.lt.s32.totalorder %s2524_s26, %s2524_s26 }
  0x13   :  { %p2531_p8 = por %p2530_p7, %p2529_p6 }
  0x15   :  { %p2532_p9 = pnand %p2531_p8, %p2525_p5 }
  0x17   :  { %2535 = shalt.err (!%p2532_p9)
}
  0x18   :  { %21 = dma.hbm_to_vmem [thread:$0]  %s3744_s0, 256, %s19_s23, [#allocation3]  }
  0x19   :  { %s2544_s29 = scalar_lea.vmem %s41_s25, 64  ;;  %p2549_p11 = scmp.lt.s32.totalorder %s41_s25, %s41_s25 }
  0x1a   :  { %p2545_p10 = scmp.ne.s32.totalorder %s41_s25, %s2544_s29  ;;  %p2550_p12 = scmp.lt.s32.totalorder %s2544_s29, %s2544_s29 }
  0x1c   :  { %p2551_p13 = por %p2550_p12, %p2549_p11 }
  0x1e   :  { %p2552_p0 = pnand %p2551_p13, %p2545_p10 }
  0x20   :  { %2555 = shalt.err (!%p2552_p0)
}
  0x21   :  { %43 = dma.hbm_to_vmem [thread:$0]  %s3746_s2, 64, %s41_s25, [#allocation6]  }
  0x22   :  { %2576 = dma.done.wait [#allocation3], 256  }
  0x23   :  { %2577 = vsyncadd [#allocation3], 4294967040 }
  0x24   :  { %2578 = dma.done.wait [#allocation6], 576  }
  0x25   :  { %2579 = vsyncadd [#allocation6], 4294966720  ;;  %v2587_v0 = vmov 36   ;;  %v2588_v1 = vmov 0   ;;  %v2669_v2 = vld [vmem:[#allocation7] sm:$0xf]  ;;  %v83_v38 = vlaneseq }
  0x26   :  { %2419 = vset.pattern.permute.xlu0 %v2587_v0  ;;  %2420 = vset.pattern.permute.xlu1 %v2588_v1  ;;  %v2671_v3 = vld [vmem:[#allocation2 + $0x8] sm:$0xff]  ;;  %s2589_s0 = smov 17   ;;  %v2676_v4 = vld [vmem:[#allocation2] sm:$0xff]  ;;  %v2590_v5 = vmov 1   ;;  %v2591_v6 = vmov 2   ;;  %v2592_v7 = vmov 3  }
  0x27   :  { %75 = vperm.xlu0 %2419, %v2669_v2   ;;  %81 = vrot.lane.b32.xlu1 %v2671_v3, %s2589_s0  ;;  %v2593_v8 = vmov 4   ;;  %v2594_v9 = vmov 5   ;;  %v2595_v10 = vmov 7   ;;  %v2596_v11 = vmov 8   ;;  %s2599_s2 = smov 15   ;;  %s2605_s5 = smov 1  }
  0x28   :  { %v2597_v12 = vmov 6   ;;  %v2598_v13 = vmov 11   ;;  %v2600_v14 = vmov 9   ;;  %v2601_v15 = vmov 12   ;;  %s2607_s6 = smov 127   ;;  %s2609_s7 = smov 113  }
  0x29   :  { %v2602_v16 = vmov 15   ;;  %v2603_v17 = vmov 10   ;;  %v2604_v18 = vmov 18   ;;  %v2606_v19 = vmov 13   ;;  %v2758_v33 = vld [vmem:[%s3747_s3] sm:$0xf] }
  0x2a   :  { %v3762_v20 = vmov 21   ;;  %v3761_v21 = vmov 24   ;;  %v2611_v22 = vmov 14   ;;  %v2612_v23 = vmov 16   ;;  %s2625_s10 = smov 112   ;;  %s2628_s11 = smov 111  }
  0x2b   :  { %102 = vperm.xlu1 %2420, %v2669_v2   ;;  %79 = vrot.lane.b32.xlu0 %v2676_v4, %s2589_s0  ;;  %v3760_v24 = vmov 27   ;;  %v2614_v25 = vmov 17   ;;  %v3759_v26 = vmov 28   ;;  %v2616_v27 = vmov 19  }
  0x2c   :  { %2421 = vset.pattern.permute.xlu0 %v2590_v5  ;;  %v3757_v28 = vmov 31   ;;  %v3763_v29 = vmov 20   ;;  %v3755_v30 = vmov 32   ;;  %v3753_v31 = vmov 35  }
  0x2d   :  { %v3758_v32 = vmov 22   ;;  %v3756_v34 = vmov 23   ;;  %v3754_v35 = vmov 25   ;;  %v3752_v36 = vmov 26  }
  0x2e   :  { %v3751_v37 = vmov 29   ;;  %v90_v39 = vshrl.u32 %v83_v38, 7  ;;  %v2786_v40 = vand.u32 127, %v83_v38  ;;  %v55_v43 = vld [vmem:[#allocation5] ss:$8 sm:$0x3] }
  0x2f   :  { %2422 = vset.pattern.permute.xlu1 %v2591_v6  ;;  %130 = vperm.xlu0 %2421, %v2669_v2   ;;  %v3750_v46 = vmov 30   ;;  %v57_v53 = vld [vmem:[#allocation5 + $0x1] ss:$8 sm:$0x3]  ;;  %v3749_v61 = vmov 33   ;;  %vm1255_vm8 = vcmask 1043456  }
  0x30   :  { %158 = vperm.xlu1 %2422, %v2669_v2   ;;  %v2788_v41 = vsub.s32 0, %v90_v39  ;;  %v2790_v42 = vsub.s32 1, %v90_v39  ;;  %vm85_vm0 = vcmp.lt.s32.totalorder %v2786_v40, 17  ;;  %v2804_v50 = vsub.s32 2, %v90_v39 }
  0x31   :  { %v2806_v51 = vsub.s32 6, %v90_v39  ;;  %v2808_v54 = vsub.s32 4, %v90_v39  ;;  %v2816_v57 = vsub.s32 5, %v90_v39  ;;  %v2818_v58 = vsub.s32 3, %v90_v39 }
  0x32   :  { %v2798_v47 = vrot.slane %v55_v43, %v2788_v41  ;;  %v2801_v48 = vrot.slane %v55_v43, %v2790_v42  ;;  %v2823_v62 = vsub.s32 7, %v90_v39  ;;  %v2826_v63 = vrot.slane %v57_v53, %v2788_v41 }
  0x33   :  { %213 = vrot.lane.b32.xlu0 %v2676_v4, %s2584_s19  ;;  %vm217_vm1 = vcmp.lt.s32.totalorder %v2786_v40, 16  ;;  %vm349_vm2 = vcmp.lt.s32.totalorder %v2786_v40, 15  ;;  %vm481_vm3 = vcmp.lt.s32.totalorder %v2786_v40, 1  ;;  %vm725_vm4 = vcmp.lt.s32.totalorder %v2786_v40, 127 }
  0x34   :  { %2423 = vset.pattern.permute.xlu1 %v2592_v7  ;;  %2424 = vset.pattern.permute.xlu0 %v2593_v8  ;;  %vm857_vm5 = vcmp.lt.s32.totalorder %v2786_v40, 113  ;;  %vm989_vm6 = vcmp.lt.s32.totalorder %v2786_v40, 112  ;;  %vm1121_vm7 = vcmp.lt.s32.totalorder %v2786_v40, 111 }
  0x35   :  { %186 = vperm.xlu1 %2423, %v2669_v2  }
  0x37   :  { %234 = vperm.xlu0 %2424, %v2669_v2  }
  0x39   :  { %215 = vrot.lane.b32.xlu1 %v2671_v3, %s2584_s19 }
  0x3a   :  { %2425 = vset.pattern.permute.xlu1 %v2594_v9 }
  0x3b   :  { %2427 = vset.pattern.permute.xlu0 %v2595_v10 }
  0x3c   :  { %318 = vperm.xlu0 %2427, %v2669_v2  }
  0x3d   :  { %262 = vperm.xlu1 %2425, %v2669_v2  }
  0x40   :  { %2428 = vset.pattern.permute.xlu0 %v2596_v11 }
  0x41   :  { %2426 = vset.pattern.permute.xlu1 %v2597_v12  ;;  %366 = vperm.xlu0 %2428, %v2669_v2  }
  0x42   :  { %290 = vperm.xlu1 %2426, %v2669_v2  }
  0x45   :  { %2431 = vset.pattern.permute.xlu0 %v2598_v13 }
  0x46   :  { %345 = vrot.lane.b32.xlu1 %v2676_v4, %s2599_s2  ;;  %450 = vperm.xlu0 %2431, %v2669_v2  }
  0x47   :  { %2429 = vset.pattern.permute.xlu1 %v2600_v14 }
  0x4a   :  { %347 = vrot.lane.b32.xlu1 %v2671_v3, %s2599_s2  ;;  %2432 = vset.pattern.permute.xlu0 %v2601_v15 }
  0x4b   :  { %498 = vperm.xlu0 %2432, %v2669_v2  }
  0x4e   :  { %394 = vperm.xlu1 %2429, %v2669_v2  }
  0x4f   :  { %2435 = vset.pattern.permute.xlu0 %v2602_v16 }
  0x50   :  { %582 = vperm.xlu0 %2435, %v2669_v2  }
  0x52   :  { %2430 = vset.pattern.permute.xlu1 %v2603_v17 }
  0x53   :  { %422 = vperm.xlu1 %2430, %v2669_v2  }
  0x54   :  { %2438 = vset.pattern.permute.xlu0 %v2604_v18 }
  0x55   :  { %666 = vperm.xlu0 %2438, %v2669_v2  }
  0x57   :  { %477 = vrot.lane.b32.xlu1 %v2676_v4, %s2605_s5 }
  0x58   :  { %2433 = vset.pattern.permute.xlu1 %v2606_v19 }
  0x59   :  { %723 = vrot.lane.b32.xlu0 %v2671_v3, %s2607_s6 }
  0x5a   :  { %2441 = vset.pattern.permute.xlu0 %v3762_v20 }
  0x5b   :  { %479 = vrot.lane.b32.xlu1 %v2671_v3, %s2605_s5 }
  0x5d   :  { %770 = vperm.xlu0 %2441, %v2669_v2  }
  0x5f   :  { %526 = vperm.xlu1 %2433, %v2669_v2  }
  0x61   :  { %853 = vrot.lane.b32.xlu0 %v2676_v4, %s2609_s7 }
  0x62   :  { %2444 = vset.pattern.permute.xlu0 %v3761_v21 }
  0x63   :  { %2434 = vset.pattern.permute.xlu1 %v2611_v22 }
  0x64   :  { %554 = vperm.xlu1 %2434, %v2669_v2  }
  0x65   :  { %874 = vperm.xlu0 %2444, %v2669_v2  }
  0x68   :  { %2436 = vset.pattern.permute.xlu1 %v2612_v23 }
  0x69   :  { %610 = vperm.xlu1 %2436, %v2669_v2   ;;  %2447 = vset.pattern.permute.xlu0 %v3760_v24 }
  0x6a   :  { %958 = vperm.xlu0 %2447, %v2669_v2  }
  0x6d   :  { %2437 = vset.pattern.permute.xlu1 %v2614_v25 }
  0x6e   :  { %638 = vperm.xlu1 %2437, %v2669_v2   ;;  %2448 = vset.pattern.permute.xlu0 %v3759_v26 }
  0x6f   :  { %1006 = vperm.xlu0 %2448, %v2669_v2  }
  0x72   :  { %2439 = vset.pattern.permute.xlu1 %v2616_v27 }
  0x73   :  { %694 = vperm.xlu1 %2439, %v2669_v2   ;;  %2451 = vset.pattern.permute.xlu0 %v3757_v28 }
  0x74   :  { %1090 = vperm.xlu0 %2451, %v2669_v2  }
  0x77   :  { %721 = vrot.lane.b32.xlu1 %v2676_v4, %s2607_s6 }
  0x78   :  { %2440 = vset.pattern.permute.xlu1 %v3763_v29  ;;  %2452 = vset.pattern.permute.xlu0 %v3755_v30 }
  0x79   :  { %1138 = vperm.xlu0 %2452, %v2669_v2  }
  0x7b   :  { %742 = vperm.xlu1 %2440, %v2669_v2  }
  0x7d   :  { %2455 = vset.pattern.permute.xlu0 %v3753_v31 }
  0x7e   :  { %1222 = vperm.xlu0 %2455, %v2669_v2  }
  0x7f   :  { %2442 = vset.pattern.permute.xlu1 %v3758_v32 }
  0x80   :  { %798 = vperm.xlu1 %2442, %v2669_v2  }
  0x82   :  { %2458 = vset.pattern.permute.xlu0 %v2590_v5  ;;  %v2829_v5 = vrot.slane %v57_v53, %v2790_v42 }
  0x83   :  { %1304 = vperm.xlu0 %2458, %v2758_v33  }
  0x84   :  { %2443 = vset.pattern.permute.xlu1 %v3756_v34 }
  0x85   :  { %826 = vperm.xlu1 %2443, %v2669_v2  }
  0x87   :  { %2461 = vset.pattern.permute.xlu0 %v2593_v8 }
  0x88   :  { %1396 = vperm.xlu0 %2461, %v2758_v33  }
  0x89   :  { %855 = vrot.lane.b32.xlu1 %v2671_v3, %s2609_s7 }
  0x8a   :  { %2445 = vset.pattern.permute.xlu1 %v3754_v35 }
  0x8c   :  { %2464 = vset.pattern.permute.xlu0 %v2595_v10 }
  0x8d   :  { %902 = vperm.xlu1 %2445, %v2669_v2   ;;  %1480 = vperm.xlu0 %2464, %v2758_v33  }
  0x91   :  { %2446 = vset.pattern.permute.xlu1 %v3752_v36  ;;  %2465 = vset.pattern.permute.xlu0 %v2596_v11 }
  0x92   :  { %930 = vperm.xlu1 %2446, %v2669_v2   ;;  %1516 = vperm.xlu0 %2465, %v2758_v33  }
  0x96   :  { %985 = vrot.lane.b32.xlu1 %v2676_v4, %s2625_s10  ;;  %2468 = vset.pattern.permute.xlu0 %v2598_v13 }
  0x97   :  { %2449 = vset.pattern.permute.xlu1 %v3751_v37  ;;  %1600 = vperm.xlu0 %2468, %v2758_v33  }
  0x99   :  { %v82_v44 = vpop.permute.xlu1 %81 }
  0x9a   :  { %987 = vrot.lane.b32.xlu1 %v2671_v3, %s2625_s10 }
  0x9b   :  { %2469 = vset.pattern.permute.xlu0 %v2601_v15 }
  0x9c   :  { %1636 = vperm.xlu0 %2469, %v2758_v33  }
  0x9e   :  { %1034 = vperm.xlu1 %2449, %v2669_v2  }
  0xa0   :  { %2472 = vset.pattern.permute.xlu0 %v2602_v16 }
  0xa1   :  { %1720 = vperm.xlu0 %2472, %v2758_v33  }
  0xa2   :  { %v76_v45 = vpop.permute.xlu0 %75  ;;  %2450 = vset.pattern.permute.xlu1 %v3750_v46 }
  0xa3   :  { %1062 = vperm.xlu1 %2450, %v2669_v2  }
  0xa5   :  { %2475 = vset.pattern.permute.xlu0 %v2604_v18 }
  0xa6   :  { %v103_v49 = vpop.permute.xlu1 %102  ;;  %v80_v52 = vpop.permute.xlu0 %79 }
  0xa7   :  { %v86_v55 = vsel %vm85_vm0, %v80_v52, %v82_v44  ;;  %v87_v56 = vsel %vm85_vm0, %v82_v44, %v80_v52  ;;  %1117 = vrot.lane.b32.xlu1 %v2676_v4, %s2628_s11 }
  0xa8   :  { %v99_v59 = vmul.f32 %v2798_v47, %v87_v56  ;;  %v100_v60 = vmul.f32 %v2801_v48, %v86_v55  ;;  %2453 = vset.pattern.permute.xlu1 %v3749_v61 }
  0xaa   :  { %v164_v8 = vrot.slane %v99_v59, %v2804_v50  ;;  %v168_v10 = vrot.slane %v100_v60, %v2804_v50  ;;  %v176_v11 = vrot.slane %v99_v59, %v2806_v51  ;;  %v180_v13 = vrot.slane %v100_v60, %v2806_v51  ;;  %v131_v55 = vpop.permute.xlu0 %130 }
  0xab   :  { %v159_v15 = vpop.permute.xlu1 %158  ;;  %1119 = vrot.lane.b32.xlu1 %v2671_v3, %s2628_s11  ;;  %v108_v16 = vrot.slane %v99_v59, %v2788_v41  ;;  %v112_v18 = vrot.slane %v100_v60, %v2788_v41  ;;  %v120_v38 = vrot.slane %v99_v59, %v2808_v54  ;;  %v124_v39 = vrot.slane %v100_v60, %v2808_v54 }
  0xac   :  { %v169_v43 = vmul.f32 %v164_v8, %v159_v15  ;;  %v170_v44 = vmul.f32 %v168_v10, %v159_v15  ;;  %v181_v52 = vmul.f32 %v176_v11, %v159_v15  ;;  %v182_v53 = vmul.f32 %v180_v13, %v159_v15 }
  0xad   :  { %v113_v56 = vmul.f32 %v108_v16, %v103_v49  ;;  %v114_v61 = vmul.f32 %v112_v18, %v103_v49  ;;  %v125_v46 = vmul.f32 %v120_v38, %v103_v49  ;;  %v126_v37 = vmul.f32 %v124_v39, %v103_v49 }
  0xae   :  { %v136_v36 = vrot.slane %v99_v59, %v2790_v42  ;;  %v140_v31 = vrot.slane %v100_v60, %v2790_v42  ;;  %v148_v35 = vrot.slane %v99_v59, %v2816_v57  ;;  %v152_v30 = vrot.slane %v100_v60, %v2816_v57 }
  0xaf   :  { %v115_v34 = vadd.f32 %v113_v56, %v76_v45  ;;  %v116_v28 = vadd.f32 %v114_v61, %v76_v45  ;;  %v127_v32 = vadd.f32 %v125_v46, %v76_v45  ;;  %v128_v8 = vadd.f32 %v126_v37, %v76_v45  ;;  %1166 = vperm.xlu1 %2453, %v2669_v2  }
  0xb0   :  { %v141_v10 = vmul.f32 %v136_v36, %v131_v55  ;;  %v142_v11 = vmul.f32 %v140_v31, %v131_v55  ;;  %v153_v13 = vmul.f32 %v148_v35, %v131_v55  ;;  %v154_v15 = vmul.f32 %v152_v30, %v131_v55  ;;  %v187_v16 = vpop.permute.xlu1 %186  ;;  %v214_v31 = vpop.permute.xlu0 %213 }
  0xb1   :  { %v192_v49 = vrot.slane %v99_v59, %v2818_v58  ;;  %v196_v18 = vrot.slane %v100_v60, %v2818_v58  ;;  %v204_v38 = vrot.slane %v99_v59, %v2823_v62  ;;  %v208_v39 = vrot.slane %v100_v60, %v2823_v62 }
  0xb2   :  { %v143_v26 = vadd.f32 %v141_v10, %v115_v34  ;;  %v144_v56 = vadd.f32 %v142_v11, %v116_v28  ;;  %v155_v61 = vadd.f32 %v153_v13, %v127_v32  ;;  %v156_v46 = vadd.f32 %v154_v15, %v128_v8 }
  0xb3   :  { %v197_v37 = vmul.f32 %v192_v49, %v187_v16  ;;  %v198_v45 = vmul.f32 %v196_v18, %v187_v16  ;;  %v209_v24 = vmul.f32 %v204_v38, %v187_v16  ;;  %v210_v36 = vmul.f32 %v208_v39, %v187_v16 }
  0xb4   :  { %v2630_v35 = vmov 34   ;;  %v171_v30 = vadd.f32 %v169_v43, %v143_v26  ;;  %v172_v55 = vadd.f32 %v170_v44, %v144_v56  ;;  %v183_v21 = vadd.f32 %v181_v52, %v155_v61  ;;  %v216_v29 = vpop.permute.xlu1 %215  ;;  %v235_v10 = vpop.permute.xlu0 %234 }
  0xb5   :  { %2454 = vset.pattern.permute.xlu1 %v2630_v35  ;;  %v184_v20 = vadd.f32 %v182_v53, %v156_v46  ;;  %v218_v28 = vsel %vm217_vm1, %v214_v31, %v216_v29  ;;  %v219_v32 = vsel %vm217_vm1, %v216_v29, %v214_v31 }
  0xb6   :  { %1194 = vperm.xlu1 %2454, %v2669_v2   ;;  %v2858_v34 = vmul.f32 %v2826_v63, %v219_v32  ;;  %v2861_v59 = vmul.f32 %v2829_v5, %v218_v28  ;;  %v199_v60 = vadd.f32 %v197_v37, %v171_v30  ;;  %v200_v26 = vadd.f32 %v198_v45, %v172_v55 }
  0xb7   :  { %v211_v43 = vadd.f32 %v209_v24, %v183_v21  ;;  %v212_v44 = vadd.f32 %v210_v36, %v184_v20 }
  0xb8   :  { %v240_v52 = vrot.slane %v2858_v34, %v2788_v41  ;;  %v244_v2 = vrot.slane %v2861_v59, %v2788_v41  ;;  %v252_v53 = vrot.slane %v2858_v34, %v2808_v54  ;;  %v256_v29 = vrot.slane %v2861_v59, %v2808_v54  ;;  %v263_v8 = vpop.permute.xlu1 %262 }
  0xb9   :  { %v268_v21 = vrot.slane %v2858_v34, %v2790_v42  ;;  %v272_v20 = vrot.slane %v2861_v59, %v2790_v42  ;;  %v280_v24 = vrot.slane %v2858_v34, %v2816_v57  ;;  %v284_v11 = vrot.slane %v2861_v59, %v2816_v57 }
  0xba   :  { %2456 = vset.pattern.permute.xlu1 %v2587_v0  ;;  %v245_v13 = vmul.f32 %v240_v52, %v235_v10  ;;  %v246_v15 = vmul.f32 %v244_v2, %v235_v10  ;;  %v257_v16 = vmul.f32 %v252_v53, %v235_v10  ;;  %v258_v49 = vmul.f32 %v256_v29, %v235_v10  ;;  %v319_v29 = vpop.permute.xlu0 %318 }
  0xbb   :  { %1263 = vperm.xlu1 %2456, %v2758_v33   ;;  %v273_v56 = vmul.f32 %v268_v21, %v263_v8  ;;  %v274_v61 = vmul.f32 %v272_v20, %v263_v8  ;;  %v285_v46 = vmul.f32 %v280_v24, %v263_v8  ;;  %v286_v37 = vmul.f32 %v284_v11, %v263_v8 }
  0xbc   :  { %v247_v0 = vadd.f32 %v245_v13, %v199_v60  ;;  %v248_v18 = vadd.f32 %v246_v15, %v200_v26  ;;  %v259_v38 = vadd.f32 %v257_v16, %v211_v43  ;;  %v260_v39 = vadd.f32 %v258_v49, %v212_v44  ;;  %v59_v43 = vld [vmem:[#allocation5 + $0x2] ss:$8 sm:$0x3] }
  0xbd   :  { %v291_v45 = vpop.permute.xlu1 %290  ;;  %v296_v28 = vrot.slane %v2858_v34, %v2804_v50  ;;  %v300_v32 = vrot.slane %v2861_v59, %v2804_v50  ;;  %v308_v60 = vrot.slane %v2858_v34, %v2806_v51  ;;  %v312_v26 = vrot.slane %v2861_v59, %v2806_v51 }
  0xbe   :  { %v275_v36 = vadd.f32 %v273_v56, %v247_v0  ;;  %v276_v31 = vadd.f32 %v274_v61, %v248_v18  ;;  %v287_v30 = vadd.f32 %v285_v46, %v259_v38  ;;  %v288_v55 = vadd.f32 %v286_v37, %v260_v39 }
  0xbf   :  { %2457 = vset.pattern.permute.xlu1 %v2588_v1  ;;  %v324_v1 = vrot.slane %v2858_v34, %v2818_v58  ;;  %v328_v44 = vrot.slane %v2861_v59, %v2818_v58  ;;  %v336_v52 = vrot.slane %v2858_v34, %v2823_v62  ;;  %v340_v2 = vrot.slane %v2861_v59, %v2823_v62 }
  0xc0   :  { %1276 = vperm.xlu1 %2457, %v2758_v33   ;;  %v301_v8 = vmul.f32 %v296_v28, %v291_v45  ;;  %v302_v10 = vmul.f32 %v300_v32, %v291_v45  ;;  %v313_v21 = vmul.f32 %v308_v60, %v291_v45  ;;  %v314_v20 = vmul.f32 %v312_v26, %v291_v45 }
  0xc1   :  { %v346_v53 = vpop.permute.xlu1 %345  ;;  %v2903_v24 = vrot.slane %v59_v43, %v2788_v41  ;;  %v2906_v34 = vrot.slane %v59_v43, %v2790_v42  ;;  %v329_v16 = vmul.f32 %v324_v1, %v319_v29  ;;  %v330_v49 = vmul.f32 %v328_v44, %v319_v29 }
  0xc2   :  { %v303_v11 = vadd.f32 %v301_v8, %v275_v36  ;;  %v304_v59 = vadd.f32 %v302_v10, %v276_v31  ;;  %v315_v13 = vadd.f32 %v313_v21, %v287_v30  ;;  %v316_v15 = vadd.f32 %v314_v20, %v288_v55 }
  0xc3   :  { %v341_v18 = vmul.f32 %v336_v52, %v319_v29  ;;  %v342_v38 = vmul.f32 %v340_v2, %v319_v29 }
  0xc4   :  { %2459 = vset.pattern.permute.xlu1 %v2591_v6  ;;  %v331_v46 = vadd.f32 %v329_v16, %v303_v11  ;;  %v332_v37 = vadd.f32 %v330_v49, %v304_v59 }
  0xc5   :  { %1332 = vperm.xlu1 %2459, %v2758_v33   ;;  %v348_v0 = vpop.permute.xlu1 %347  ;;  %v343_v45 = vadd.f32 %v341_v18, %v315_v13  ;;  %v344_v36 = vadd.f32 %v342_v38, %v316_v15 }
  0xc6   :  { %v350_v6 = vsel %vm349_vm2, %v346_v53, %v348_v0  ;;  %v351_v39 = vsel %vm349_vm2, %v348_v0, %v346_v53 }
  0xc7   :  { %v2913_v56 = vmul.f32 %v2903_v24, %v351_v39  ;;  %v2916_v61 = vmul.f32 %v2906_v34, %v350_v6 }
  0xc9   :  { %2460 = vset.pattern.permute.xlu1 %v2592_v7  ;;  %v372_v31 = vrot.slane %v2913_v56, %v2788_v41  ;;  %v376_v30 = vrot.slane %v2916_v61, %v2788_v41  ;;  %v384_v55 = vrot.slane %v2913_v56, %v2808_v54  ;;  %v388_v28 = vrot.slane %v2916_v61, %v2808_v54  ;;  %v395_v32 = vpop.permute.xlu1 %394  ;;  %v367_v7 = vpop.permute.xlu0 %366 }
  0xca   :  { %1360 = vperm.xlu1 %2460, %v2758_v33   ;;  %v400_v60 = vrot.slane %v2913_v56, %v2790_v42  ;;  %v404_v26 = vrot.slane %v2916_v61, %v2790_v42  ;;  %v412_v43 = vrot.slane %v2913_v56, %v2816_v57  ;;  %v416_v1 = vrot.slane %v2916_v61, %v2816_v57 }
  0xcb   :  { %v377_v44 = vmul.f32 %v372_v31, %v367_v7  ;;  %v378_v52 = vmul.f32 %v376_v30, %v367_v7  ;;  %v389_v2 = vmul.f32 %v384_v55, %v367_v7  ;;  %v390_v53 = vmul.f32 %v388_v28, %v367_v7 }
  0xcc   :  { %v405_v20 = vmul.f32 %v400_v60, %v395_v32  ;;  %v406_v11 = vmul.f32 %v404_v26, %v395_v32  ;;  %v417_v59 = vmul.f32 %v412_v43, %v395_v32  ;;  %v418_v13 = vmul.f32 %v416_v1, %v395_v32 }
  0xcd   :  { %v379_v29 = vadd.f32 %v377_v44, %v331_v46  ;;  %v380_v8 = vadd.f32 %v378_v52, %v332_v37  ;;  %v391_v10 = vadd.f32 %v389_v2, %v343_v45  ;;  %v392_v21 = vadd.f32 %v390_v53, %v344_v36  ;;  %v61_v46 = vld [vmem:[#allocation5 + $0x3] ss:$8 sm:$0x3]  ;;  %v451_v55 = vpop.permute.xlu0 %450 }
  0xce   :  { %2462 = vset.pattern.permute.xlu1 %v2594_v9  ;;  %v423_v15 = vpop.permute.xlu1 %422  ;;  %v428_v38 = vrot.slane %v2913_v56, %v2804_v50  ;;  %v432_v9 = vrot.slane %v2916_v61, %v2804_v50  ;;  %v440_v6 = vrot.slane %v2913_v56, %v2806_v51  ;;  %v444_v39 = vrot.slane %v2916_v61, %v2806_v51 }
  0xcf   :  { %1424 = vperm.xlu1 %2462, %v2758_v33   ;;  %v407_v16 = vadd.f32 %v405_v20, %v379_v29  ;;  %v408_v49 = vadd.f32 %v406_v11, %v380_v8  ;;  %v419_v0 = vadd.f32 %v417_v59, %v391_v10  ;;  %v420_v18 = vadd.f32 %v418_v13, %v392_v21 }
  0xd0   :  { %v456_v37 = vrot.slane %v2913_v56, %v2818_v58  ;;  %v460_v45 = vrot.slane %v2916_v61, %v2818_v58  ;;  %v468_v36 = vrot.slane %v2913_v56, %v2823_v62  ;;  %v472_v31 = vrot.slane %v2916_v61, %v2823_v62 }
  0xd1   :  { %v433_v28 = vmul.f32 %v428_v38, %v423_v15  ;;  %v434_v32 = vmul.f32 %v432_v9, %v423_v15  ;;  %v446_v7 = vmul.f32 %v444_v39, %v423_v15  ;;  %v2958_v60 = vrot.slane %v61_v46, %v2788_v41 }
  0xd2   :  { %v478_v30 = vpop.permute.xlu1 %477  ;;  %v2961_v26 = vrot.slane %v61_v46, %v2790_v42  ;;  %v461_v44 = vmul.f32 %v456_v37, %v451_v55  ;;  %v462_v52 = vmul.f32 %v460_v45, %v451_v55  ;;  %v473_v53 = vmul.f32 %v468_v36, %v451_v55 }
  0xd3   :  { %2463 = vset.pattern.permute.xlu1 %v2597_v12  ;;  %v445_v12 = vmul.f32 %v440_v6, %v423_v15  ;;  %v435_v56 = vadd.f32 %v433_v28, %v407_v16  ;;  %v436_v43 = vadd.f32 %v434_v32, %v408_v49  ;;  %v448_v61 = vadd.f32 %v446_v7, %v420_v18 }
  0xd4   :  { %1452 = vperm.xlu1 %2463, %v2758_v33   ;;  %v474_v29 = vmul.f32 %v472_v31, %v451_v55  ;;  %v620_v28 = vrot.slane %v2671_v3, %v2788_v41  ;;  %v632_v32 = vrot.slane %v2671_v3, %v2808_v54 }
  0xd5   :  { %v447_v1 = vadd.f32 %v445_v12, %v419_v0  ;;  %v463_v11 = vadd.f32 %v461_v44, %v435_v56  ;;  %v464_v59 = vadd.f32 %v462_v52, %v436_v43 }
  0xd6   :  { %v480_v2 = vpop.permute.xlu1 %479  ;;  %v476_v15 = vadd.f32 %v474_v29, %v448_v61 }
  0xd7   :  { %v482_v8 = vsel %vm481_vm3, %v478_v30, %v480_v2  ;;  %v483_v10 = vsel %vm481_vm3, %v480_v2, %v478_v30  ;;  %v475_v13 = vadd.f32 %v473_v53, %v447_v1 }
  0xd8   :  { %2466 = vset.pattern.permute.xlu1 %v2600_v14  ;;  %v495_v21 = vmul.f32 %v2958_v60, %v483_v10  ;;  %v496_v20 = vmul.f32 %v2961_v26, %v482_v8  ;;  %v499_v14 = vpop.permute.xlu0 %498  ;;  %v616_v8 = vrot.slane %v2676_v4, %v2788_v41  ;;  %v628_v10 = vrot.slane %v2676_v4, %v2808_v54 }
  0xd9   :  { %1544 = vperm.xlu1 %2466, %v2758_v33  }
  0xda   :  { %v504_v16 = vrot.slane %v495_v21, %v2788_v41  ;;  %v508_v49 = vrot.slane %v496_v20, %v2788_v41  ;;  %v516_v0 = vrot.slane %v495_v21, %v2808_v54  ;;  %v520_v18 = vrot.slane %v496_v20, %v2808_v54  ;;  %v527_v38 = vpop.permute.xlu1 %526 }
  0xdb   :  { %v532_v9 = vrot.slane %v495_v21, %v2790_v42  ;;  %v536_v6 = vrot.slane %v496_v20, %v2790_v42  ;;  %v544_v39 = vrot.slane %v495_v21, %v2816_v57  ;;  %v548_v46 = vrot.slane %v496_v20, %v2816_v57 }
  0xdc   :  { %v509_v37 = vmul.f32 %v504_v16, %v499_v14  ;;  %v510_v45 = vmul.f32 %v508_v49, %v499_v14  ;;  %v521_v36 = vmul.f32 %v516_v0, %v499_v14  ;;  %v522_v31 = vmul.f32 %v520_v18, %v499_v14  ;;  %v583_v2 = vpop.permute.xlu0 %582 }
  0xdd   :  { %2467 = vset.pattern.permute.xlu1 %v2603_v17  ;;  %v537_v30 = vmul.f32 %v532_v9, %v527_v38  ;;  %v538_v55 = vmul.f32 %v536_v6, %v527_v38  ;;  %v549_v1 = vmul.f32 %v544_v39, %v527_v38  ;;  %v550_v17 = vmul.f32 %v548_v46, %v527_v38 }
  0xde   :  { %1572 = vperm.xlu1 %2467, %v2758_v33   ;;  %v511_v12 = vadd.f32 %v509_v37, %v463_v11  ;;  %v512_v7 = vadd.f32 %v510_v45, %v464_v59  ;;  %v523_v56 = vadd.f32 %v521_v36, %v475_v13  ;;  %v524_v43 = vadd.f32 %v522_v31, %v476_v15 }
  0xdf   :  { %v588_v61 = vrot.slane %v495_v21, %v2818_v58  ;;  %v592_v44 = vrot.slane %v496_v20, %v2818_v58  ;;  %v555_v52 = vpop.permute.xlu1 %554  ;;  %v600_v53 = vrot.slane %v495_v21, %v2823_v62  ;;  %v604_v29 = vrot.slane %v496_v20, %v2823_v62 }
  0xe0   :  { %v539_v11 = vadd.f32 %v537_v30, %v511_v12  ;;  %v540_v59 = vadd.f32 %v538_v55, %v512_v7  ;;  %v551_v13 = vadd.f32 %v549_v1, %v523_v56  ;;  %v552_v15 = vadd.f32 %v550_v17, %v524_v43 }
  0xe1   :  { %v560_v14 = vrot.slane %v495_v21, %v2804_v50  ;;  %v564_v16 = vrot.slane %v496_v20, %v2804_v50  ;;  %v572_v49 = vrot.slane %v495_v21, %v2806_v51  ;;  %v593_v0 = vmul.f32 %v588_v61, %v583_v2 }
  0xe2   :  { %2470 = vset.pattern.permute.xlu1 %v2606_v19  ;;  %v576_v19 = vrot.slane %v496_v20, %v2806_v51  ;;  %v594_v18 = vmul.f32 %v592_v44, %v583_v2  ;;  %v648_v38 = vrot.slane %v2671_v3, %v2790_v42  ;;  %v660_v9 = vrot.slane %v2671_v3, %v2816_v57 }
  0xe3   :  { %1664 = vperm.xlu1 %2470, %v2758_v33   ;;  %v565_v6 = vmul.f32 %v560_v14, %v555_v52  ;;  %v566_v39 = vmul.f32 %v564_v16, %v555_v52  ;;  %v577_v46 = vmul.f32 %v572_v49, %v555_v52  ;;  %v605_v36 = vmul.f32 %v600_v53, %v583_v2 }
  0xe4   :  { %v578_v37 = vmul.f32 %v576_v19, %v555_v52  ;;  %v611_v45 = vpop.permute.xlu1 %610  ;;  %v606_v31 = vmul.f32 %v604_v29, %v583_v2  ;;  %v644_v1 = vrot.slane %v2676_v4, %v2790_v42  ;;  %v656_v17 = vrot.slane %v2676_v4, %v2816_v57 }
  0xe5   :  { %v621_v30 = vmul.f32 %v616_v8, %v611_v45  ;;  %v622_v55 = vmul.f32 %v620_v28, %v611_v45  ;;  %v567_v21 = vadd.f32 %v565_v6, %v539_v11  ;;  %v568_v20 = vadd.f32 %v566_v39, %v540_v59 }
  0xe6   :  { %v579_v12 = vadd.f32 %v577_v46, %v551_v13  ;;  %v580_v7 = vadd.f32 %v578_v37, %v552_v15  ;;  %v633_v56 = vmul.f32 %v628_v10, %v611_v45  ;;  %v634_v43 = vmul.f32 %v632_v32, %v611_v45  ;;  %v667_v10 = vpop.permute.xlu0 %666  ;;  %v63_v46 = vld [vmem:[#allocation5 + $0x5] ss:$8 sm:$0x3] }
  0xe7   :  { %2471 = vset.pattern.permute.xlu1 %v2611_v22  ;;  %v595_v61 = vadd.f32 %v593_v0, %v567_v21  ;;  %v596_v44 = vadd.f32 %v594_v18, %v568_v20  ;;  %v676_v22 = vrot.slane %v2671_v3, %v2804_v50  ;;  %v672_v53 = vrot.slane %v2676_v4, %v2804_v50 }
  0xe8   :  { %1692 = vperm.xlu1 %2471, %v2758_v33   ;;  %v607_v52 = vadd.f32 %v605_v36, %v579_v12  ;;  %v608_v28 = vadd.f32 %v606_v31, %v580_v7  ;;  %v688_v32 = vrot.slane %v2671_v3, %v2806_v51  ;;  %v684_v11 = vrot.slane %v2676_v4, %v2806_v51 }
  0xe9   :  { %v639_v2 = vpop.permute.xlu1 %638  ;;  %v623_v29 = vadd.f32 %v621_v30, %v595_v61  ;;  %v624_v8 = vadd.f32 %v622_v55, %v596_v44  ;;  %v704_v19 = vrot.slane %v2671_v3, %v2818_v58  ;;  %v677_v6 = vmul.f32 %v672_v53, %v667_v10 }
  0xea   :  { %v649_v59 = vmul.f32 %v644_v1, %v639_v2  ;;  %v650_v13 = vmul.f32 %v648_v38, %v639_v2  ;;  %v661_v15 = vmul.f32 %v656_v17, %v639_v2  ;;  %v662_v14 = vmul.f32 %v660_v9, %v639_v2  ;;  %v724_v55 = vpop.permute.xlu0 %723 }
  0xeb   :  { %v635_v16 = vadd.f32 %v633_v56, %v607_v52  ;;  %v636_v49 = vadd.f32 %v634_v43, %v608_v28  ;;  %v678_v39 = vmul.f32 %v676_v22, %v667_v10  ;;  %v689_v38 = vmul.f32 %v684_v11, %v667_v10 }
  0xec   :  { %2473 = vset.pattern.permute.xlu1 %v2612_v23  ;;  %v700_v23 = vrot.slane %v2676_v4, %v2818_v58  ;;  %v651_v0 = vadd.f32 %v649_v59, %v623_v29  ;;  %v652_v18 = vadd.f32 %v650_v13, %v624_v8  ;;  %v690_v36 = vmul.f32 %v688_v32, %v667_v10 }
  0xed   :  { %1748 = vperm.xlu1 %2473, %v2758_v33   ;;  %v663_v37 = vadd.f32 %v661_v15, %v635_v16  ;;  %v664_v45 = vadd.f32 %v662_v14, %v636_v49  ;;  %v716_v31 = vrot.slane %v2671_v3, %v2823_v62  ;;  %v712_v30 = vrot.slane %v2676_v4, %v2823_v62 }
  0xee   :  { %v695_v9 = vpop.permute.xlu1 %694  ;;  %v3031_v21 = vrot.slane %v63_v46, %v2788_v41  ;;  %v3034_v20 = vrot.slane %v63_v46, %v2790_v42  ;;  %v679_v12 = vadd.f32 %v677_v6, %v651_v0  ;;  %v680_v7 = vadd.f32 %v678_v39, %v652_v18 }
  0xef   :  { %v691_v56 = vadd.f32 %v689_v38, %v663_v37  ;;  %v692_v3 = vadd.f32 %v690_v36, %v664_v45  ;;  %v705_v43 = vmul.f32 %v700_v23, %v695_v9  ;;  %v706_v1 = vmul.f32 %v704_v19, %v695_v9  ;;  %v771_v23 = vpop.permute.xlu0 %770 }
  0xf0   :  { %3778 = vst [vmem:[#allocation12_spill] sm:$0xff] %v3034_v20  ;;  %v717_v17 = vmul.f32 %v712_v30, %v695_v9 }
  0xf1   :  { %2474 = vset.pattern.permute.xlu1 %v2614_v25  ;;  %v718_v25 = vmul.f32 %v716_v31, %v695_v9  ;;  %v707_v8 = vadd.f32 %v705_v43, %v679_v12  ;;  %v708_v32 = vadd.f32 %v706_v1, %v680_v7  ;;  %v65_v43 = vld [vmem:[#allocation5 + $0x6] ss:$8 sm:$0x3] }
  0xf2   :  { %1776 = vperm.xlu1 %2474, %v2758_v33   ;;  %v722_v4 = vpop.permute.xlu1 %721  ;;  %v719_v10 = vadd.f32 %v717_v17, %v691_v56 }
  0xf3   :  { %v726_v33 = vsel %vm725_vm4, %v722_v4, %v724_v55  ;;  %v727_v61 = vsel %vm725_vm4, %v724_v55, %v722_v4  ;;  %v720_v11 = vadd.f32 %v718_v25, %v692_v3 }
  0xf4   :  { %v739_v44 = vmul.f32 %v3031_v21, %v726_v33  ;;  %v740_v52 = vmul.f32 %v3034_v20, %v727_v61 }
  0xf6   :  { %2476 = vset.pattern.permute.xlu1 %v2616_v27  ;;  %v743_v28 = vpop.permute.xlu1 %742  ;;  %v748_v2 = vrot.slane %v739_v44, %v2788_v41  ;;  %v752_v22 = vrot.slane %v740_v52, %v2788_v41  ;;  %v760_v53 = vrot.slane %v739_v44, %v2808_v54  ;;  %v764_v29 = vrot.slane %v740_v52, %v2808_v54 }
  0xf7   :  { %v776_v16 = vrot.slane %v739_v44, %v2790_v42  ;;  %v780_v27 = vrot.slane %v740_v52, %v2790_v42  ;;  %v788_v49 = vrot.slane %v739_v44, %v2816_v57  ;;  %v792_v19 = vrot.slane %v740_v52, %v2816_v57 }
  0xf8   :  { %v753_v59 = vmul.f32 %v748_v2, %v743_v28  ;;  %v754_v13 = vmul.f32 %v752_v22, %v743_v28  ;;  %v765_v15 = vmul.f32 %v760_v53, %v743_v28  ;;  %v766_v14 = vmul.f32 %v764_v29, %v743_v28 }
  0xf9   :  { %v781_v37 = vmul.f32 %v776_v16, %v771_v23  ;;  %v782_v45 = vmul.f32 %v780_v27, %v771_v23  ;;  %v793_v38 = vmul.f32 %v788_v49, %v771_v23  ;;  %v794_v36 = vmul.f32 %v792_v19, %v771_v23 }
  0xfa   :  { %v755_v0 = vadd.f32 %v753_v59, %v707_v8  ;;  %v756_v18 = vadd.f32 %v754_v13, %v708_v32  ;;  %v767_v6 = vadd.f32 %v765_v15, %v719_v10  ;;  %v768_v39 = vadd.f32 %v766_v14, %v720_v11  ;;  %v854_v59 = vpop.permute.xlu0 %853 }
  0xfb   :  { %v799_v46 = vpop.permute.xlu1 %798  ;;  %v804_v9 = vrot.slane %v739_v44, %v2804_v50  ;;  %v808_v31 = vrot.slane %v740_v52, %v2804_v50  ;;  %v816_v30 = vrot.slane %v739_v44, %v2806_v51  ;;  %v820_v55 = vrot.slane %v740_v52, %v2806_v51 }
  0xfc   :  { %v783_v12 = vadd.f32 %v781_v37, %v755_v0  ;;  %v784_v7 = vadd.f32 %v782_v45, %v756_v18  ;;  %v795_v56 = vadd.f32 %v793_v38, %v767_v6  ;;  %v796_v3 = vadd.f32 %v794_v36, %v768_v39 }
  0xfd   :  { %v809_v1 = vmul.f32 %v804_v9, %v799_v46  ;;  %v810_v4 = vmul.f32 %v808_v31, %v799_v46  ;;  %v821_v17 = vmul.f32 %v816_v30, %v799_v46  ;;  %v822_v25 = vmul.f32 %v820_v55, %v799_v46 }
  0xfe   :  { %v832_v61 = vrot.slane %v739_v44, %v2818_v58  ;;  %v836_v28 = vrot.slane %v740_v52, %v2818_v58  ;;  %v844_v2 = vrot.slane %v739_v44, %v2823_v62  ;;  %v848_v22 = vrot.slane %v740_v52, %v2823_v62  ;;  %v875_v36 = vpop.permute.xlu0 %874 }
  0xff   :  { %v3061_v53 = vrot.slane %v65_v43, %v2788_v41  ;;  %v3064_v29 = vrot.slane %v65_v43, %v2790_v42  ;;  %v811_v13 = vadd.f32 %v809_v1, %v783_v12  ;;  %v812_v15 = vadd.f32 %v810_v4, %v784_v7 }
 0x100   :  { %v827_v33 = vpop.permute.xlu1 %826  ;;  %v823_v16 = vadd.f32 %v821_v17, %v795_v56  ;;  %v824_v44 = vadd.f32 %v822_v25, %v796_v3 }
 0x101   :  { %3779 = vst [vmem:[#allocation13_spill] sm:$0xff] %v3061_v53  ;;  %3780 = vst [vmem:[#allocation14_spill] sm:$0xff] %v3064_v29  ;;  %v837_v8 = vmul.f32 %v832_v61, %v827_v33  ;;  %v838_v32 = vmul.f32 %v836_v28, %v827_v33  ;;  %v849_v10 = vmul.f32 %v844_v2, %v827_v33 }
 0x102   :  { %v850_v11 = vmul.f32 %v848_v22, %v827_v33 }
 0x103   :  { %v839_v23 = vadd.f32 %v837_v8, %v811_v13  ;;  %v840_v0 = vadd.f32 %v838_v32, %v812_v15  ;;  %v851_v18 = vadd.f32 %v849_v10, %v823_v16 }
 0x104   :  { %v856_v14 = vpop.permute.xlu1 %855  ;;  %v852_v6 = vadd.f32 %v850_v11, %v824_v44 }
 0x105   :  { %v858_v52 = vsel %vm857_vm5, %v854_v59, %v856_v14  ;;  %v859_v27 = vsel %vm857_vm5, %v856_v14, %v854_v59  ;;  %v67_v14 = vld [vmem:[#allocation5 + $0x7] ss:$8 sm:$0x3] }
 0x106   :  { %v871_v49 = vmul.f32 %v3061_v53, %v858_v52  ;;  %v872_v19 = vmul.f32 %v3064_v29, %v859_v27 }
 0x108   :  { %v880_v39 = vrot.slane %v871_v49, %v2788_v41  ;;  %v884_v46 = vrot.slane %v872_v19, %v2788_v41  ;;  %v892_v37 = vrot.slane %v871_v49, %v2808_v54  ;;  %v896_v45 = vrot.slane %v872_v19, %v2808_v54  ;;  %v903_v38 = vpop.permute.xlu1 %902 }
 0x109   :  { %v908_v9 = vrot.slane %v871_v49, %v2790_v42  ;;  %v912_v31 = vrot.slane %v872_v19, %v2790_v42  ;;  %v920_v30 = vrot.slane %v871_v49, %v2816_v57  ;;  %v924_v55 = vrot.slane %v872_v19, %v2816_v57 }
 0x10a   :  { %v885_v12 = vmul.f32 %v880_v39, %v875_v36  ;;  %v886_v7 = vmul.f32 %v884_v46, %v875_v36  ;;  %v897_v56 = vmul.f32 %v892_v37, %v875_v36  ;;  %v898_v3 = vmul.f32 %v896_v45, %v875_v36 }
 0x10b   :  { %v913_v25 = vmul.f32 %v908_v9, %v903_v38  ;;  %v914_v33 = vmul.f32 %v912_v31, %v903_v38  ;;  %v925_v61 = vmul.f32 %v920_v30, %v903_v38  ;;  %v926_v28 = vmul.f32 %v924_v55, %v903_v38 }
 0x10c   :  { %v887_v43 = vadd.f32 %v885_v12, %v839_v23  ;;  %v888_v1 = vadd.f32 %v886_v7, %v840_v0  ;;  %v899_v4 = vadd.f32 %v897_v56, %v851_v18  ;;  %v900_v17 = vadd.f32 %v898_v3, %v852_v6  ;;  %v959_v0 = vpop.permute.xlu0 %958 }
 0x10d   :  { %v931_v2 = vpop.permute.xlu1 %930  ;;  %v936_v11 = vrot.slane %v871_v49, %v2804_v50  ;;  %v940_v59 = vrot.slane %v872_v19, %v2804_v50  ;;  %v948_v13 = vrot.slane %v871_v49, %v2806_v51  ;;  %v952_v15 = vrot.slane %v872_v19, %v2806_v51 }
 0x10e   :  { %v915_v22 = vadd.f32 %v913_v25, %v887_v43  ;;  %v916_v8 = vadd.f32 %v914_v33, %v888_v1  ;;  %v927_v32 = vadd.f32 %v925_v61, %v899_v4  ;;  %v928_v10 = vadd.f32 %v926_v28, %v900_v17 }
 0x10f   :  { %v964_v16 = vrot.slane %v871_v49, %v2818_v58  ;;  %v968_v44 = vrot.slane %v872_v19, %v2818_v58  ;;  %v976_v52 = vrot.slane %v871_v49, %v2823_v62  ;;  %v980_v27 = vrot.slane %v872_v19, %v2823_v62 }
 0x110   :  { %v941_v18 = vmul.f32 %v936_v11, %v931_v2  ;;  %v942_v6 = vmul.f32 %v940_v59, %v931_v2  ;;  %v953_v39 = vmul.f32 %v948_v13, %v931_v2  ;;  %v954_v46 = vmul.f32 %v952_v15, %v931_v2 }
 0x111   :  { %v986_v23 = vpop.permute.xlu1 %985  ;;  %v3090_v37 = vrot.slane %v67_v14, %v2788_v41  ;;  %v3093_v45 = vrot.slane %v67_v14, %v2790_v42  ;;  %v969_v31 = vmul.f32 %v964_v16, %v959_v0  ;;  %v970_v19 = vmul.f32 %v968_v44, %v959_v0 }
 0x112   :  { %v943_v38 = vadd.f32 %v941_v18, %v915_v22  ;;  %v944_v36 = vadd.f32 %v942_v6, %v916_v8  ;;  %v955_v9 = vadd.f32 %v953_v39, %v927_v32  ;;  %v956_v49 = vadd.f32 %v954_v46, %v928_v10  ;;  %v1007_v8 = vpop.permute.xlu0 %1006 }
 0x113   :  { %3781 = vst [vmem:[#allocation15_spill] sm:$0xff] %v3090_v37  ;;  %3782 = vst [vmem:[#allocation16_spill] sm:$0xff] %v3093_v45  ;;  %v981_v55 = vmul.f32 %v976_v52, %v959_v0  ;;  %v982_v12 = vmul.f32 %v980_v27, %v959_v0 }
 0x114   :  { %v971_v1 = vadd.f32 %v969_v31, %v943_v38  ;;  %v972_v4 = vadd.f32 %v970_v19, %v944_v36 }
 0x115   :  { %v988_v30 = vpop.permute.xlu1 %987  ;;  %v983_v17 = vadd.f32 %v981_v55, %v955_v9  ;;  %v984_v25 = vadd.f32 %v982_v12, %v956_v49  ;;  %v69_v12 = vld [vmem:[#allocation5 + $0x10] ss:$8 sm:$0x3] }
 0x116   :  { %v990_v7 = vsel %vm989_vm6, %v986_v23, %v988_v30  ;;  %v991_v56 = vsel %vm989_vm6, %v988_v30, %v986_v23 }
 0x117   :  { %v1003_v3 = vmul.f32 %v3090_v37, %v990_v7  ;;  %v1004_v43 = vmul.f32 %v3093_v45, %v991_v56 }
 0x119   :  { %v1012_v33 = vrot.slane %v1003_v3, %v2788_v41  ;;  %v1016_v61 = vrot.slane %v1004_v43, %v2788_v41  ;;  %v1024_v28 = vrot.slane %v1003_v3, %v2808_v54  ;;  %v1028_v2 = vrot.slane %v1004_v43, %v2808_v54  ;;  %v1035_v22 = vpop.permute.xlu1 %1034 }
 0x11a   :  { %v1040_v32 = vrot.slane %v1003_v3, %v2790_v42  ;;  %v1044_v10 = vrot.slane %v1004_v43, %v2790_v42  ;;  %v1052_v11 = vrot.slane %v1003_v3, %v2816_v57  ;;  %v1056_v59 = vrot.slane %v1004_v43, %v2816_v57 }
 0x11b   :  { %v1017_v13 = vmul.f32 %v1012_v33, %v1007_v8  ;;  %v1018_v15 = vmul.f32 %v1016_v61, %v1007_v8  ;;  %v1029_v14 = vmul.f32 %v1024_v28, %v1007_v8  ;;  %v1030_v16 = vmul.f32 %v1028_v2, %v1007_v8 }
 0x11c   :  { %v1045_v0 = vmul.f32 %v1040_v32, %v1035_v22  ;;  %v1046_v18 = vmul.f32 %v1044_v10, %v1035_v22  ;;  %v1057_v6 = vmul.f32 %v1052_v11, %v1035_v22  ;;  %v1058_v39 = vmul.f32 %v1056_v59, %v1035_v22 }
 0x11d   :  { %v1019_v44 = vadd.f32 %v1017_v13, %v971_v1  ;;  %v1020_v52 = vadd.f32 %v1018_v15, %v972_v4  ;;  %v1031_v27 = vadd.f32 %v1029_v14, %v983_v17  ;;  %v1032_v23 = vadd.f32 %v1030_v16, %v984_v25  ;;  %v1091_v25 = vpop.permute.xlu0 %1090 }
 0x11e   :  { %v1063_v46 = vpop.permute.xlu1 %1062  ;;  %v1068_v31 = vrot.slane %v1003_v3, %v2804_v50  ;;  %v1072_v19 = vrot.slane %v1004_v43, %v2804_v50  ;;  %v1080_v30 = vrot.slane %v1003_v3, %v2806_v51  ;;  %v1084_v55 = vrot.slane %v1004_v43, %v2806_v51 }
 0x11f   :  { %v1047_v38 = vadd.f32 %v1045_v0, %v1019_v44  ;;  %v1048_v36 = vadd.f32 %v1046_v18, %v1020_v52  ;;  %v1059_v9 = vadd.f32 %v1057_v6, %v1031_v27  ;;  %v1060_v49 = vadd.f32 %v1058_v39, %v1032_v23 }
 0x120   :  { %v1096_v7 = vrot.slane %v1003_v3, %v2818_v58  ;;  %v1100_v56 = vrot.slane %v1004_v43, %v2818_v58  ;;  %v1108_v1 = vrot.slane %v1003_v3, %v2823_v62  ;;  %v1112_v4 = vrot.slane %v1004_v43, %v2823_v62 }
 0x121   :  { %v1073_v33 = vmul.f32 %v1068_v31, %v1063_v46  ;;  %v1074_v61 = vmul.f32 %v1072_v19, %v1063_v46  ;;  %v1085_v28 = vmul.f32 %v1080_v30, %v1063_v46  ;;  %v1086_v2 = vmul.f32 %v1084_v55, %v1063_v46 }
 0x122   :  { %v1118_v17 = vpop.permute.xlu1 %1117  ;;  %v3119_v22 = vrot.slane %v69_v12, %v2788_v41  ;;  %v3122_v8 = vrot.slane %v69_v12, %v2790_v42  ;;  %v1101_v59 = vmul.f32 %v1096_v7, %v1091_v25  ;;  %v1102_v43 = vmul.f32 %v1100_v56, %v1091_v25 }
 0x123   :  { %v1075_v32 = vadd.f32 %v1073_v33, %v1047_v38  ;;  %v1076_v10 = vadd.f32 %v1074_v61, %v1048_v36  ;;  %v1087_v11 = vadd.f32 %v1085_v28, %v1059_v9  ;;  %v1088_v3 = vadd.f32 %v1086_v2, %v1060_v49  ;;  %v1139_v9 = vpop.permute.xlu0 %1138 }
 0x124   :  { %3783 = vst [vmem:[#allocation17_spill] sm:$0xff] %v3119_v22  ;;  %3784 = vst [vmem:[#allocation18_spill] sm:$0xff] %v3122_v8  ;;  %v1113_v15 = vmul.f32 %v1108_v1, %v1091_v25  ;;  %v1114_v14 = vmul.f32 %v1112_v4, %v1091_v25 }
 0x125   :  { %v1103_v23 = vadd.f32 %v1101_v59, %v1075_v32  ;;  %v1104_v0 = vadd.f32 %v1102_v43, %v1076_v10 }
 0x126   :  { %v1120_v13 = vpop.permute.xlu1 %1119  ;;  %v1115_v18 = vadd.f32 %v1113_v15, %v1087_v11  ;;  %v1116_v6 = vadd.f32 %v1114_v14, %v1088_v3 }
 0x127   :  { %v1122_v16 = vsel %vm1121_vm7, %v1118_v17, %v1120_v13  ;;  %v1123_v44 = vsel %vm1121_vm7, %v1120_v13, %v1118_v17  ;;  %v1223_v14 = vpop.permute.xlu0 %1222 }
 0x128   :  { %v1135_v52 = vmul.f32 %v3119_v22, %v1122_v16  ;;  %v1136_v27 = vmul.f32 %v3122_v8, %v1123_v44 }
 0x12a   :  { %v1144_v39 = vrot.slane %v1135_v52, %v2788_v41  ;;  %v1148_v46 = vrot.slane %v1136_v27, %v2788_v41  ;;  %v1156_v38 = vrot.slane %v1135_v52, %v2808_v54  ;;  %v1160_v36 = vrot.slane %v1136_v27, %v2808_v54  ;;  %v1167_v49 = vpop.permute.xlu1 %1166 }
 0x12b   :  { %v1172_v31 = vrot.slane %v1135_v52, %v2790_v42  ;;  %v1176_v19 = vrot.slane %v1136_v27, %v2790_v42  ;;  %v1184_v30 = vrot.slane %v1135_v52, %v2816_v57  ;;  %v1188_v55 = vrot.slane %v1136_v27, %v2816_v57 }
 0x12c   :  { %v1149_v12 = vmul.f32 %v1144_v39, %v1139_v9  ;;  %v1150_v7 = vmul.f32 %v1148_v46, %v1139_v9  ;;  %v1161_v56 = vmul.f32 %v1156_v38, %v1139_v9  ;;  %v1162_v1 = vmul.f32 %v1160_v36, %v1139_v9 }
 0x12d   :  { %v1177_v61 = vmul.f32 %v1172_v31, %v1167_v49  ;;  %v1178_v28 = vmul.f32 %v1176_v19, %v1167_v49  ;;  %v1189_v2 = vmul.f32 %v1184_v30, %v1167_v49  ;;  %v1190_v32 = vmul.f32 %v1188_v55, %v1167_v49 }
 0x12e   :  { %v1151_v4 = vadd.f32 %v1149_v12, %v1103_v23  ;;  %v1152_v17 = vadd.f32 %v1150_v7, %v1104_v0  ;;  %v1163_v25 = vadd.f32 %v1161_v56, %v1115_v18  ;;  %v1164_v33 = vadd.f32 %v1162_v1, %v1116_v6 }
 0x12f   :  { %v1240_v10 = vrot.slane %v1135_v52, %v2823_v62  ;;  %v1244_v11 = vrot.slane %v1136_v27, %v2823_v62  ;;  %v1200_v16 = vrot.slane %v1135_v52, %v2804_v50  ;;  %v1204_v44 = vrot.slane %v1136_v27, %v2804_v50 }
 0x130   :  { %v1179_v3 = vadd.f32 %v1177_v61, %v1151_v4  ;;  %v1180_v59 = vadd.f32 %v1178_v28, %v1152_v17  ;;  %v1191_v43 = vadd.f32 %v1189_v2, %v1163_v25  ;;  %v1192_v13 = vadd.f32 %v1190_v32, %v1164_v33  ;;  %v2493_v2 = vld [vmem:[%s3747_s3] sm:$0xf]  ;;  %s2631_s3 = smov [#allocation8]  }
 0x131   :  { %v1195_v15 = vpop.permute.xlu1 %1194  ;;  %v1212_v23 = vrot.slane %v1135_v52, %v2806_v51  ;;  %v1216_v0 = vrot.slane %v1136_v27, %v2806_v51  ;;  %v1228_v18 = vrot.slane %v1135_v52, %v2818_v58  ;;  %v1232_v6 = vrot.slane %v1136_v27, %v2818_v58  ;;  %s2359_s14 = sshll.u32 %s2631_s3, 4  ;;  %s2360_s14 = int_to_ptr.vmem [resolvable:$true] %s2359_s14 }
 0x132   :  { %v1205_v39 = vmul.f32 %v1200_v16, %v1195_v15  ;;  %v1206_v46 = vmul.f32 %v1204_v44, %v1195_v15  ;;  %v1245_v9 = vmul.f32 %v1240_v10, %v1223_v14  ;;  %v1246_v49 = vmul.f32 %v1244_v11, %v1223_v14  ;;  %s2556_s15 = scalar_lea.vmem %s2360_s14, 256  ;;  %p2561_p2 = scmp.lt.s32.totalorder %s2360_s14, %s2360_s14 }
 0x133   :  { %v1217_v38 = vmul.f32 %v1212_v23, %v1195_v15  ;;  %v1218_v36 = vmul.f32 %v1216_v0, %v1195_v15  ;;  %v1233_v12 = vmul.f32 %v1228_v18, %v1223_v14  ;;  %v1234_v7 = vmul.f32 %v1232_v6, %v1223_v14  ;;  %p2557_p1 = scmp.ne.s32.totalorder %s2360_s14, %s2556_s15  ;;  %p2562_p3 = scmp.lt.s32.totalorder %s2556_s15, %s2556_s15 }
 0x134   :  { %v1207_v31 = vadd.f32 %v1205_v39, %v1179_v3  ;;  %v1208_v19 = vadd.f32 %v1206_v46, %v1180_v59  ;;  %v3785_v32 = vmov 20   ;;  %v3786_v10 = vmov 21  }
 0x135   :  { %v1219_v30 = vadd.f32 %v1217_v38, %v1191_v43  ;;  %v1220_v55 = vadd.f32 %v1218_v36, %v1192_v13  ;;  %v3787_v11 = vmov 24   ;;  %v3788_v3 = vmov 27   ;;  %p2563_p4 = por %p2562_p3, %p2561_p2 }
 0x136   :  { %v1235_v4 = vadd.f32 %v1233_v12, %v1207_v31  ;;  %v1236_v17 = vadd.f32 %v1234_v7, %v1208_v19  ;;  %v3789_v59 = vmov 28   ;;  %v3790_v43 = vmov 22   ;;  %v3186_v16 = vpop.permute.xlu1 %1263 }
 0x137   :  { %v1247_v56 = vadd.f32 %v1245_v9, %v1219_v30  ;;  %v1248_v1 = vadd.f32 %v1246_v49, %v1220_v55  ;;  %v3791_v13 = vmov 31   ;;  %v3792_v15 = vmov 23   ;;  %v3205_v9 = vpop.permute.xlu0 %1304  ;;  %p2564_p5 = pnand %p2563_p4, %p2557_p1 }
 0x138   :  { %v3793_v14 = vmov 32   ;;  %v3794_v44 = vmov 25   ;;  %v3795_v23 = vmov 35   ;;  %v3796_v18 = vmov 26  }
 0x139   :  { %v1251_v52 = vrot.slane %v1247_v56, 4  ;;  %v1252_v25 = vrot.slane %v1248_v1, 4  ;;  %v3797_v39 = vmov 29   ;;  %v3798_v36 = vmov 30  }
 0x13a   :  { %v3799_v31 = vmov 33  }
 0x13b   :  { %v1256_v27 = vsel %vm1255_vm8, %v1235_v4, %v1251_v52  ;;  %v1257_v33 = vsel %vm1255_vm8, %v1236_v17, %v1252_v25  ;;  %v1277_v0 = vpop.permute.xlu1 %1276  ;;  %v3212_v19 = vpop.permute.xlu0 %1396 }
 0x13c   :  { %v3148_v61 = vmax.f32 %v1256_v27, 0.0  ;;  %v3150_v28 = vmax.f32 %v1257_v33, 0.0 }
 0x13e   :  { %1269 = vrot.lane.b32.xlu0 %v3150_v28, %s2589_s0  ;;  %1267 = vrot.lane.b32.xlu1 %v3148_v61, %s2589_s0  ;;  %v1758_v33 = vrot.slane %v3150_v28, %v2788_v41  ;;  %v1814_v29 = vrot.slane %v3150_v28, %v2804_v50  ;;  %v1826_v53 = vrot.slane %v3150_v28, %v2806_v51 }
 0x13f   :  { %v3218_v55 = vpop.permute.xlu0 %1480 }
 0x140   :  { %v3193_v6 = vpop.permute.xlu1 %1332 }
 0x142   :  { %1387 = vrot.lane.b32.xlu0 %v3148_v61, %s2584_s19  ;;  %1832 = vperm.xlu1 %2476, %v2493_v2  }
 0x143   :  { %v3223_v7 = vpop.permute.xlu0 %1516 }
 0x145   :  { %v3198_v46 = vpop.permute.xlu1 %1360 }
 0x146   :  { %1804 = vperm.xlu0 %2475, %v2493_v2   ;;  %1389 = vrot.lane.b32.xlu1 %v3150_v28, %s2584_s19 }
 0x147   :  { %2477 = vset.pattern.permute.xlu1 %v3785_v32  ;;  %v3227_v1 = vpop.permute.xlu0 %1600  ;;  %v1770_v32 = vrot.slane %v3150_v28, %v2808_v54 }
 0x148   :  { %3803 = vst [vmem:[#allocation22_spill] sm:$0xff] %v3227_v1 }
 0x14a   :  { %1861 = vrot.lane.b32.xlu0 %v3150_v28, %s2607_s6  ;;  %1507 = vrot.lane.b32.xlu1 %v3148_v61, %s2599_s2  ;;  %v3202_v38 = vpop.permute.xlu1 %1424 }
 0x14b   :  { %2478 = vset.pattern.permute.xlu0 %v3786_v10  ;;  %v3231_v17 = vpop.permute.xlu0 %1636 }
 0x14c   :  { %3805 = vst [vmem:[#allocation24_spill] sm:$0xff] %v3231_v17 }
 0x14e   :  { %1896 = vperm.xlu0 %2478, %v2493_v2   ;;  %1509 = vrot.lane.b32.xlu1 %v3150_v28, %s2599_s2 }
 0x14f   :  { %v3207_v49 = vpop.permute.xlu1 %1452  ;;  %v3235_v25 = vpop.permute.xlu0 %1720 }
 0x150   :  { %3806 = vst [vmem:[#allocation25_spill] sm:$0xff] %v3235_v25  ;;  %v1810_v25 = vrot.slane %v3148_v61, %v2804_v50 }
 0x152   :  { %1979 = vrot.lane.b32.xlu0 %v3148_v61, %s2609_s7  ;;  %1627 = vrot.lane.b32.xlu1 %v3148_v61, %s2605_s5 }
 0x153   :  { %2481 = vset.pattern.permute.xlu0 %v3787_v11 }
 0x154   :  { %v3214_v30 = vpop.permute.xlu1 %1544 }
 0x155   :  { %3800 = vst [vmem:[#allocation19_spill] sm:$0xff] %v3214_v30 }
 0x156   :  { %1629 = vrot.lane.b32.xlu1 %v3150_v28, %s2605_s5  ;;  %1988 = vperm.xlu0 %2481, %v2493_v2  }
 0x159   :  { %v3220_v12 = vpop.permute.xlu1 %1572 }
 0x15a   :  { %1859 = vrot.lane.b32.xlu1 %v3148_v61, %s2607_s6  ;;  %2484 = vset.pattern.permute.xlu0 %v3788_v3  ;;  %3801 = vst [vmem:[#allocation20_spill] sm:$0xff] %v3220_v12  ;;  %v1782_v3 = vrot.slane %v3148_v61, %v2790_v42 }
 0x15b   :  { %2072 = vperm.xlu0 %2484, %v2493_v2  }
 0x15e   :  { %1868 = vperm.xlu1 %2477, %v2493_v2   ;;  %v3225_v56 = vpop.permute.xlu1 %1664 }
 0x15f   :  { %2485 = vset.pattern.permute.xlu0 %v3789_v59  ;;  %3802 = vst [vmem:[#allocation21_spill] sm:$0xff] %v3225_v56  ;;  %v1786_v59 = vrot.slane %v3150_v28, %v2790_v42 }
 0x160   :  { %2108 = vperm.xlu0 %2485, %v2493_v2  }
 0x162   :  { %2479 = vset.pattern.permute.xlu1 %v3790_v43 }
 0x163   :  { %1924 = vperm.xlu1 %2479, %v2493_v2   ;;  %v3229_v4 = vpop.permute.xlu1 %1692 }
 0x164   :  { %2488 = vset.pattern.permute.xlu0 %v3791_v13  ;;  %3804 = vst [vmem:[#allocation23_spill] sm:$0xff] %v3229_v4  ;;  %v1822_v4 = vrot.slane %v3148_v61, %v2806_v51 }
 0x165   :  { %2192 = vperm.xlu0 %2488, %v2493_v2  }
 0x167   :  { %2480 = vset.pattern.permute.xlu1 %v3792_v15  ;;  %v1794_v15 = vrot.slane %v3148_v61, %v2816_v57 }
 0x168   :  { %1952 = vperm.xlu1 %2480, %v2493_v2   ;;  %v3233_v52 = vpop.permute.xlu1 %1748 }
 0x169   :  { %2489 = vset.pattern.permute.xlu0 %v3793_v14  ;;  %v1798_v14 = vrot.slane %v3150_v28, %v2816_v57 }
 0x16a   :  { %2228 = vperm.xlu0 %2489, %v2493_v2  }
 0x16c   :  { %1981 = vrot.lane.b32.xlu1 %v3150_v28, %s2609_s7 }
 0x16d   :  { %2482 = vset.pattern.permute.xlu1 %v3794_v44  ;;  %v3237_v27 = vpop.permute.xlu1 %1776 }
 0x16e   :  { %2492 = vset.pattern.permute.xlu0 %v3795_v23 }
 0x16f   :  { %2312 = vperm.xlu0 %2492, %v2493_v2  }
 0x170   :  { %2016 = vperm.xlu1 %2482, %v2493_v2  }
 0x174   :  { %2483 = vset.pattern.permute.xlu1 %v3796_v18 }
 0x175   :  { %2044 = vperm.xlu1 %2483, %v2493_v2  }
 0x179   :  { %2099 = vrot.lane.b32.xlu1 %v3148_v61, %s2625_s10 }
 0x17a   :  { %2486 = vset.pattern.permute.xlu1 %v3797_v39 }
 0x17d   :  { %2101 = vrot.lane.b32.xlu1 %v3150_v28, %s2625_s10 }
 0x181   :  { %2136 = vperm.xlu1 %2486, %v2493_v2  }
 0x185   :  { %2487 = vset.pattern.permute.xlu1 %v3798_v36  ;;  %v1838_v36 = vrot.slane %v3148_v61, %v2818_v58 }
 0x186   :  { %2164 = vperm.xlu1 %2487, %v2493_v2  }
 0x18a   :  { %2219 = vrot.lane.b32.xlu1 %v3148_v61, %s2628_s11 }
 0x18b   :  { %2490 = vset.pattern.permute.xlu1 %v3799_v31  ;;  %v1850_v31 = vrot.slane %v3148_v61, %v2823_v62 }
 0x18e   :  { %2221 = vrot.lane.b32.xlu1 %v3150_v28, %s2628_s11 }
 0x192   :  { %2256 = vperm.xlu1 %2490, %v2493_v2  }
 0x196   :  { %2491 = vset.pattern.permute.xlu1 %v2630_v35  ;;  %v1754_v35 = vrot.slane %v3148_v61, %v2788_v41 }
 0x197   :  { %2284 = vperm.xlu1 %2491, %v2493_v2   ;;  %v1766_v2 = vrot.slane %v3148_v61, %v2808_v54 }
 0x1b0   :  { %v1270_v10 = vpop.permute.xlu0 %1269  ;;  %v1268_v11 = vpop.permute.xlu1 %1267 }
 0x1b1   :  { %v1271_v43 = vsel %vm85_vm0, %v1268_v11, %v1270_v10  ;;  %v1272_v13 = vsel %vm85_vm0, %v1270_v10, %v1268_v11 }
 0x1b2   :  { %v3260_v44 = vmul.f32 %v1272_v13, %v2798_v47  ;;  %v3263_v23 = vmul.f32 %v1271_v43, %v2801_v48 }
 0x1b4   :  { %v1282_v10 = vrot.slane %v3260_v44, %v2788_v41  ;;  %v1286_v47 = vrot.slane %v3263_v23, %v2788_v41  ;;  %v1294_v48 = vrot.slane %v3260_v44, %v2808_v54  ;;  %v1298_v11 = vrot.slane %v3263_v23, %v2808_v54 }
 0x1b5   :  { %v1310_v43 = vrot.slane %v3260_v44, %v2790_v42  ;;  %v1314_v13 = vrot.slane %v3263_v23, %v2790_v42  ;;  %v1322_v39 = vrot.slane %v3260_v44, %v2816_v57  ;;  %v1326_v18 = vrot.slane %v3263_v23, %v2816_v57 }
 0x1b6   :  { %v1287_v8 = vmul.f32 %v1282_v10, %v1277_v0  ;;  %v1288_v22 = vmul.f32 %v1286_v47, %v1277_v0  ;;  %v1299_v45 = vmul.f32 %v1294_v48, %v1277_v0  ;;  %v1300_v37 = vmul.f32 %v1298_v11, %v1277_v0 }
 0x1b7   :  { %v1315_v47 = vmul.f32 %v1310_v43, %v3205_v9  ;;  %v1316_v48 = vmul.f32 %v1314_v13, %v3205_v9  ;;  %v1338_v11 = vrot.slane %v3260_v44, %v2804_v50  ;;  %v1342_v1 = vrot.slane %v3263_v23, %v2804_v50 }
 0x1b8   :  { %v1289_v56 = vadd.f32 %v1287_v8, %v3186_v16  ;;  %v1290_v17 = vadd.f32 %v1288_v22, %v3186_v16  ;;  %v1301_v10 = vadd.f32 %v1299_v45, %v3186_v16  ;;  %v1302_v0 = vadd.f32 %v1300_v37, %v3186_v16 }
 0x1b9   :  { %v1327_v61 = vmul.f32 %v1322_v39, %v3205_v9  ;;  %v1328_v8 = vmul.f32 %v1326_v18, %v3205_v9  ;;  %v1350_v22 = vrot.slane %v3260_v44, %v2806_v51  ;;  %v1354_v37 = vrot.slane %v3263_v23, %v2806_v51 }
 0x1ba   :  { %v3314_v45 = vmul.f32 %v1754_v35, %v3233_v52  ;;  %v3317_v16 = vmul.f32 %v1758_v33, %v3233_v52  ;;  %v1317_v43 = vadd.f32 %v1315_v47, %v1289_v56  ;;  %v1318_v13 = vadd.f32 %v1316_v48, %v1290_v17  ;;  %v1388_v47 = vpop.permute.xlu0 %1387 }
 0x1bb   :  { %v1329_v12 = vadd.f32 %v1327_v61, %v1301_v10  ;;  %v1330_v30 = vadd.f32 %v1328_v8, %v1302_v0  ;;  %v1343_v39 = vmul.f32 %v1338_v11, %v3193_v6  ;;  %v1344_v9 = vmul.f32 %v1342_v1, %v3193_v6 }
 0x1bc   :  { %v1366_v18 = vrot.slane %v3260_v44, %v2818_v58  ;;  %v1370_v20 = vrot.slane %v3263_v23, %v2818_v58  ;;  %v1378_v35 = vrot.slane %v3260_v44, %v2823_v62  ;;  %v1382_v33 = vrot.slane %v3263_v23, %v2823_v62 }
 0x1bd   :  { %v1833_v56 = vpop.permute.xlu1 %1832  ;;  %v3330_v17 = vmul.f32 %v1766_v2, %v3233_v52  ;;  %v3333_v10 = vmul.f32 %v1770_v32, %v3233_v52  ;;  %v1355_v1 = vmul.f32 %v1350_v22, %v3193_v6  ;;  %v1356_v0 = vmul.f32 %v1354_v37, %v3193_v6 }
 0x1be   :  { %v3338_v48 = vmul.f32 %v1782_v3, %v3237_v27  ;;  %v3341_v44 = vmul.f32 %v1786_v59, %v3237_v27  ;;  %v1345_v11 = vadd.f32 %v1343_v39, %v1317_v43  ;;  %v1346_v23 = vadd.f32 %v1344_v9, %v1318_v13 }
 0x1bf   :  { %v3344_v61 = vmul.f32 %v1794_v15, %v3237_v27  ;;  %v3347_v2 = vmul.f32 %v1798_v14, %v3237_v27  ;;  %v1357_v52 = vadd.f32 %v1355_v1, %v1329_v12  ;;  %v1358_v32 = vadd.f32 %v1356_v0, %v1330_v30 }
 0x1c0   :  { %v1371_v8 = vmul.f32 %v1366_v18, %v3198_v46  ;;  %v1372_v6 = vmul.f32 %v1370_v20, %v3198_v46  ;;  %v1383_v3 = vmul.f32 %v1378_v35, %v3198_v46  ;;  %v1384_v22 = vmul.f32 %v1382_v33, %v3198_v46 }
 0x1c1   :  { %v1390_v59 = vpop.permute.xlu1 %1389  ;;  %v3353_v37 = vmul.f32 %v1838_v36, %v1833_v56  ;;  %v3807_v15 = vrot.slane %v3150_v28, %v2818_v58  ;;  %v3360_v27 = vmul.f32 %v1850_v31, %v1833_v56  ;;  %v3808_v30 = vrot.slane %v3150_v28, %v2823_v62  ;;  %v1805_v20 = vpop.permute.xlu0 %1804 }
 0x1c2   :  { %v1373_v14 = vadd.f32 %v1371_v8, %v1345_v11  ;;  %v1374_v13 = vadd.f32 %v1372_v6, %v1346_v23  ;;  %v1391_v46 = vsel %vm217_vm1, %v1388_v47, %v1390_v59  ;;  %v1392_v36 = vsel %vm217_vm1, %v1390_v59, %v1388_v47 }
 0x1c3   :  { %v3358_v43 = vmul.f32 %v3807_v15, %v1833_v56  ;;  %v3365_v12 = vmul.f32 %v3808_v30, %v1833_v56  ;;  %v1385_v39 = vadd.f32 %v1383_v3, %v1357_v52  ;;  %v1386_v9 = vadd.f32 %v1384_v22, %v1358_v32 }
 0x1c4   :  { %v3372_v18 = vmul.f32 %v1392_v36, %v2826_v63  ;;  %v3375_v31 = vmul.f32 %v1391_v46, %v2829_v5  ;;  %v3377_v28 = vmul.f32 %v1810_v25, %v1805_v20  ;;  %v3379_v35 = vmul.f32 %v1814_v29, %v1805_v20 }
 0x1c5   :  { %v3381_v33 = vmul.f32 %v1822_v4, %v1805_v20  ;;  %v3383_v56 = vmul.f32 %v1826_v53, %v1805_v20  ;;  %v1508_v1 = vpop.permute.xlu1 %1507 }
 0x1c6   :  { %v1402_v0 = vrot.slane %v3372_v18, %v2788_v41  ;;  %v1406_v47 = vrot.slane %v3375_v31, %v2788_v41  ;;  %v1414_v63 = vrot.slane %v3372_v18, %v2808_v54  ;;  %v1418_v5 = vrot.slane %v3375_v31, %v2808_v54 }
 0x1c7   :  { %v1430_v29 = vrot.slane %v3372_v18, %v2790_v42  ;;  %v1434_v53 = vrot.slane %v3375_v31, %v2790_v42  ;;  %v1442_v4 = vrot.slane %v3372_v18, %v2816_v57  ;;  %v1446_v25 = vrot.slane %v3375_v31, %v2816_v57 }
 0x1c8   :  { %v1407_v11 = vmul.f32 %v1402_v0, %v3212_v19  ;;  %v1408_v23 = vmul.f32 %v1406_v47, %v3212_v19  ;;  %v1419_v52 = vmul.f32 %v1414_v63, %v3212_v19  ;;  %v1420_v32 = vmul.f32 %v1418_v5, %v3212_v19 }
 0x1c9   :  { %v1435_v8 = vmul.f32 %v1430_v29, %v3202_v38  ;;  %v1436_v6 = vmul.f32 %v1434_v53, %v3202_v38  ;;  %v1447_v3 = vmul.f32 %v1442_v4, %v3202_v38  ;;  %v1448_v22 = vmul.f32 %v1446_v25, %v3202_v38  ;;  %v1510_v59 = vpop.permute.xlu1 %1509 }
 0x1ca   :  { %v1409_v15 = vadd.f32 %v1407_v11, %v1373_v14  ;;  %v1410_v30 = vadd.f32 %v1408_v23, %v1374_v13  ;;  %v1421_v20 = vadd.f32 %v1419_v52, %v1385_v39  ;;  %v1422_v46 = vadd.f32 %v1420_v32, %v1386_v9 }
 0x1cb   :  { %v1458_v36 = vrot.slane %v3372_v18, %v2804_v50  ;;  %v1462_v0 = vrot.slane %v3375_v31, %v2804_v50  ;;  %v1470_v19 = vrot.slane %v3372_v18, %v2806_v51  ;;  %v1474_v47 = vrot.slane %v3375_v31, %v2806_v51 }
 0x1cc   :  { %v1486_v38 = vrot.slane %v3372_v18, %v2818_v58  ;;  %v1490_v14 = vrot.slane %v3375_v31, %v2818_v58  ;;  %v1498_v13 = vrot.slane %v3372_v18, %v2823_v62  ;;  %v1502_v39 = vrot.slane %v3375_v31, %v2823_v62 }
 0x1cd   :  { %v1463_v9 = vmul.f32 %v1458_v36, %v3207_v49  ;;  %v1464_v63 = vmul.f32 %v1462_v0, %v3207_v49  ;;  %v1475_v5 = vmul.f32 %v1470_v19, %v3207_v49  ;;  %v1476_v29 = vmul.f32 %v1474_v47, %v3207_v49  ;;  %v1628_v53 = vpop.permute.xlu1 %1627 }
 0x1ce   :  { %v1511_v4 = vsel %vm349_vm2, %v1508_v1, %v1510_v59  ;;  %v1512_v25 = vsel %vm349_vm2, %v1510_v59, %v1508_v1  ;;  %v1437_v11 = vadd.f32 %v1435_v8, %v1409_v15  ;;  %v1438_v18 = vadd.f32 %v1436_v6, %v1410_v30 }
 0x1cf   :  { %v3434_v23 = vmul.f32 %v1512_v25, %v2903_v24  ;;  %v3437_v31 = vmul.f32 %v1511_v4, %v2906_v34  ;;  %v1449_v52 = vadd.f32 %v1447_v3, %v1421_v20  ;;  %v1450_v32 = vadd.f32 %v1448_v22, %v1422_v46  ;;  %v1862_v4 = vpop.permute.xlu0 %1861 }
 0x1d0   :  { %v1465_v36 = vadd.f32 %v1463_v9, %v1437_v11  ;;  %v1466_v0 = vadd.f32 %v1464_v63, %v1438_v18  ;;  %v1491_v49 = vmul.f32 %v1486_v38, %v3218_v55  ;;  %v1492_v19 = vmul.f32 %v1490_v14, %v3218_v55  ;;  %v3809_v18 = vld [vmem:[#allocation12_spill] sm:$0xff] }
 0x1d1   :  { %v1522_v47 = vrot.slane %v3434_v23, %v2788_v41  ;;  %v1526_v1 = vrot.slane %v3437_v31, %v2788_v41  ;;  %v1534_v24 = vrot.slane %v3434_v23, %v2808_v54  ;;  %v1538_v34 = vrot.slane %v3437_v31, %v2808_v54  ;;  %v1630_v8 = vpop.permute.xlu1 %1629 }
 0x1d2   :  { %v1631_v6 = vsel %vm481_vm3, %v1628_v53, %v1630_v8  ;;  %v1632_v3 = vsel %vm481_vm3, %v1630_v8, %v1628_v53  ;;  %v1477_v22 = vadd.f32 %v1475_v5, %v1449_v52  ;;  %v1478_v59 = vadd.f32 %v1476_v29, %v1450_v32 }
 0x1d3   :  { %v3454_v15 = vmul.f32 %v1632_v3, %v2958_v60  ;;  %v3457_v30 = vmul.f32 %v1631_v6, %v2961_v26  ;;  %v1493_v20 = vadd.f32 %v1491_v49, %v1465_v36  ;;  %v1494_v46 = vadd.f32 %v1492_v19, %v1466_v0  ;;  %v3810_v49 = vld [vmem:[#allocation19_spill] sm:$0xff] }
 0x1d4   :  { %v1503_v38 = vmul.f32 %v1498_v13, %v3218_v55  ;;  %v1504_v14 = vmul.f32 %v1502_v39, %v3218_v55  ;;  %v1527_v9 = vmul.f32 %v1522_v47, %v3223_v7  ;;  %v1528_v63 = vmul.f32 %v1526_v1, %v3223_v7 }
 0x1d5   :  { %v1860_v53 = vpop.permute.xlu1 %1859  ;;  %v1539_v5 = vmul.f32 %v1534_v24, %v3223_v7  ;;  %v1540_v60 = vmul.f32 %v1538_v34, %v3223_v7  ;;  %v1550_v26 = vrot.slane %v3434_v23, %v2790_v42  ;;  %v1554_v29 = vrot.slane %v3437_v31, %v2790_v42 }
 0x1d6   :  { %v1863_v13 = vsel %vm725_vm4, %v1860_v53, %v1862_v4  ;;  %v1864_v55 = vsel %vm725_vm4, %v1862_v4, %v1860_v53  ;;  %v1505_v39 = vadd.f32 %v1503_v38, %v1477_v22  ;;  %v1506_v25 = vadd.f32 %v1504_v14, %v1478_v59  ;;  %v3811_v38 = vld [vmem:[#allocation20_spill] sm:$0xff] }
 0x1d7   :  { %v3474_v11 = vmul.f32 %v1863_v13, %v3031_v21  ;;  %v3477_v52 = vmul.f32 %v1864_v55, %v3809_v18  ;;  %v1529_v7 = vadd.f32 %v1527_v9, %v1493_v20  ;;  %v1530_v32 = vadd.f32 %v1528_v63, %v1494_v46  ;;  %v3812_v55 = vld [vmem:[#allocation22_spill] sm:$0xff] }
 0x1d8   :  { %v1541_v36 = vadd.f32 %v1539_v5, %v1505_v39  ;;  %v1542_v0 = vadd.f32 %v1540_v60, %v1506_v25  ;;  %v1555_v19 = vmul.f32 %v1550_v26, %v3810_v49  ;;  %v1556_v47 = vmul.f32 %v1554_v29, %v3810_v49 }
 0x1d9   :  { %v1562_v1 = vrot.slane %v3434_v23, %v2816_v57  ;;  %v1566_v24 = vrot.slane %v3437_v31, %v2816_v57  ;;  %v1578_v21 = vrot.slane %v3434_v23, %v2804_v50  ;;  %v1582_v34 = vrot.slane %v3437_v31, %v2804_v50  ;;  %v3489_v8 = vpop.permute.xlu1 %1868 }
 0x1da   :  { %v1557_v6 = vadd.f32 %v1555_v19, %v1529_v7  ;;  %v1558_v3 = vadd.f32 %v1556_v47, %v1530_v32  ;;  %v1590_v22 = vrot.slane %v3434_v23, %v2806_v51  ;;  %v1594_v59 = vrot.slane %v3437_v31, %v2806_v51 }
 0x1db   :  { %v1567_v20 = vmul.f32 %v1562_v1, %v3810_v49  ;;  %v1568_v46 = vmul.f32 %v1566_v24, %v3810_v49  ;;  %v1583_v14 = vmul.f32 %v1578_v21, %v3811_v38  ;;  %v1584_v9 = vmul.f32 %v1582_v34, %v3811_v38 }
 0x1dc   :  { %v1595_v63 = vmul.f32 %v1590_v22, %v3811_v38  ;;  %v1596_v4 = vmul.f32 %v1594_v59, %v3811_v38  ;;  %v1606_v53 = vrot.slane %v3434_v23, %v2818_v58  ;;  %v1610_v5 = vrot.slane %v3437_v31, %v2818_v58 }
 0x1dd   :  { %v1569_v60 = vadd.f32 %v1567_v20, %v1541_v36  ;;  %v1570_v26 = vadd.f32 %v1568_v46, %v1542_v0  ;;  %v1585_v29 = vadd.f32 %v1583_v14, %v1557_v6  ;;  %v1586_v13 = vadd.f32 %v1584_v9, %v1558_v3 }
 0x1de   :  { %v1611_v39 = vmul.f32 %v1606_v53, %v3812_v55  ;;  %v1612_v25 = vmul.f32 %v1610_v5, %v3812_v55  ;;  %v1618_v18 = vrot.slane %v3434_v23, %v2823_v62  ;;  %v1622_v7 = vrot.slane %v3437_v31, %v2823_v62  ;;  %v3511_v32 = vpop.permute.xlu1 %1924  ;;  %v3813_v23 = vld [vmem:[#allocation24_spill] sm:$0xff]  ;;  %v3814_v53 = vld [vmem:[#allocation21_spill] sm:$0xff] }
 0x1df   :  { %v1597_v49 = vadd.f32 %v1595_v63, %v1569_v60  ;;  %v1598_v19 = vadd.f32 %v1596_v4, %v1570_v26  ;;  %v1642_v36 = vrot.slane %v3454_v15, %v2788_v41  ;;  %v1646_v0 = vrot.slane %v3457_v30, %v2788_v41 }
 0x1e0   :  { %v1613_v47 = vadd.f32 %v1611_v39, %v1585_v29  ;;  %v1614_v1 = vadd.f32 %v1612_v25, %v1586_v13  ;;  %v1623_v24 = vmul.f32 %v1618_v18, %v3812_v55  ;;  %v1624_v21 = vmul.f32 %v1622_v7, %v3812_v55 }
 0x1e1   :  { %v1647_v34 = vmul.f32 %v1642_v36, %v3813_v23  ;;  %v1648_v31 = vmul.f32 %v1646_v0, %v3813_v23  ;;  %v1654_v6 = vrot.slane %v3454_v15, %v2808_v54  ;;  %v1658_v3 = vrot.slane %v3457_v30, %v2808_v54  ;;  %v3815_v36 = vld [vmem:[#allocation23_spill] sm:$0xff] }
 0x1e2   :  { %v1625_v22 = vadd.f32 %v1623_v24, %v1597_v49  ;;  %v1626_v59 = vadd.f32 %v1624_v21, %v1598_v19  ;;  %v1670_v20 = vrot.slane %v3454_v15, %v2790_v42  ;;  %v1674_v46 = vrot.slane %v3457_v30, %v2790_v42 }
 0x1e3   :  { %v1649_v38 = vadd.f32 %v1647_v34, %v1613_v47  ;;  %v1650_v14 = vadd.f32 %v1648_v31, %v1614_v1  ;;  %v1659_v9 = vmul.f32 %v1654_v6, %v3813_v23  ;;  %v1660_v63 = vmul.f32 %v1658_v3, %v3813_v23  ;;  %v3531_v4 = vpop.permute.xlu1 %1952 }
 0x1e4   :  { %v1675_v5 = vmul.f32 %v1670_v20, %v3814_v53  ;;  %v1676_v60 = vmul.f32 %v1674_v46, %v3814_v53  ;;  %v1682_v26 = vrot.slane %v3454_v15, %v2816_v57  ;;  %v1686_v29 = vrot.slane %v3457_v30, %v2816_v57  ;;  %v3816_v46 = vld [vmem:[#allocation25_spill] sm:$0xff] }
 0x1e5   :  { %v1661_v13 = vadd.f32 %v1659_v9, %v1625_v22  ;;  %v1662_v55 = vadd.f32 %v1660_v63, %v1626_v59  ;;  %v1698_v39 = vrot.slane %v3454_v15, %v2804_v50  ;;  %v1702_v25 = vrot.slane %v3457_v30, %v2804_v50 }
 0x1e6   :  { %v1677_v18 = vadd.f32 %v1675_v5, %v1649_v38  ;;  %v1678_v7 = vadd.f32 %v1676_v60, %v1650_v14  ;;  %v1687_v49 = vmul.f32 %v1682_v26, %v3814_v53  ;;  %v1688_v19 = vmul.f32 %v1686_v29, %v3814_v53 }
 0x1e7   :  { %v1703_v0 = vmul.f32 %v1698_v39, %v3815_v36  ;;  %v1704_v47 = vmul.f32 %v1702_v25, %v3815_v36  ;;  %v1710_v1 = vrot.slane %v3454_v15, %v2806_v51  ;;  %v1714_v24 = vrot.slane %v3457_v30, %v2806_v51  ;;  %v3551_v21 = vpop.permute.xlu1 %1981 }
 0x1e8   :  { %v1689_v23 = vadd.f32 %v1687_v49, %v1661_v13  ;;  %v1690_v34 = vadd.f32 %v1688_v19, %v1662_v55  ;;  %v1726_v31 = vrot.slane %v3454_v15, %v2818_v58  ;;  %v1730_v6 = vrot.slane %v3457_v30, %v2818_v58 }
 0x1e9   :  { %v1705_v3 = vadd.f32 %v1703_v0, %v1677_v18  ;;  %v1706_v22 = vadd.f32 %v1704_v47, %v1678_v7  ;;  %v1715_v59 = vmul.f32 %v1710_v1, %v3815_v36  ;;  %v1716_v20 = vmul.f32 %v1714_v24, %v3815_v36 }
 0x1ea   :  { %v1731_v38 = vmul.f32 %v1726_v31, %v3816_v46  ;;  %v1732_v14 = vmul.f32 %v1730_v6, %v3816_v46  ;;  %v1738_v9 = vrot.slane %v3454_v15, %v2823_v62  ;;  %v1742_v63 = vrot.slane %v3457_v30, %v2823_v62 }
 0x1eb   :  { %v1717_v53 = vadd.f32 %v1715_v59, %v1689_v23  ;;  %v1718_v5 = vadd.f32 %v1716_v20, %v1690_v34  ;;  %v1874_v60 = vrot.slane %v3474_v11, %v2788_v41  ;;  %v1878_v26 = vrot.slane %v3477_v52, %v2788_v41  ;;  %v3569_v29 = vpop.permute.xlu1 %2016  ;;  %v1897_v34 = vpop.permute.xlu0 %1896 }
 0x1ec   :  { %v1733_v13 = vadd.f32 %v1731_v38, %v1705_v3  ;;  %v1734_v55 = vadd.f32 %v1732_v14, %v1706_v22  ;;  %v1743_v39 = vmul.f32 %v1738_v9, %v3816_v46  ;;  %v1744_v25 = vmul.f32 %v1742_v63, %v3816_v46 }
 0x1ed   :  { %v1886_v15 = vrot.slane %v3474_v11, %v2808_v54  ;;  %v1890_v30 = vrot.slane %v3477_v52, %v2808_v54  ;;  %v1879_v18 = vmul.f32 %v1874_v60, %v3489_v8  ;;  %v1880_v7 = vmul.f32 %v1878_v26, %v3489_v8 }
 0x1ee   :  { %v1745_v49 = vadd.f32 %v1743_v39, %v1717_v53  ;;  %v1746_v19 = vadd.f32 %v1744_v25, %v1718_v5  ;;  %v1762_v36 = vadd.f32 %v3317_v16, %v1734_v55  ;;  %v1761_v0 = vadd.f32 %v3314_v45, %v1733_v13 }
 0x1ef   :  { %v1891_v47 = vmul.f32 %v1886_v15, %v3489_v8  ;;  %v1892_v1 = vmul.f32 %v1890_v30, %v3489_v8  ;;  %v1902_v24 = vrot.slane %v3474_v11, %v2790_v42  ;;  %v1906_v23 = vrot.slane %v3477_v52, %v2790_v42 }
 0x1f0   :  { %v1774_v31 = vadd.f32 %v3333_v10, %v1746_v19  ;;  %v1790_v6 = vadd.f32 %v3341_v44, %v1762_v36  ;;  %v1773_v3 = vadd.f32 %v3330_v17, %v1745_v49  ;;  %v1789_v16 = vadd.f32 %v3338_v48, %v1761_v0  ;;  %v3591_v45 = vpop.permute.xlu1 %2044  ;;  %v1980_v36 = vpop.permute.xlu0 %1979 }
 0x1f1   :  { %v1907_v22 = vmul.f32 %v1902_v24, %v1897_v34  ;;  %v1908_v59 = vmul.f32 %v1906_v23, %v1897_v34  ;;  %v1914_v8 = vrot.slane %v3474_v11, %v2816_v57  ;;  %v1918_v20 = vrot.slane %v3477_v52, %v2816_v57 }
 0x1f2   :  { %v1802_v46 = vadd.f32 %v3347_v2, %v1774_v31  ;;  %v1818_v10 = vadd.f32 %v3379_v35, %v1790_v6  ;;  %v1801_v44 = vadd.f32 %v3344_v61, %v1773_v3  ;;  %v1817_v17 = vadd.f32 %v3377_v28, %v1789_v16 }
 0x1f3   :  { %v1919_v38 = vmul.f32 %v1914_v8, %v1897_v34  ;;  %v1920_v48 = vmul.f32 %v1918_v20, %v1897_v34  ;;  %v1930_v14 = vrot.slane %v3474_v11, %v2804_v50  ;;  %v1934_v9 = vrot.slane %v3477_v52, %v2804_v50  ;;  %v3818_v8 = vld [vmem:[#allocation14_spill] sm:$0xff] }
 0x1f4   :  { %v1830_v63 = vadd.f32 %v3383_v56, %v1802_v46  ;;  %v1846_v53 = vadd.f32 %v3358_v43, %v1818_v10  ;;  %v1829_v2 = vadd.f32 %v3381_v33, %v1801_v44  ;;  %v1845_v35 = vadd.f32 %v3353_v37, %v1817_v17  ;;  %v2100_v5 = vpop.permute.xlu1 %2099  ;;  %v1989_v46 = vpop.permute.xlu0 %1988 }
 0x1f5   :  { %v1942_v61 = vrot.slane %v3474_v11, %v2806_v51  ;;  %v1946_v28 = vrot.slane %v3477_v52, %v2806_v51  ;;  %v1935_v60 = vmul.f32 %v1930_v14, %v3511_v32  ;;  %v1936_v26 = vmul.f32 %v1934_v9, %v3511_v32 }
 0x1f6   :  { %v1858_v13 = vadd.f32 %v3365_v12, %v1830_v63  ;;  %v1857_v56 = vadd.f32 %v3360_v27, %v1829_v2  ;;  %v1881_v43 = vadd.f32 %v1879_v18, %v1845_v35  ;;  %v1882_v55 = vadd.f32 %v1880_v7, %v1846_v53 }
 0x1f7   :  { %v1947_v33 = vmul.f32 %v1942_v61, %v3511_v32  ;;  %v1948_v37 = vmul.f32 %v1946_v28, %v3511_v32  ;;  %v1958_v39 = vrot.slane %v3474_v11, %v2818_v58  ;;  %v1962_v25 = vrot.slane %v3477_v52, %v2818_v58 }
 0x1f8   :  { %v1893_v15 = vadd.f32 %v1891_v47, %v1857_v56  ;;  %v1894_v30 = vadd.f32 %v1892_v1, %v1858_v13  ;;  %v1910_v49 = vadd.f32 %v1908_v59, %v1882_v55  ;;  %v1909_v19 = vadd.f32 %v1907_v22, %v1881_v43  ;;  %v2102_v7 = vpop.permute.xlu1 %2101  ;;  %v3817_v22 = vld [vmem:[#allocation13_spill] sm:$0xff] }
 0x1f9   :  { %v1970_v27 = vrot.slane %v3474_v11, %v2823_v62  ;;  %v1974_v12 = vrot.slane %v3477_v52, %v2823_v62  ;;  %v1963_v18 = vmul.f32 %v1958_v39, %v3531_v4  ;;  %v1964_v32 = vmul.f32 %v1962_v25, %v3531_v4 }
 0x1fa   :  { %v1922_v0 = vadd.f32 %v1920_v48, %v1894_v30  ;;  %v1921_v24 = vadd.f32 %v1919_v38, %v1893_v15  ;;  %v1937_v23 = vadd.f32 %v1935_v60, %v1909_v19  ;;  %v1938_v34 = vadd.f32 %v1936_v26, %v1910_v49  ;;  %v3819_v38 = vld [vmem:[#allocation15_spill] sm:$0xff]  ;;  %v2073_v19 = vpop.permute.xlu0 %2072 }
 0x1fb   :  { %v1975_v47 = vmul.f32 %v1970_v27, %v3531_v4  ;;  %v1976_v1 = vmul.f32 %v1974_v12, %v3531_v4  ;;  %v1983_v11 = vsel %vm857_vm5, %v1980_v36, %v3551_v21  ;;  %v1984_v52 = vsel %vm857_vm5, %v3551_v21, %v1980_v36  ;;  %v3820_v21 = vld [vmem:[#allocation16_spill] sm:$0xff] }
 0x1fc   :  { %v1949_v31 = vadd.f32 %v1947_v33, %v1921_v24  ;;  %v1950_v6 = vadd.f32 %v1948_v37, %v1922_v0  ;;  %v1965_v3 = vadd.f32 %v1963_v18, %v1937_v23  ;;  %v1966_v16 = vadd.f32 %v1964_v32, %v1938_v34  ;;  %v3653_v35 = vpop.permute.xlu1 %2136 }
 0x1fd   :  { %v1985_v59 = vmul.f32 %v1983_v11, %v3817_v22  ;;  %v1986_v20 = vmul.f32 %v1984_v52, %v3818_v8  ;;  %v2103_v4 = vsel %vm989_vm6, %v2100_v5, %v2102_v7  ;;  %v2104_v10 = vsel %vm989_vm6, %v2102_v7, %v2100_v5 }
 0x1fe   :  { %v1977_v44 = vadd.f32 %v1975_v47, %v1949_v31  ;;  %v1978_v17 = vadd.f32 %v1976_v1, %v1950_v6  ;;  %v3644_v48 = vmul.f32 %v2103_v4, %v3819_v38  ;;  %v3647_v14 = vmul.f32 %v2104_v10, %v3820_v21  ;;  %v2109_v10 = vpop.permute.xlu0 %2108 }
 0x1ff   :  { %v1994_v9 = vrot.slane %v1985_v59, %v2788_v41  ;;  %v1998_v63 = vrot.slane %v1986_v20, %v2788_v41  ;;  %v2006_v53 = vrot.slane %v1985_v59, %v2808_v54  ;;  %v2010_v2 = vrot.slane %v1986_v20, %v2808_v54 }
 0x200   :  { %v2022_v5 = vrot.slane %v1985_v59, %v2790_v42  ;;  %v2026_v61 = vrot.slane %v1986_v20, %v2790_v42  ;;  %v2034_v28 = vrot.slane %v1985_v59, %v2816_v57  ;;  %v2038_v60 = vrot.slane %v1986_v20, %v2816_v57 }
 0x201   :  { %v1999_v26 = vmul.f32 %v1994_v9, %v1989_v46  ;;  %v2000_v13 = vmul.f32 %v1998_v63, %v1989_v46  ;;  %v2011_v56 = vmul.f32 %v2006_v53, %v1989_v46  ;;  %v2012_v43 = vmul.f32 %v2010_v2, %v1989_v46  ;;  %v3667_v23 = vpop.permute.xlu1 %2164 }
 0x202   :  { %v2027_v55 = vmul.f32 %v2022_v5, %v3569_v29  ;;  %v2028_v33 = vmul.f32 %v2026_v61, %v3569_v29  ;;  %v2039_v37 = vmul.f32 %v2034_v28, %v3569_v29  ;;  %v2040_v39 = vmul.f32 %v2038_v60, %v3569_v29 }
 0x203   :  { %v2001_v25 = vadd.f32 %v1999_v26, %v1965_v3  ;;  %v2002_v15 = vadd.f32 %v2000_v13, %v1966_v16  ;;  %v2013_v30 = vadd.f32 %v2011_v56, %v1977_v44  ;;  %v2014_v49 = vadd.f32 %v2012_v43, %v1978_v17 }
 0x204   :  { %v2078_v36 = vrot.slane %v1985_v59, %v2818_v58  ;;  %v2082_v27 = vrot.slane %v1986_v20, %v2818_v58  ;;  %v2090_v12 = vrot.slane %v1985_v59, %v2823_v62  ;;  %v2094_v18 = vrot.slane %v1986_v20, %v2823_v62 }
 0x205   :  { %v2029_v32 = vadd.f32 %v2027_v55, %v2001_v25  ;;  %v2030_v7 = vadd.f32 %v2028_v33, %v2002_v15  ;;  %v2041_v0 = vadd.f32 %v2039_v37, %v2013_v30  ;;  %v2042_v24 = vadd.f32 %v2040_v39, %v2014_v49  ;;  %v2220_v5 = vpop.permute.xlu1 %2219 }
 0x206   :  { %v2083_v29 = vmul.f32 %v2078_v36, %v2073_v19  ;;  %v2084_v34 = vmul.f32 %v2082_v27, %v2073_v19  ;;  %v2095_v47 = vmul.f32 %v2090_v12, %v2073_v19  ;;  %v2096_v1 = vmul.f32 %v2094_v18, %v2073_v19  ;;  %v2193_v27 = vpop.permute.xlu0 %2192 }
 0x207   :  { %v2050_v11 = vrot.slane %v1985_v59, %v2804_v50  ;;  %v2054_v52 = vrot.slane %v1986_v20, %v2804_v50  ;;  %v2062_v31 = vrot.slane %v1985_v59, %v2806_v51  ;;  %v2066_v6 = vrot.slane %v1986_v20, %v2806_v51 }
 0x208   :  { %v2114_v3 = vrot.slane %v3644_v48, %v2788_v41  ;;  %v2118_v16 = vrot.slane %v3647_v14, %v2788_v41  ;;  %v2126_v22 = vrot.slane %v3644_v48, %v2808_v54  ;;  %v2130_v8 = vrot.slane %v3647_v14, %v2808_v54 }
 0x209   :  { %v2055_v46 = vmul.f32 %v2050_v11, %v3591_v45  ;;  %v2056_v4 = vmul.f32 %v2054_v52, %v3591_v45  ;;  %v2067_v59 = vmul.f32 %v2062_v31, %v3591_v45  ;;  %v2068_v20 = vmul.f32 %v2066_v6, %v3591_v45 }
 0x20a   :  { %v2119_v44 = vmul.f32 %v2114_v3, %v2109_v10  ;;  %v2120_v17 = vmul.f32 %v2118_v16, %v2109_v10  ;;  %v2131_v38 = vmul.f32 %v2126_v22, %v2109_v10  ;;  %v2132_v21 = vmul.f32 %v2130_v8, %v2109_v10 }
 0x20b   :  { %v2057_v9 = vadd.f32 %v2055_v46, %v2029_v32  ;;  %v2058_v63 = vadd.f32 %v2056_v4, %v2030_v7  ;;  %v2069_v53 = vadd.f32 %v2067_v59, %v2041_v0  ;;  %v2070_v2 = vadd.f32 %v2068_v20, %v2042_v24  ;;  %v2222_v32 = vpop.permute.xlu1 %2221  ;;  %v3821_v4 = vld [vmem:[#allocation17_spill] sm:$0xff]  ;;  %v3822_v59 = vld [vmem:[#allocation18_spill] sm:$0xff] }
 0x20c   :  { %v2142_v61 = vrot.slane %v3644_v48, %v2790_v42  ;;  %v2146_v28 = vrot.slane %v3647_v14, %v2790_v42  ;;  %v2154_v60 = vrot.slane %v3644_v48, %v2816_v57  ;;  %v2158_v45 = vrot.slane %v3647_v14, %v2816_v57 }
 0x20d   :  { %v2085_v26 = vadd.f32 %v2083_v29, %v2057_v9  ;;  %v2086_v13 = vadd.f32 %v2084_v34, %v2058_v63  ;;  %v2097_v56 = vadd.f32 %v2095_v47, %v2069_v53  ;;  %v2098_v43 = vadd.f32 %v2096_v1, %v2070_v2  ;;  %v2229_v53 = vpop.permute.xlu0 %2228 }
 0x20e   :  { %v2147_v55 = vmul.f32 %v2142_v61, %v3653_v35  ;;  %v2148_v33 = vmul.f32 %v2146_v28, %v3653_v35  ;;  %v2159_v30 = vmul.f32 %v2154_v60, %v3653_v35  ;;  %v2160_v49 = vmul.f32 %v2158_v45, %v3653_v35 }
 0x20f   :  { %v2121_v37 = vadd.f32 %v2119_v44, %v2085_v26  ;;  %v2122_v39 = vadd.f32 %v2120_v17, %v2086_v13  ;;  %v2133_v25 = vadd.f32 %v2131_v38, %v2097_v56  ;;  %v2134_v15 = vadd.f32 %v2132_v21, %v2098_v43  ;;  %v2257_v28 = vpop.permute.xlu1 %2256 }
 0x210   :  { %v2198_v19 = vrot.slane %v3644_v48, %v2818_v58  ;;  %v2202_v36 = vrot.slane %v3647_v14, %v2818_v58  ;;  %v2210_v12 = vrot.slane %v3644_v48, %v2823_v62  ;;  %v2214_v18 = vrot.slane %v3647_v14, %v2823_v62 }
 0x211   :  { %v2149_v7 = vadd.f32 %v2147_v55, %v2121_v37  ;;  %v2150_v0 = vadd.f32 %v2148_v33, %v2122_v39  ;;  %v2161_v24 = vadd.f32 %v2159_v30, %v2133_v25  ;;  %v2162_v29 = vadd.f32 %v2160_v49, %v2134_v15 }
 0x212   :  { %v2170_v35 = vrot.slane %v3644_v48, %v2804_v50  ;;  %v2174_v34 = vrot.slane %v3647_v14, %v2804_v50  ;;  %v2182_v47 = vrot.slane %v3644_v48, %v2806_v51  ;;  %v2186_v1 = vrot.slane %v3647_v14, %v2806_v51 }
 0x213   :  { %v2203_v11 = vmul.f32 %v2198_v19, %v2193_v27  ;;  %v2204_v52 = vmul.f32 %v2202_v36, %v2193_v27  ;;  %v2223_v31 = vsel %vm1121_vm7, %v2220_v5, %v2222_v32  ;;  %v2224_v6 = vsel %vm1121_vm7, %v2222_v32, %v2220_v5 }
 0x214   :  { %v2175_v3 = vmul.f32 %v2170_v35, %v3667_v23  ;;  %v2176_v16 = vmul.f32 %v2174_v34, %v3667_v23  ;;  %v2187_v22 = vmul.f32 %v2182_v47, %v3667_v23  ;;  %v2188_v8 = vmul.f32 %v2186_v1, %v3667_v23 }
 0x215   :  { %v2215_v48 = vmul.f32 %v2210_v12, %v2193_v27  ;;  %v2216_v46 = vmul.f32 %v2214_v18, %v2193_v27  ;;  %v2225_v14 = vmul.f32 %v2223_v31, %v3821_v4  ;;  %v2226_v20 = vmul.f32 %v2224_v6, %v3822_v59  ;;  %v2285_v27 = vpop.permute.xlu1 %2284 }
 0x216   :  { %v2177_v10 = vadd.f32 %v2175_v3, %v2149_v7  ;;  %v2178_v44 = vadd.f32 %v2176_v16, %v2150_v0  ;;  %v2189_v17 = vadd.f32 %v2187_v22, %v2161_v24  ;;  %v2190_v38 = vadd.f32 %v2188_v8, %v2162_v29 }
 0x217   :  { %v2234_v40 = vrot.slane %v2225_v14, %v2788_v41  ;;  %v2238_v21 = vrot.slane %v2226_v20, %v2788_v41  ;;  %v2246_v9 = vrot.slane %v2225_v14, %v2808_v54  ;;  %v2250_v63 = vrot.slane %v2226_v20, %v2808_v54 }
 0x218   :  { %v2205_v23 = vadd.f32 %v2203_v11, %v2177_v10  ;;  %v2206_v2 = vadd.f32 %v2204_v52, %v2178_v44  ;;  %v2217_v5 = vadd.f32 %v2215_v48, %v2189_v17  ;;  %v2218_v61 = vadd.f32 %v2216_v46, %v2190_v38  ;;  %v2494_v17 = vld [vmem:[#allocation2] sm:$0xff] }
 0x219   :  { %v2239_v60 = vmul.f32 %v2234_v40, %v2229_v53  ;;  %v2240_v45 = vmul.f32 %v2238_v21, %v2229_v53  ;;  %v2251_v26 = vmul.f32 %v2246_v9, %v2229_v53  ;;  %v2252_v13 = vmul.f32 %v2250_v63, %v2229_v53  ;;  %v2495_v40 = vld [vmem:[#allocation2 + $0x8] sm:$0xff] }
 0x21a   :  { %v2262_v56 = vrot.slane %v2225_v14, %v2790_v42  ;;  %v2266_v43 = vrot.slane %v2226_v20, %v2790_v42  ;;  %v2274_v41 = vrot.slane %v2225_v14, %v2816_v57  ;;  %v2278_v55 = vrot.slane %v2226_v20, %v2816_v57  ;;  %v2313_v57 = vpop.permute.xlu0 %2312 }
 0x21b   :  { %v2242_v33 = vadd.f32 %v2240_v45, %v2206_v2  ;;  %v2254_v54 = vadd.f32 %v2252_v13, %v2218_v61  ;;  %v2241_v37 = vadd.f32 %v2239_v60, %v2205_v23  ;;  %v2253_v39 = vadd.f32 %v2251_v26, %v2217_v5 }
 0x21c   :  { %v2268_v25 = vmul.f32 %v2266_v43, %v2257_v28  ;;  %v2280_v15 = vmul.f32 %v2278_v55, %v2257_v28  ;;  %v2267_v30 = vmul.f32 %v2262_v56, %v2257_v28  ;;  %v2279_v49 = vmul.f32 %v2274_v41, %v2257_v28 }
 0x21d   :  { %v2330_v19 = vrot.slane %v2225_v14, %v2823_v62  ;;  %v2334_v36 = vrot.slane %v2226_v20, %v2823_v62  ;;  %v2290_v42 = vrot.slane %v2225_v14, %v2804_v50  ;;  %v2294_v32 = vrot.slane %v2226_v20, %v2804_v50 }
 0x21e   :  { %v2270_v12 = vadd.f32 %v2268_v25, %v2242_v33  ;;  %v2282_v18 = vadd.f32 %v2280_v15, %v2254_v54  ;;  %v2302_v7 = vrot.slane %v2225_v14, %v2806_v51  ;;  %v2306_v0 = vrot.slane %v2226_v20, %v2806_v51 }
 0x21f   :  { %v2269_v24 = vadd.f32 %v2267_v30, %v2241_v37  ;;  %v2281_v29 = vadd.f32 %v2279_v49, %v2253_v39  ;;  %v2295_v35 = vmul.f32 %v2290_v42, %v2285_v27  ;;  %v2296_v34 = vmul.f32 %v2294_v32, %v2285_v27 }
 0x220   :  { %v2318_v47 = vrot.slane %v2225_v14, %v2818_v58  ;;  %v2322_v62 = vrot.slane %v2226_v20, %v2818_v58  ;;  %v2307_v1 = vmul.f32 %v2302_v7, %v2285_v27  ;;  %v2308_v11 = vmul.f32 %v2306_v0, %v2285_v27 }
 0x221   :  { %v2335_v52 = vmul.f32 %v2330_v19, %v2313_v57  ;;  %v2336_v31 = vmul.f32 %v2334_v36, %v2313_v57  ;;  %v2297_v6 = vadd.f32 %v2295_v35, %v2269_v24  ;;  %v2298_v3 = vadd.f32 %v2296_v34, %v2270_v12 }
 0x222   :  { %v2309_v50 = vadd.f32 %v2307_v1, %v2281_v29  ;;  %v2310_v16 = vadd.f32 %v2308_v11, %v2282_v18  ;;  %v2323_v22 = vmul.f32 %v2318_v47, %v2313_v57  ;;  %v2324_v8 = vmul.f32 %v2322_v62, %v2313_v57 }
 0x224   :  { %v2337_v48 = vadd.f32 %v2335_v52, %v2309_v50  ;;  %v2338_v51 = vadd.f32 %v2336_v31, %v2310_v16  ;;  %v2325_v46 = vadd.f32 %v2323_v22, %v2297_v6  ;;  %v2326_v4 = vadd.f32 %v2324_v8, %v2298_v3 }
 0x226   :  { %v2341_v59 = vrot.slane %v2337_v48, 4  ;;  %v2342_v10 = vrot.slane %v2338_v51, 4 }
 0x228   :  { %v2345_v14 = vsel %vm1255_vm8, %v2325_v46, %v2341_v59  ;;  %v2346_v58 = vsel %vm1255_vm8, %v2326_v4, %v2342_v10 }
 0x229   :  { %v2347_v20 = vmax.f32 %v2345_v14, 0.0  ;;  %v2348_v44 = vmax.f32 %v2346_v58, 0.0 }
 0x22b   :  { %v2349_v38 = vadd.f32 %v2494_v17, %v2347_v20  ;;  %v2350_v21 = vadd.f32 %v2495_v40, %v2348_v44 }
 0x22d   :  { %2351 = vst [vmem:[#allocation8] sm:$0xff] %v2349_v38  ;;  %2352 = vst [vmem:[#allocation8 + $0x8] sm:$0xff] %v2350_v21 }
 0x22e   :  { %2567 = shalt.err (!%p2564_p5)
}
 0x22f   :  { %2362 = dma.vmem_to_hbm [thread:$0]  %s2360_s14, 256, %s3748_s4, [#allocation4]  }
 0x230   :  { %2580 = dma.done.wait [#allocation4], 256  }
 0x231   :  { %2581 = vsyncadd [#allocation4], 4294967040 }
 0x232   :  { %2366 = vsyncpa [#allocation3], 1 }
 0x233   :  { %2367 = vsyncpa [#allocation6], 1 }
 0x234   :  { %2368 = vsyncpa [#allocation4], 1 }

</bundles_post_ra>
